<compile_context>
chip_gen: v5e
topology: v5e:2x2
jax: 0.10.0
libtpu: 0.0.40
codegen_flags: <defaults>
</compile_context>

<pallas_src>
import functools

import jax
import jax.numpy as jnp
from jax.experimental import pallas as pl
from jax.experimental.pallas import tpu as pltpu


_VMEM = pl.BlockSpec(memory_space=pltpu.MemorySpace.VMEM)
_PARAM_NAMES = ("w1", "b1", "wz", "bz", "wr", "br", "wc", "bc")

# dot_general dimension numbers for 2-D operands.
_NT = (((1,), (1,)), ((), ()))   # A @ B.T
_TN = (((0,), (0,)), ((), ()))   # A.T @ B


# ----------------------------- fused Pallas kernel -----------------------------

def _mt3_fused_kernel(x12_ref, xe_ref, lab_ref,
                      w1_ref, b1_ref, wz_ref, bz_ref, wr_ref, br_ref,
                      wc_ref, bc_ref,
                      logits_ref, byol_ref, ce_ref,
                      w1s, b1s, wzs, bzs, wrs, brs,
                      *, inner_steps, inner_lr, num_classes):
    """Whole MT3 forward for one task.

    Inner SGD loop (fwd + hand-derived BYOL backward + update) with the adapted
    weights resident in VMEM scratch, then final BYOL eval and classifier + masked
    mean-CE, all in one launch.  x12/xe arrive pre-cast to bf16 (cast hoisted to
    the wrapper); weight casts stay in-kernel (VPU filler hidden under the MXU).
    """
    tb = x12_ref.shape[0]
    b = tb // 2                      # per-augmentation batch (B); 2B rows stacked
    inv_b = 1.0 / float(b)
    lr = inner_lr

    # Inner-loop weights live in VMEM scratch for the whole kernel (no HBM
    # round-trips between SGD steps).
    w1s[...] = w1_ref[...]
    b1s[...] = b1_ref[...]
    wzs[...] = wz_ref[...]
    bzs[...] = bz_ref[...]
    wrs[...] = wr_ref[...]
    brs[...] = br_ref[...]

    def encode(x16, w1, b1, wz, bz, wr, br):
        # bf16 MXU operands, f32 accumulation (bf16-native MXU on v6e/v7x).
        f = jnp.maximum(
            jnp.dot(x16, w1.astype(jnp.bfloat16),
                    preferred_element_type=jnp.float32) + b1, 0.0)
        z = jnp.dot(f.astype(jnp.bfloat16), wz.astype(jnp.bfloat16),
                    preferred_element_type=jnp.float32) + bz
        r = jnp.dot(z.astype(jnp.bfloat16), wr.astype(jnp.bfloat16),
                    preferred_element_type=jnp.float32) + br
        return f, z, r

    def byol_stats(z, r):
        # F.normalize(., dim=1, eps=1e-12): rsqrt on ||.||^2 clamped at 1e-24
        # (== 1 / max(||.||, 1e-12)); rsqrt runs on the EUP slot.
        inv_nr = jax.lax.rsqrt(jnp.maximum(jnp.sum(r * r, -1, keepdims=True), 1e-24))
        inv_nz = jax.lax.rsqrt(jnp.maximum(jnp.sum(z * z, -1, keepdims=True), 1e-24))
        rn = r * inv_nr
        zn = z * inv_nz
        # Pair each augmentation's prediction with the OTHER augmentation's
        # (detached) projection: rotating the (2B, P) stack by B along sublanes
        # swaps the two halves (XLU roll; B is a multiple of 8 here).
        zn_sw = pltpu.roll(zn, shift=b, axis=0)
        s = jnp.sum(rn * zn_sw, -1, keepdims=True)      # (2B, 1)
        return rn, zn_sw, s, inv_nr

    # Inner SGD loop.  inner_steps is a small static int -> trace-time unroll;
    # per-iteration state lives in the scratch refs so live ranges stay bounded.
    # TODO(synk): switch to pl.loop / lax.fori_loop if inner_steps grows large.
    for _ in range(inner_steps):
        x16 = x12_ref[...]
        w1 = w1s[...]; b1 = b1s[...]
        wz = wzs[...]; bz = bzs[...]
        wr = wrs[...]; br = brs[...]
        f, z, r = encode(x16, w1, b1, wz, bz, wr, br)
        rn, zn_sw, s, inv_nr = byol_stats(z, r)

        # d(mean BYOL)/dr with the projection side detached (matches .detach()).
        gr = (-2.0 * inv_b) * (zn_sw - s * rn) * inv_nr
        gr16 = gr.astype(jnp.bfloat16)
        gwr = jax.lax.dot_general(z.astype(jnp.bfloat16), gr16, _TN,
                                  preferred_element_type=jnp.float32)
        gbr = jnp.sum(gr, axis=0, keepdims=True)
        gz = jax.lax.dot_general(gr16, wr.astype(jnp.bfloat16), _NT,
                                 preferred_element_type=jnp.float32)
        gz16 = gz.astype(jnp.bfloat16)
        gwz = jax.lax.dot_general(f.astype(jnp.bfloat16), gz16, _TN,
                                  preferred_element_type=jnp.float32)
        gbz = jnp.sum(gz, axis=0, keepdims=True)
        gf = jax.lax.dot_general(gz16, wz.astype(jnp.bfloat16), _NT,
                                 preferred_element_type=jnp.float32)
        gh = jnp.where(f > 0.0, gf, 0.0)
        gh16 = gh.astype(jnp.bfloat16)
        gw1 = jax.lax.dot_general(x16, gh16, _TN,
                                  preferred_element_type=jnp.float32)
        gb1 = jnp.sum(gh, axis=0, keepdims=True)

        # Fused SGD update: weights never leave VMEM between steps.
        w1s[...] = w1 - lr * gw1
        b1s[...] = b1 - lr * gb1
        wzs[...] = wz - lr * gwz
        bzs[...] = bz - lr * gbz
        wrs[...] = wr - lr * gwr
        brs[...] = br - lr * gbr

    # Final (non-adapting) BYOL evaluation with the adapted weights.
    _, zf, rf = encode(x12_ref[...], w1s[...], b1s[...], wzs[...], bzs[...],
                       wrs[...], brs[...])
    _, _, sf, _ = byol_stats(zf, rf)
    # mean_i(loss1_i + loss2_i) = 4 - (2/B) * sum over all 2B rows of s
    byol_ref[...] = 4.0 - 2.0 * inv_b * jnp.sum(sf, axis=0, keepdims=True)

    # Classifier head (wc/bc are never adapted by the BYOL inner loop) + masked CE.
    fe = jnp.maximum(
        jnp.dot(xe_ref[...], w1s[...].astype(jnp.bfloat16),
                preferred_element_type=jnp.float32) + b1s[...], 0.0)
    logits = jnp.dot(fe.astype(jnp.bfloat16), wc_ref[...].astype(jnp.bfloat16),
                     preferred_element_type=jnp.float32) + bc_ref[...]
    logits_ref[...] = logits                              # lane-dense (B, 128) store

    nb, cpad = logits.shape
    col = jax.lax.broadcasted_iota(jnp.int32, (nb, cpad), 1)
    valid = col < num_classes                             # padded class lanes
    neg = jnp.finfo(jnp.float32).min
    m = jnp.max(jnp.where(valid, logits, neg), axis=-1, keepdims=True)
    e = jnp.where(valid, jnp.exp(logits - m), 0.0)        # masked lanes contribute 0
    lse = m + jnp.log(jnp.sum(e, axis=-1, keepdims=True))
    lab = lab_ref[...].astype(jnp.int32)                  # (B, 1); one-hot in-kernel
    picked = jnp.sum(jnp.where(col == lab, logits, 0.0), axis=-1, keepdims=True)
    # TODO(synk): the two (1,1) scalar outputs could move to SMEM-space outputs;
    # with a single fused launch the masked 1-lane stores are negligible.
    ce_ref[...] = jnp.sum(lse - picked, axis=0, keepdims=True) * (1.0 / nb)


# ------------------- pure-JAX reference (meta-backward only) -------------------

def _mt3_reference(x12, xe, w1, b1, wz, bz, wr, br, wc_p, bc_p, *, onehot,
                   inner_steps, inner_lr, num_classes):
    """f32 reference of the fused kernel.  Used only inside the custom_vjp
    backward: jax.vjp of this function yields the second-order MAML meta-gradient
    (backprop through the unrolled inner SGD, Hessian terms included), so the
    Pallas primal never has to expose per-step activations."""
    x12 = x12.astype(jnp.float32)
    xe = xe.astype(jnp.float32)
    b = x12.shape[0] // 2

    def byol_mean(ip):
        w1_, b1_, wz_, bz_, wr_, br_ = ip
        f = jnp.maximum(x12 @ w1_ + b1_, 0.0)
        z = f @ wz_ + bz_
        r = z @ wr_ + br_
        rn = r * jax.lax.rsqrt(jnp.maximum(jnp.sum(r * r, -1, keepdims=True), 1e-24))
        zd = jax.lax.stop_gradient(z)                    # matches z.detach()
        zn = zd * jax.lax.rsqrt(jnp.maximum(jnp.sum(zd * zd, -1, keepdims=True),
                                            1e-24))
        zn_sw = jnp.concatenate([zn[b:], zn[:b]], axis=0)
        return 4.0 - (2.0 / b) * jnp.sum(rn * zn_sw)

    inner = (w1, b1, wz, bz, wr, br)
    for _ in range(inner_steps):
        g = jax.grad(byol_mean)(inner)
        inner = tuple(p - inner_lr * gp for p, gp in zip(inner, g))
    byol = byol_mean(inner)

    fe = jnp.maximum(xe @ inner[0] + inner[1], 0.0)
    logits = fe @ wc_p + bc_p
    cpad = logits.shape[-1]
    valid = (jnp.arange(cpad) < num_classes)[None, :]
    neg = jnp.finfo(jnp.float32).min
    m = jnp.max(jnp.where(valid, logits, neg), axis=-1, keepdims=True)
    e = jnp.where(valid, jnp.exp(logits - m), 0.0)
    lse = m + jnp.log(jnp.sum(e, axis=-1, keepdims=True))
    picked = jnp.sum(onehot * logits, axis=-1, keepdims=True)
    ce = jnp.mean(lse - picked)
    return logits, byol, ce


# --------------------- pallas_call wrapper + custom_vjp -------------------------

def _make_mt3_forward(inner_steps, inner_lr, num_classes):
    kernel = functools.partial(_mt3_fused_kernel, inner_steps=inner_steps,
                               inner_lr=inner_lr, num_classes=num_classes)

    def run_pallas(x12, xe, labels_f, w1, b1, wz, bz, wr, br, wc_p, bc_p):
        assert x12.shape[0] % 2 == 0
        nb = xe.shape[0]
        d = x12.shape[1]
        hid = w1.shape[1]
        proj = wz.shape[1]
        cpad = wc_p.shape[1]
        # Everything fits easily in VMEM at these sizes -> one grid-less launch.
        # TODO(synk): for realistic D=C*H*W, tile the first matmul over D
        # (K-grid + f32 VMEM accumulator, K-tile re-derived for v7x's 64 MiB VMEM,
        # vmem_limit_bytes via pltpu.CompilerParams) and add a "parallel"
        # task/batch grid axis so v7x's second TensorCore is used.  On v5e, stream
        # bf16 weight copies from HBM (f32 master kept for the SGD update).
        return pl.pallas_call(
            kernel,
            out_shape=(
                jax.ShapeDtypeStruct((nb, cpad), jnp.float32),   # padded logits
                jax.ShapeDtypeStruct((1, 1), jnp.float32),       # mean BYOL loss
                jax.ShapeDtypeStruct((1, 1), jnp.float32),       # mean CE loss
            ),
            in_specs=[_VMEM] * 11,
            out_specs=(_VMEM, _VMEM, _VMEM),
            scratch_shapes=[
                pltpu.VMEM((d, hid), jnp.float32),     # adapted w1
                pltpu.VMEM((1, hid), jnp.float32),     # adapted b1
                pltpu.VMEM((hid, proj), jnp.float32),  # adapted wz
                pltpu.VMEM((1, proj), jnp.float32),    # adapted bz
                pltpu.VMEM((proj, proj), jnp.float32), # adapted wr
                pltpu.VMEM((1, proj), jnp.float32),    # adapted br
            ],
        )(x12, xe, labels_f, w1, b1, wz, bz, wr, br, wc_p, bc_p)

    @jax.custom_vjp
    def mt3_forward(x12, xe, labels_f, w1, b1, wz, bz, wr, br, wc_p, bc_p):
        logits, byol, ce = run_pallas(x12, xe, labels_f, w1, b1, wz, bz, wr, br,
                                      wc_p, bc_p)
        return logits, byol[0, 0], ce[0, 0]

    def _fwd(x12, xe, labels_f, w1, b1, wz, bz, wr, br, wc_p, bc_p):
        logits, byol, ce = run_pallas(x12, xe, labels_f, w1, b1, wz, bz, wr, br,
                                      wc_p, bc_p)
        res = (x12, xe, labels_f, w1, b1, wz, bz, wr, br, wc_p, bc_p)
        return (logits, byol[0, 0], ce[0, 0]), res

    def _bwd(res, cts):
        # TODO(synk): fuse this second-order meta-backward into Pallas as well
        # (requires hand-derived HVPs of the BYOL loss); kept as a plain-JAX
        # replay so correctness of the MAML gradient is guaranteed by AD.
        x12, xe, labels_f, w1, b1, wz, bz, wr, br, wc_p, bc_p = res
        cpad = wc_p.shape[1]
        onehot = jax.nn.one_hot(labels_f[:, 0].astype(jnp.int32), cpad,
                                dtype=jnp.float32)
        ref = functools.partial(_mt3_reference, onehot=onehot,
                                inner_steps=inner_steps, inner_lr=inner_lr,
                                num_classes=num_classes)
        _, vjp_fn = jax.vjp(ref, x12, xe, w1, b1, wz, bz, wr, br, wc_p, bc_p)
        gx12, gxe, gw1, gb1, gwz, gbz, gwr, gbr, gwc, gbc = vjp_fn(cts)
        return (gx12, gxe, jnp.zeros_like(labels_f),
                gw1, gb1, gwz, gbz, gwr, gbr, gwc, gbc)

    mt3_forward.defvjp(_fwd, _bwd)
    return mt3_forward


# --------------------------------- MT3 model ------------------------------------

class MT3ModelPallas:
    """JAX/Pallas re-implementation of _MT3Model.outer_train_loop (single task).

    TODO(synk): stack a leading meta_batch_size task axis into the batch dim
    (M = meta_batch*2B rows, ideally >=128) with a "parallel" grid axis so the MXU
    M-dimension fills up and weight DMAs amortise across tasks; the reference
    module is per-task, so the single-task API is kept here.
    """

    def __init__(self, spec_params, inner_steps, inner_lr, beta_byol,
                 meta_batch_size, training=False):
        self.spec_params = tuple(spec_params)
        self.inner_steps = int(inner_steps)
        self.inner_lr = float(inner_lr)
        self.beta_byol = float(beta_byol)
        self.meta_batch_size = int(meta_batch_size)
        self.training = bool(training)
        self._num_classes = int(self.spec_params[6].shape[1])
        self._cpad = max(128, ((self._num_classes + 127) // 128) * 128)
        self._mt3_forward = _make_mt3_forward(self.inner_steps, self.inner_lr,
                                              self._num_classes)
        # Single jit over the whole outer loop; inner SGD lives inside the kernel.
        self._outer_jit = jax.jit(self._outer_train_loop_impl)

    def __call__(self, task_imgs_aug1, task_imgs_aug2, images, labels):
        return self.outer_train_loop(task_imgs_aug1, task_imgs_aug2, images, labels)

    @staticmethod
    def _flatten(x):
        return x.reshape(x.shape[0], -1).astype(jnp.float32)

    def _outer_train_loop_impl(self, params, aug1, aug2, images, labels):
        x12 = jnp.concatenate([self._flatten(aug1), self._flatten(aug2)], axis=0)
        # bf16 casts hoisted out of the kernel: x12 is reused inner_steps+2 times
        # from VMEM, so cast once and halve the largest input's HBM->VMEM bytes.
        x12_bf = x12.astype(jnp.bfloat16)
        xe_bf = self._flatten(images).astype(jnp.bfloat16)
        labels_f = labels.astype(jnp.float32).reshape(-1, 1)   # one-hot built in-kernel

        ncls = self._num_classes
        cpad = self._cpad

        def objective(p):
            w1, b1, wz, bz, wr, br, wc, bc = p
            wc_p = jnp.pad(wc, ((0, 0), (0, cpad - ncls)))      # lane-align classes
            bc_p = jnp.pad(bc, ((0, 0), (0, cpad - ncls)))
            logits_p, byol, ce = self._mt3_forward(
                x12_bf, xe_bf, labels_f, w1, b1, wz, bz, wr, br, wc_p, bc_p)
            total = ce + self.beta_byol * byol
            return total / self.meta_batch_size, (logits_p[:, :ncls], total, ce, byol)

        if self.training:
            # Second-order MAML meta-gradient via the custom_vjp backward.
            (_, aux), grads = jax.value_and_grad(objective, has_aux=True)(params)
        else:
            _, aux = objective(params)
            # TODO(synk): with training=False the PyTorch reference has no populated
            # .grad; zeros keep the return structure without running a backward.
            grads = tuple(jnp.zeros_like(p) for p in params)
        logits, total, ce, byol = aux
        return logits, total, ce, byol, grads

    def outer_train_loop(self, task_imgs_aug1, task_imgs_aug2, images, labels):
        logits, total, ce, byol, grads = self._outer_jit(
            self.spec_params, task_imgs_aug1, task_imgs_aug2, images, labels)
        # Device arrays are returned (no float()/item() host syncs in the hot path).
        return logits, total, ce, byol, dict(zip(_PARAM_NAMES, grads))


def init_spec_params(key, d_in, hidden, proj, num_classes):
    # hidden/proj chosen as multiples of 128 so activations are lane-dense
    # (use multiples of 256 on v6e/v7x to fill the 256-wide MXU).
    k1, k2, k3, k4 = jax.random.split(key, 4)
    w1 = jax.random.normal(k1, (d_in, hidden), jnp.float32) / jnp.sqrt(float(d_in))
    b1 = jnp.zeros((1, hidden), jnp.float32)
    wz = jax.random.normal(k2, (hidden, proj), jnp.float32) / jnp.sqrt(float(hidden))
    bz = jnp.zeros((1, proj), jnp.float32)
    wr = jax.random.normal(k3, (proj, proj), jnp.float32) / jnp.sqrt(float(proj))
    br = jnp.zeros((1, proj), jnp.float32)
    wc = jax.random.normal(k4, (hidden, num_classes), jnp.float32) / jnp.sqrt(float(hidden))
    bc = jnp.zeros((1, num_classes), jnp.float32)
    return (w1, b1, wz, bz, wr, br, wc, bc)


if __name__ == "__main__":
    key = jax.random.PRNGKey(0)
    B, C, H, W = 8, 4, 8, 8                 # D = C*H*W = 256 (lane-aligned)
    HID, PROJ, NCLS = 128, 128, 10          # lane-aligned hidden / projection dims

    kp, k1, k2, k3, k4 = jax.random.split(key, 5)
    spec_params = init_spec_params(kp, C * H * W, HID, PROJ, NCLS)

    task_imgs_aug1 = jax.random.normal(k1, (B, C, H, W), jnp.float32)
    task_imgs_aug2 = jax.random.normal(k2, (B, C, H, W), jnp.float32)
    images = jax.random.normal(k3, (B, C, H, W), jnp.float32)
    labels = jax.random.randint(k4, (B,), 0, NCLS)

    model = MT3ModelPallas(spec_params, inner_steps=2, inner_lr=0.1,
                           beta_byol=0.1, meta_batch_size=4, training=True)

    logits, total_loss, ce_loss, byol_loss, grad_dict = model(
        task_imgs_aug1, task_imgs_aug2, images, labels)

    jax.block_until_ready((logits, total_loss, ce_loss, byol_loss, grad_dict))
    assert logits.shape == (B, NCLS)
    assert all(bool(jnp.isfinite(v).all()) for v in (total_loss, ce_loss, byol_loss))
    assert all(bool(jnp.isfinite(g).all()) for g in grad_dict.values())
    assert grad_dict["w1"].shape == spec_params[0].shape
    assert grad_dict["wc"].shape == spec_params[6].shape
    print("KERNEL_OK")
</pallas_src>

<mosaic_0001>
module attributes {stable_mosaic.version = 11 : i64} {
  func.func @_mt3_fused_kernel(%arg0: memref<16x256xbf16, #tpu.memory_space<vmem>>, %arg1: memref<8x256xbf16, #tpu.memory_space<vmem>>, %arg2: memref<8x1xf32, #tpu.memory_space<vmem>>, %arg3: memref<256x128xf32, #tpu.memory_space<vmem>>, %arg4: memref<1x128xf32, #tpu.memory_space<vmem>>, %arg5: memref<128x128xf32, #tpu.memory_space<vmem>>, %arg6: memref<1x128xf32, #tpu.memory_space<vmem>>, %arg7: memref<128x128xf32, #tpu.memory_space<vmem>>, %arg8: memref<1x128xf32, #tpu.memory_space<vmem>>, %arg9: memref<128x128xf32, #tpu.memory_space<vmem>>, %arg10: memref<1x128xf32, #tpu.memory_space<vmem>>, %arg11: memref<8x128xf32, #tpu.memory_space<vmem>>, %arg12: memref<1x1xf32, #tpu.memory_space<vmem>>, %arg13: memref<1x1xf32, #tpu.memory_space<vmem>>, %arg14: memref<256x128xf32, #tpu.memory_space<vmem>>, %arg15: memref<1x128xf32, #tpu.memory_space<vmem>>, %arg16: memref<128x128xf32, #tpu.memory_space<vmem>>, %arg17: memref<1x128xf32, #tpu.memory_space<vmem>>, %arg18: memref<128x128xf32, #tpu.memory_space<vmem>>, %arg19: memref<1x128xf32, #tpu.memory_space<vmem>>) attributes {dimension_semantics = [], scalar_prefetch = 0 : i64, scratch_operands = 6 : i64, tpu.core_type = #tpu.core_type<tc>} {
    %c0 = arith.constant 0 : index
    %c0_0 = arith.constant 0 : index
    %0 = vector.load %arg3[%c0, %c0_0] : memref<256x128xf32, #tpu.memory_space<vmem>>, vector<256x128xf32>
    %c0_1 = arith.constant 0 : index
    %c0_2 = arith.constant 0 : index
    %1 = vector.load %arg14[%c0_1, %c0_2] : memref<256x128xf32, #tpu.memory_space<vmem>>, vector<256x128xf32>
    tpu.vector_store %arg14[%c0_1, %c0_2], %0 {strides = array<i32>} : memref<256x128xf32, #tpu.memory_space<vmem>>, vector<256x128xf32>,
    %c0_3 = arith.constant 0 : index
    %c0_4 = arith.constant 0 : index
    %2 = vector.load %arg4[%c0_3, %c0_4] : memref<1x128xf32, #tpu.memory_space<vmem>>, vector<1x128xf32>
    %c0_5 = arith.constant 0 : index
    %c0_6 = arith.constant 0 : index
    %3 = vector.load %arg15[%c0_5, %c0_6] : memref<1x128xf32, #tpu.memory_space<vmem>>, vector<1x128xf32>
    tpu.vector_store %arg15[%c0_5, %c0_6], %2 {strides = array<i32>} : memref<1x128xf32, #tpu.memory_space<vmem>>, vector<1x128xf32>,
    %c0_7 = arith.constant 0 : index
    %c0_8 = arith.constant 0 : index
    %4 = vector.load %arg5[%c0_7, %c0_8] : memref<128x128xf32, #tpu.memory_space<vmem>>, vector<128x128xf32>
    %c0_9 = arith.constant 0 : index
    %c0_10 = arith.constant 0 : index
    %5 = vector.load %arg16[%c0_9, %c0_10] : memref<128x128xf32, #tpu.memory_space<vmem>>, vector<128x128xf32>
    tpu.vector_store %arg16[%c0_9, %c0_10], %4 {strides = array<i32>} : memref<128x128xf32, #tpu.memory_space<vmem>>, vector<128x128xf32>,
    %c0_11 = arith.constant 0 : index
    %c0_12 = arith.constant 0 : index
    %6 = vector.load %arg6[%c0_11, %c0_12] : memref<1x128xf32, #tpu.memory_space<vmem>>, vector<1x128xf32>
    %c0_13 = arith.constant 0 : index
    %c0_14 = arith.constant 0 : index
    %7 = vector.load %arg17[%c0_13, %c0_14] : memref<1x128xf32, #tpu.memory_space<vmem>>, vector<1x128xf32>
    tpu.vector_store %arg17[%c0_13, %c0_14], %6 {strides = array<i32>} : memref<1x128xf32, #tpu.memory_space<vmem>>, vector<1x128xf32>,
    %c0_15 = arith.constant 0 : index
    %c0_16 = arith.constant 0 : index
    %8 = vector.load %arg7[%c0_15, %c0_16] : memref<128x128xf32, #tpu.memory_space<vmem>>, vector<128x128xf32>
    %c0_17 = arith.constant 0 : index
    %c0_18 = arith.constant 0 : index
    %9 = vector.load %arg18[%c0_17, %c0_18] : memref<128x128xf32, #tpu.memory_space<vmem>>, vector<128x128xf32>
    tpu.vector_store %arg18[%c0_17, %c0_18], %8 {strides = array<i32>} : memref<128x128xf32, #tpu.memory_space<vmem>>, vector<128x128xf32>,
    %c0_19 = arith.constant 0 : index
    %c0_20 = arith.constant 0 : index
    %10 = vector.load %arg8[%c0_19, %c0_20] : memref<1x128xf32, #tpu.memory_space<vmem>>, vector<1x128xf32>
    %c0_21 = arith.constant 0 : index
    %c0_22 = arith.constant 0 : index
    %11 = vector.load %arg19[%c0_21, %c0_22] : memref<1x128xf32, #tpu.memory_space<vmem>>, vector<1x128xf32>
    tpu.vector_store %arg19[%c0_21, %c0_22], %10 {strides = array<i32>} : memref<1x128xf32, #tpu.memory_space<vmem>>, vector<1x128xf32>,
    %c0_23 = arith.constant 0 : index
    %c0_24 = arith.constant 0 : index
    %12 = vector.load %arg0[%c0_23, %c0_24] : memref<16x256xbf16, #tpu.memory_space<vmem>>, vector<16x256xbf16>
    %c0_25 = arith.constant 0 : index
    %c0_26 = arith.constant 0 : index
    %13 = vector.load %arg14[%c0_25, %c0_26] : memref<256x128xf32, #tpu.memory_space<vmem>>, vector<256x128xf32>
    %c0_27 = arith.constant 0 : index
    %c0_28 = arith.constant 0 : index
    %14 = vector.load %arg15[%c0_27, %c0_28] : memref<1x128xf32, #tpu.memory_space<vmem>>, vector<1x128xf32>
    %c0_29 = arith.constant 0 : index
    %c0_30 = arith.constant 0 : index
    %15 = vector.load %arg16[%c0_29, %c0_30] : memref<128x128xf32, #tpu.memory_space<vmem>>, vector<128x128xf32>
    %c0_31 = arith.constant 0 : index
    %c0_32 = arith.constant 0 : index
    %16 = vector.load %arg17[%c0_31, %c0_32] : memref<1x128xf32, #tpu.memory_space<vmem>>, vector<1x128xf32>
    %c0_33 = arith.constant 0 : index
    %c0_34 = arith.constant 0 : index
    %17 = vector.load %arg18[%c0_33, %c0_34] : memref<128x128xf32, #tpu.memory_space<vmem>>, vector<128x128xf32>
    %c0_35 = arith.constant 0 : index
    %c0_36 = arith.constant 0 : index
    %18 = vector.load %arg19[%c0_35, %c0_36] : memref<1x128xf32, #tpu.memory_space<vmem>>, vector<1x128xf32>
    %19 = arith.truncf %13 : vector<256x128xf32> to vector<256x128xbf16>
    %cst = arith.constant dense<0.000000e+00> : vector<16x128xf32>
    %20 = tpu.matmul %12, %19, %cst {dimension_numbers = #tpu.dot_dimension_numbers<[1], [0], [0], [1], [0, 0, 1, 1], [], []>} : vector<16x256xbf16>, vector<256x128xbf16>, vector<16x128xf32> -> vector<16x128xf32>
    %21 = vector.broadcast %14 : vector<1x128xf32> to vector<16x128xf32>
    %22 = arith.addf %20, %21 : vector<16x128xf32>
    %cst_37 = arith.constant 0.000000e+00 : f32
    %23 = vector.broadcast %cst_37 : f32 to vector<16x128xf32>
    %24 = arith.maximumf %22, %23 : vector<16x128xf32>
    %25 = arith.truncf %24 : vector<16x128xf32> to vector<16x128xbf16>
    %26 = arith.truncf %15 : vector<128x128xf32> to vector<128x128xbf16>
    %cst_38 = arith.constant dense<0.000000e+00> : vector<16x128xf32>
    %27 = tpu.matmul %25, %26, %cst_38 {dimension_numbers = #tpu.dot_dimension_numbers<[1], [0], [0], [1], [0, 0, 1, 1], [], []>} : vector<16x128xbf16>, vector<128x128xbf16>, vector<16x128xf32> -> vector<16x128xf32>
    %28 = vector.broadcast %16 : vector<1x128xf32> to vector<16x128xf32>
    %29 = arith.addf %27, %28 : vector<16x128xf32>
    %30 = arith.truncf %29 : vector<16x128xf32> to vector<16x128xbf16>
    %31 = arith.truncf %17 : vector<128x128xf32> to vector<128x128xbf16>
    %cst_39 = arith.constant dense<0.000000e+00> : vector<16x128xf32>
    %32 = tpu.matmul %30, %31, %cst_39 {dimension_numbers = #tpu.dot_dimension_numbers<[1], [0], [0], [1], [0, 0, 1, 1], [], []>} : vector<16x128xbf16>, vector<128x128xbf16>, vector<16x128xf32> -> vector<16x128xf32>
    %33 = vector.broadcast %18 : vector<1x128xf32> to vector<16x128xf32>
    %34 = arith.addf %32, %33 : vector<16x128xf32>
    %35 = arith.mulf %34, %34 : vector<16x128xf32>
    %cst_40 = arith.constant dense<0.000000e+00> : vector<16xf32>
    %36 = vector.multi_reduction <add>, %35, %cst_40 [1] : vector<16x128xf32> to vector<16xf32>
    %37 = vector.shape_cast %36 : vector<16xf32> to vector<16x1xf32>
    %cst_41 = arith.constant 1.000000e-24 : f32
    %38 = vector.broadcast %cst_41 : f32 to vector<16x1xf32>
    %39 = arith.maximumf %37, %38 : vector<16x1xf32>
    %40 = math.rsqrt %39 : vector<16x1xf32>
    %41 = arith.mulf %29, %29 : vector<16x128xf32>
    %cst_42 = arith.constant dense<0.000000e+00> : vector<16xf32>
    %42 = vector.multi_reduction <add>, %41, %cst_42 [1] : vector<16x128xf32> to vector<16xf32>
    %43 = vector.shape_cast %42 : vector<16xf32> to vector<16x1xf32>
    %cst_43 = arith.constant 1.000000e-24 : f32
    %44 = vector.broadcast %cst_43 : f32 to vector<16x1xf32>
    %45 = arith.maximumf %43, %44 : vector<16x1xf32>
    %46 = math.rsqrt %45 : vector<16x1xf32>
    %47 = vector.broadcast %40 : vector<16x1xf32> to vector<16x128xf32>
    %48 = arith.mulf %34, %47 : vector<16x128xf32>
    %49 = vector.broadcast %46 : vector<16x1xf32> to vector<16x128xf32>
    %50 = arith.mulf %29, %49 : vector<16x128xf32>
    %c8_i32 = arith.constant 8 : i32
    %51 = tpu.dynamic_rotate %50 by %c8_i32 dim 0 : vector<16x128xf32>, i32 -> vector<16x128xf32>
    %52 = arith.mulf %48, %51 : vector<16x128xf32>
    %cst_44 = arith.constant dense<0.000000e+00> : vector<16xf32>
    %53 = vector.multi_reduction <add>, %52, %cst_44 [1] : vector<16x128xf32> to vector<16xf32>
    %54 = vector.shape_cast %53 : vector<16xf32> to vector<16x1xf32>
    %55 = vector.broadcast %54 : vector<16x1xf32> to vector<16x128xf32>
    %56 = arith.mulf %55, %48 : vector<16x128xf32>
    %57 = arith.subf %51, %56 : vector<16x128xf32>
    %cst_45 = arith.constant -2.500000e-01 : f32
    %58 = vector.broadcast %cst_45 : f32 to vector<16x128xf32>
    %59 = arith.mulf %58, %57 : vector<16x128xf32>
    %60 = vector.broadcast %40 : vector<16x1xf32> to vector<16x128xf32>
    %61 = arith.mulf %59, %60 : vector<16x128xf32>
    %62 = arith.truncf %61 : vector<16x128xf32> to vector<16x128xbf16>
    %63 = arith.truncf %29 : vector<16x128xf32> to vector<16x128xbf16>
    %cst_46 = arith.constant dense<0.000000e+00> : vector<128x128xf32>
    %64 = tpu.matmul %63, %62, %cst_46 {dimension_numbers = #tpu.dot_dimension_numbers<[0], [0], [1], [1], [0, 1, 1, 1], [], []>} : vector<16x128xbf16>, vector<16x128xbf16>, vector<128x128xf32> -> vector<128x128xf32>
    %cst_47 = arith.constant dense<0.000000e+00> : vector<128xf32>
    %65 = vector.multi_reduction <add>, %61, %cst_47 [0] : vector<16x128xf32> to vector<128xf32>
    %66 = vector.shape_cast %65 : vector<128xf32> to vector<1x128xf32>
    %67 = arith.truncf %17 : vector<128x128xf32> to vector<128x128xbf16>
    %cst_48 = arith.constant dense<0.000000e+00> : vector<16x128xf32>
    %68 = tpu.matmul %62, %67, %cst_48 {dimension_numbers = #tpu.dot_dimension_numbers<[1], [1], [0], [0], [0, 0, 1, 0], [], []>} : vector<16x128xbf16>, vector<128x128xbf16>, vector<16x128xf32> -> vector<16x128xf32>
    %69 = arith.truncf %68 : vector<16x128xf32> to vector<16x128xbf16>
    %70 = arith.truncf %24 : vector<16x128xf32> to vector<16x128xbf16>
    %cst_49 = arith.constant dense<0.000000e+00> : vector<128x128xf32>
    %71 = tpu.matmul %70, %69, %cst_49 {dimension_numbers = #tpu.dot_dimension_numbers<[0], [0], [1], [1], [0, 1, 1, 1], [], []>} : vector<16x128xbf16>, vector<16x128xbf16>, vector<128x128xf32> -> vector<128x128xf32>
    %cst_50 = arith.constant dense<0.000000e+00> : vector<128xf32>
    %72 = vector.multi_reduction <add>, %68, %cst_50 [0] : vector<16x128xf32> to vector<128xf32>
    %73 = vector.shape_cast %72 : vector<128xf32> to vector<1x128xf32>
    %74 = arith.truncf %15 : vector<128x128xf32> to vector<128x128xbf16>
    %cst_51 = arith.constant dense<0.000000e+00> : vector<16x128xf32>
    %75 = tpu.matmul %69, %74, %cst_51 {dimension_numbers = #tpu.dot_dimension_numbers<[1], [1], [0], [0], [0, 0, 1, 0], [], []>} : vector<16x128xbf16>, vector<128x128xbf16>, vector<16x128xf32> -> vector<16x128xf32>
    %cst_52 = arith.constant 0.000000e+00 : f32
    %76 = vector.broadcast %cst_52 : f32 to vector<16x128xf32>
    %77 = arith.cmpf ogt, %24, %76 : vector<16x128xf32>
    %cst_53 = arith.constant 0.000000e+00 : f32
    %78 = vector.broadcast %cst_53 : f32 to vector<16x128xf32>
    %79 = arith.select %77, %75, %78 : vector<16x128xi1>, vector<16x128xf32>
    %80 = arith.truncf %79 : vector<16x128xf32> to vector<16x128xbf16>
    %cst_54 = arith.constant dense<0.000000e+00> : vector<256x128xf32>
    %81 = tpu.matmul %12, %80, %cst_54 {dimension_numbers = #tpu.dot_dimension_numbers<[0], [0], [1], [1], [0, 1, 1, 1], [], []>} : vector<16x256xbf16>, vector<16x128xbf16>, vector<256x128xf32> -> vector<256x128xf32>
    %cst_55 = arith.constant dense<0.000000e+00> : vector<128xf32>
    %82 = vector.multi_reduction <add>, %79, %cst_55 [0] : vector<16x128xf32> to vector<128xf32>
    %83 = vector.shape_cast %82 : vector<128xf32> to vector<1x128xf32>
    %cst_56 = arith.constant 1.000000e-01 : f32
    %84 = vector.broadcast %cst_56 : f32 to vector<256x128xf32>
    %85 = arith.mulf %84, %81 : vector<256x128xf32>
    %86 = arith.subf %13, %85 : vector<256x128xf32>
    %c0_57 = arith.constant 0 : index
    %c0_58 = arith.constant 0 : index
    %87 = vector.load %arg14[%c0_57, %c0_58] : memref<256x128xf32, #tpu.memory_space<vmem>>, vector<256x128xf32>
    tpu.vector_store %arg14[%c0_57, %c0_58], %86 {strides = array<i32>} : memref<256x128xf32, #tpu.memory_space<vmem>>, vector<256x128xf32>,
    %cst_59 = arith.constant 1.000000e-01 : f32
    %88 = vector.broadcast %cst_59 : f32 to vector<1x128xf32>
    %89 = arith.mulf %88, %83 : vector<1x128xf32>
    %90 = arith.subf %14, %89 : vector<1x128xf32>
    %c0_60 = arith.constant 0 : index
    %c0_61 = arith.constant 0 : index
    %91 = vector.load %arg15[%c0_60, %c0_61] : memref<1x128xf32, #tpu.memory_space<vmem>>, vector<1x128xf32>
    tpu.vector_store %arg15[%c0_60, %c0_61], %90 {strides = array<i32>} : memref<1x128xf32, #tpu.memory_space<vmem>>, vector<1x128xf32>,
    %cst_62 = arith.constant 1.000000e-01 : f32
    %92 = vector.broadcast %cst_62 : f32 to vector<128x128xf32>
    %93 = arith.mulf %92, %71 : vector<128x128xf32>
    %94 = arith.subf %15, %93 : vector<128x128xf32>
    %c0_63 = arith.constant 0 : index
    %c0_64 = arith.constant 0 : index
    %95 = vector.load %arg16[%c0_63, %c0_64] : memref<128x128xf32, #tpu.memory_space<vmem>>, vector<128x128xf32>
    tpu.vector_store %arg16[%c0_63, %c0_64], %94 {strides = array<i32>} : memref<128x128xf32, #tpu.memory_space<vmem>>, vector<128x128xf32>,
    %cst_65 = arith.constant 1.000000e-01 : f32
    %96 = vector.broadcast %cst_65 : f32 to vector<1x128xf32>
    %97 = arith.mulf %96, %73 : vector<1x128xf32>
    %98 = arith.subf %16, %97 : vector<1x128xf32>
    %c0_66 = arith.constant 0 : index
    %c0_67 = arith.constant 0 : index
    %99 = vector.load %arg17[%c0_66, %c0_67] : memref<1x128xf32, #tpu.memory_space<vmem>>, vector<1x128xf32>
    tpu.vector_store %arg17[%c0_66, %c0_67], %98 {strides = array<i32>} : memref<1x128xf32, #tpu.memory_space<vmem>>, vector<1x128xf32>,
    %cst_68 = arith.constant 1.000000e-01 : f32
    %100 = vector.broadcast %cst_68 : f32 to vector<128x128xf32>
    %101 = arith.mulf %100, %64 : vector<128x128xf32>
    %102 = arith.subf %17, %101 : vector<128x128xf32>
    %c0_69 = arith.constant 0 : index
    %c0_70 = arith.constant 0 : index
    %103 = vector.load %arg18[%c0_69, %c0_70] : memref<128x128xf32, #tpu.memory_space<vmem>>, vector<128x128xf32>
    tpu.vector_store %arg18[%c0_69, %c0_70], %102 {strides = array<i32>} : memref<128x128xf32, #tpu.memory_space<vmem>>, vector<128x128xf32>,
    %cst_71 = arith.constant 1.000000e-01 : f32
    %104 = vector.broadcast %cst_71 : f32 to vector<1x128xf32>
    %105 = arith.mulf %104, %66 : vector<1x128xf32>
    %106 = arith.subf %18, %105 : vector<1x128xf32>
    %c0_72 = arith.constant 0 : index
    %c0_73 = arith.constant 0 : index
    %107 = vector.load %arg19[%c0_72, %c0_73] : memref<1x128xf32, #tpu.memory_space<vmem>>, vector<1x128xf32>
    tpu.vector_store %arg19[%c0_72, %c0_73], %106 {strides = array<i32>} : memref<1x128xf32, #tpu.memory_space<vmem>>, vector<1x128xf32>,
    %c0_74 = arith.constant 0 : index
    %c0_75 = arith.constant 0 : index
    %108 = vector.load %arg0[%c0_74, %c0_75] : memref<16x256xbf16, #tpu.memory_space<vmem>>, vector<16x256xbf16>
    %c0_76 = arith.constant 0 : index
    %c0_77 = arith.constant 0 : index
    %109 = vector.load %arg14[%c0_76, %c0_77] : memref<256x128xf32, #tpu.memory_space<vmem>>, vector<256x128xf32>
    %c0_78 = arith.constant 0 : index
    %c0_79 = arith.constant 0 : index
    %110 = vector.load %arg15[%c0_78, %c0_79] : memref<1x128xf32, #tpu.memory_space<vmem>>, vector<1x128xf32>
    %c0_80 = arith.constant 0 : index
    %c0_81 = arith.constant 0 : index
    %111 = vector.load %arg16[%c0_80, %c0_81] : memref<128x128xf32, #tpu.memory_space<vmem>>, vector<128x128xf32>
    %c0_82 = arith.constant 0 : index
    %c0_83 = arith.constant 0 : index
    %112 = vector.load %arg17[%c0_82, %c0_83] : memref<1x128xf32, #tpu.memory_space<vmem>>, vector<1x128xf32>
    %c0_84 = arith.constant 0 : index
    %c0_85 = arith.constant 0 : index
    %113 = vector.load %arg18[%c0_84, %c0_85] : memref<128x128xf32, #tpu.memory_space<vmem>>, vector<128x128xf32>
    %c0_86 = arith.constant 0 : index
    %c0_87 = arith.constant 0 : index
    %114 = vector.load %arg19[%c0_86, %c0_87] : memref<1x128xf32, #tpu.memory_space<vmem>>, vector<1x128xf32>
    %115 = arith.truncf %109 : vector<256x128xf32> to vector<256x128xbf16>
    %cst_88 = arith.constant dense<0.000000e+00> : vector<16x128xf32>
    %116 = tpu.matmul %108, %115, %cst_88 {dimension_numbers = #tpu.dot_dimension_numbers<[1], [0], [0], [1], [0, 0, 1, 1], [], []>} : vector<16x256xbf16>, vector<256x128xbf16>, vector<16x128xf32> -> vector<16x128xf32>
    %117 = vector.broadcast %110 : vector<1x128xf32> to vector<16x128xf32>
    %118 = arith.addf %116, %117 : vector<16x128xf32>
    %cst_89 = arith.constant 0.000000e+00 : f32
    %119 = vector.broadcast %cst_89 : f32 to vector<16x128xf32>
    %120 = arith.maximumf %118, %119 : vector<16x128xf32>
    %121 = arith.truncf %120 : vector<16x128xf32> to vector<16x128xbf16>
    %122 = arith.truncf %111 : vector<128x128xf32> to vector<128x128xbf16>
    %cst_90 = arith.constant dense<0.000000e+00> : vector<16x128xf32>
    %123 = tpu.matmul %121, %122, %cst_90 {dimension_numbers = #tpu.dot_dimension_numbers<[1], [0], [0], [1], [0, 0, 1, 1], [], []>} : vector<16x128xbf16>, vector<128x128xbf16>, vector<16x128xf32> -> vector<16x128xf32>
    %124 = vector.broadcast %112 : vector<1x128xf32> to vector<16x128xf32>
    %125 = arith.addf %123, %124 : vector<16x128xf32>
    %126 = arith.truncf %125 : vector<16x128xf32> to vector<16x128xbf16>
    %127 = arith.truncf %113 : vector<128x128xf32> to vector<128x128xbf16>
    %cst_91 = arith.constant dense<0.000000e+00> : vector<16x128xf32>
    %128 = tpu.matmul %126, %127, %cst_91 {dimension_numbers = #tpu.dot_dimension_numbers<[1], [0], [0], [1], [0, 0, 1, 1], [], []>} : vector<16x128xbf16>, vector<128x128xbf16>, vector<16x128xf32> -> vector<16x128xf32>
    %129 = vector.broadcast %114 : vector<1x128xf32> to vector<16x128xf32>
    %130 = arith.addf %128, %129 : vector<16x128xf32>
    %131 = arith.mulf %130, %130 : vector<16x128xf32>
    %cst_92 = arith.constant dense<0.000000e+00> : vector<16xf32>
    %132 = vector.multi_reduction <add>, %131, %cst_92 [1] : vector<16x128xf32> to vector<16xf32>
    %133 = vector.shape_cast %132 : vector<16xf32> to vector<16x1xf32>
    %cst_93 = arith.constant 1.000000e-24 : f32
    %134 = vector.broadcast %cst_93 : f32 to vector<16x1xf32>
    %135 = arith.maximumf %133, %134 : vector<16x1xf32>
    %136 = math.rsqrt %135 : vector<16x1xf32>
    %137 = arith.mulf %125, %125 : vector<16x128xf32>
    %cst_94 = arith.constant dense<0.000000e+00> : vector<16xf32>
    %138 = vector.multi_reduction <add>, %137, %cst_94 [1] : vector<16x128xf32> to vector<16xf32>
    %139 = vector.shape_cast %138 : vector<16xf32> to vector<16x1xf32>
    %cst_95 = arith.constant 1.000000e-24 : f32
    %140 = vector.broadcast %cst_95 : f32 to vector<16x1xf32>
    %141 = arith.maximumf %139, %140 : vector<16x1xf32>
    %142 = math.rsqrt %141 : vector<16x1xf32>
    %143 = vector.broadcast %136 : vector<16x1xf32> to vector<16x128xf32>
    %144 = arith.mulf %130, %143 : vector<16x128xf32>
    %145 = vector.broadcast %142 : vector<16x1xf32> to vector<16x128xf32>
    %146 = arith.mulf %125, %145 : vector<16x128xf32>
    %c8_i32_96 = arith.constant 8 : i32
    %147 = tpu.dynamic_rotate %146 by %c8_i32_96 dim 0 : vector<16x128xf32>, i32 -> vector<16x128xf32>
    %148 = arith.mulf %144, %147 : vector<16x128xf32>
    %cst_97 = arith.constant dense<0.000000e+00> : vector<16xf32>
    %149 = vector.multi_reduction <add>, %148, %cst_97 [1] : vector<16x128xf32> to vector<16xf32>
    %150 = vector.shape_cast %149 : vector<16xf32> to vector<16x1xf32>
    %151 = vector.broadcast %150 : vector<16x1xf32> to vector<16x128xf32>
    %152 = arith.mulf %151, %144 : vector<16x128xf32>
    %153 = arith.subf %147, %152 : vector<16x128xf32>
    %cst_98 = arith.constant -2.500000e-01 : f32
    %154 = vector.broadcast %cst_98 : f32 to vector<16x128xf32>
    %155 = arith.mulf %154, %153 : vector<16x128xf32>
    %156 = vector.broadcast %136 : vector<16x1xf32> to vector<16x128xf32>
    %157 = arith.mulf %155, %156 : vector<16x128xf32>
    %158 = arith.truncf %157 : vector<16x128xf32> to vector<16x128xbf16>
    %159 = arith.truncf %125 : vector<16x128xf32> to vector<16x128xbf16>
    %cst_99 = arith.constant dense<0.000000e+00> : vector<128x128xf32>
    %160 = tpu.matmul %159, %158, %cst_99 {dimension_numbers = #tpu.dot_dimension_numbers<[0], [0], [1], [1], [0, 1, 1, 1], [], []>} : vector<16x128xbf16>, vector<16x128xbf16>, vector<128x128xf32> -> vector<128x128xf32>
    %cst_100 = arith.constant dense<0.000000e+00> : vector<128xf32>
    %161 = vector.multi_reduction <add>, %157, %cst_100 [0] : vector<16x128xf32> to vector<128xf32>
    %162 = vector.shape_cast %161 : vector<128xf32> to vector<1x128xf32>
    %163 = arith.truncf %113 : vector<128x128xf32> to vector<128x128xbf16>
    %cst_101 = arith.constant dense<0.000000e+00> : vector<16x128xf32>
    %164 = tpu.matmul %158, %163, %cst_101 {dimension_numbers = #tpu.dot_dimension_numbers<[1], [1], [0], [0], [0, 0, 1, 0], [], []>} : vector<16x128xbf16>, vector<128x128xbf16>, vector<16x128xf32> -> vector<16x128xf32>
    %165 = arith.truncf %164 : vector<16x128xf32> to vector<16x128xbf16>
    %166 = arith.truncf %120 : vector<16x128xf32> to vector<16x128xbf16>
    %cst_102 = arith.constant dense<0.000000e+00> : vector<128x128xf32>
    %167 = tpu.matmul %166, %165, %cst_102 {dimension_numbers = #tpu.dot_dimension_numbers<[0], [0], [1], [1], [0, 1, 1, 1], [], []>} : vector<16x128xbf16>, vector<16x128xbf16>, vector<128x128xf32> -> vector<128x128xf32>
    %cst_103 = arith.constant dense<0.000000e+00> : vector<128xf32>
    %168 = vector.multi_reduction <add>, %164, %cst_103 [0] : vector<16x128xf32> to vector<128xf32>
    %169 = vector.shape_cast %168 : vector<128xf32> to vector<1x128xf32>
    %170 = arith.truncf %111 : vector<128x128xf32> to vector<128x128xbf16>
    %cst_104 = arith.constant dense<0.000000e+00> : vector<16x128xf32>
    %171 = tpu.matmul %165, %170, %cst_104 {dimension_numbers = #tpu.dot_dimension_numbers<[1], [1], [0], [0], [0, 0, 1, 0], [], []>} : vector<16x128xbf16>, vector<128x128xbf16>, vector<16x128xf32> -> vector<16x128xf32>
    %cst_105 = arith.constant 0.000000e+00 : f32
    %172 = vector.broadcast %cst_105 : f32 to vector<16x128xf32>
    %173 = arith.cmpf ogt, %120, %172 : vector<16x128xf32>
    %cst_106 = arith.constant 0.000000e+00 : f32
    %174 = vector.broadcast %cst_106 : f32 to vector<16x128xf32>
    %175 = arith.select %173, %171, %174 : vector<16x128xi1>, vector<16x128xf32>
    %176 = arith.truncf %175 : vector<16x128xf32> to vector<16x128xbf16>
    %cst_107 = arith.constant dense<0.000000e+00> : vector<256x128xf32>
    %177 = tpu.matmul %108, %176, %cst_107 {dimension_numbers = #tpu.dot_dimension_numbers<[0], [0], [1], [1], [0, 1, 1, 1], [], []>} : vector<16x256xbf16>, vector<16x128xbf16>, vector<256x128xf32> -> vector<256x128xf32>
    %cst_108 = arith.constant dense<0.000000e+00> : vector<128xf32>
    %178 = vector.multi_reduction <add>, %175, %cst_108 [0] : vector<16x128xf32> to vector<128xf32>
    %179 = vector.shape_cast %178 : vector<128xf32> to vector<1x128xf32>
    %cst_109 = arith.constant 1.000000e-01 : f32
    %180 = vector.broadcast %cst_109 : f32 to vector<256x128xf32>
    %181 = arith.mulf %180, %177 : vector<256x128xf32>
    %182 = arith.subf %109, %181 : vector<256x128xf32>
    %c0_110 = arith.constant 0 : index
    %c0_111 = arith.constant 0 : index
    %183 = vector.load %arg14[%c0_110, %c0_111] : memref<256x128xf32, #tpu.memory_space<vmem>>, vector<256x128xf32>
    tpu.vector_store %arg14[%c0_110, %c0_111], %182 {strides = array<i32>} : memref<256x128xf32, #tpu.memory_space<vmem>>, vector<256x128xf32>,
    %cst_112 = arith.constant 1.000000e-01 : f32
    %184 = vector.broadcast %cst_112 : f32 to vector<1x128xf32>
    %185 = arith.mulf %184, %179 : vector<1x128xf32>
    %186 = arith.subf %110, %185 : vector<1x128xf32>
    %c0_113 = arith.constant 0 : index
    %c0_114 = arith.constant 0 : index
    %187 = vector.load %arg15[%c0_113, %c0_114] : memref<1x128xf32, #tpu.memory_space<vmem>>, vector<1x128xf32>
    tpu.vector_store %arg15[%c0_113, %c0_114], %186 {strides = array<i32>} : memref<1x128xf32, #tpu.memory_space<vmem>>, vector<1x128xf32>,
    %cst_115 = arith.constant 1.000000e-01 : f32
    %188 = vector.broadcast %cst_115 : f32 to vector<128x128xf32>
    %189 = arith.mulf %188, %167 : vector<128x128xf32>
    %190 = arith.subf %111, %189 : vector<128x128xf32>
    %c0_116 = arith.constant 0 : index
    %c0_117 = arith.constant 0 : index
    %191 = vector.load %arg16[%c0_116, %c0_117] : memref<128x128xf32, #tpu.memory_space<vmem>>, vector<128x128xf32>
    tpu.vector_store %arg16[%c0_116, %c0_117], %190 {strides = array<i32>} : memref<128x128xf32, #tpu.memory_space<vmem>>, vector<128x128xf32>,
    %cst_118 = arith.constant 1.000000e-01 : f32
    %192 = vector.broadcast %cst_118 : f32 to vector<1x128xf32>
    %193 = arith.mulf %192, %169 : vector<1x128xf32>
    %194 = arith.subf %112, %193 : vector<1x128xf32>
    %c0_119 = arith.constant 0 : index
    %c0_120 = arith.constant 0 : index
    %195 = vector.load %arg17[%c0_119, %c0_120] : memref<1x128xf32, #tpu.memory_space<vmem>>, vector<1x128xf32>
    tpu.vector_store %arg17[%c0_119, %c0_120], %194 {strides = array<i32>} : memref<1x128xf32, #tpu.memory_space<vmem>>, vector<1x128xf32>,
    %cst_121 = arith.constant 1.000000e-01 : f32
    %196 = vector.broadcast %cst_121 : f32 to vector<128x128xf32>
    %197 = arith.mulf %196, %160 : vector<128x128xf32>
    %198 = arith.subf %113, %197 : vector<128x128xf32>
    %c0_122 = arith.constant 0 : index
    %c0_123 = arith.constant 0 : index
    %199 = vector.load %arg18[%c0_122, %c0_123] : memref<128x128xf32, #tpu.memory_space<vmem>>, vector<128x128xf32>
    tpu.vector_store %arg18[%c0_122, %c0_123], %198 {strides = array<i32>} : memref<128x128xf32, #tpu.memory_space<vmem>>, vector<128x128xf32>,
    %cst_124 = arith.constant 1.000000e-01 : f32
    %200 = vector.broadcast %cst_124 : f32 to vector<1x128xf32>
    %201 = arith.mulf %200, %162 : vector<1x128xf32>
    %202 = arith.subf %114, %201 : vector<1x128xf32>
    %c0_125 = arith.constant 0 : index
    %c0_126 = arith.constant 0 : index
    %203 = vector.load %arg19[%c0_125, %c0_126] : memref<1x128xf32, #tpu.memory_space<vmem>>, vector<1x128xf32>
    tpu.vector_store %arg19[%c0_125, %c0_126], %202 {strides = array<i32>} : memref<1x128xf32, #tpu.memory_space<vmem>>, vector<1x128xf32>,
    %c0_127 = arith.constant 0 : index
    %c0_128 = arith.constant 0 : index
    %204 = vector.load %arg0[%c0_127, %c0_128] : memref<16x256xbf16, #tpu.memory_space<vmem>>, vector<16x256xbf16>
    %c0_129 = arith.constant 0 : index
    %c0_130 = arith.constant 0 : index
    %205 = vector.load %arg14[%c0_129, %c0_130] : memref<256x128xf32, #tpu.memory_space<vmem>>, vector<256x128xf32>
    %c0_131 = arith.constant 0 : index
    %c0_132 = arith.constant 0 : index
    %206 = vector.load %arg15[%c0_131, %c0_132] : memref<1x128xf32, #tpu.memory_space<vmem>>, vector<1x128xf32>
    %c0_133 = arith.constant 0 : index
    %c0_134 = arith.constant 0 : index
    %207 = vector.load %arg16[%c0_133, %c0_134] : memref<128x128xf32, #tpu.memory_space<vmem>>, vector<128x128xf32>
    %c0_135 = arith.constant 0 : index
    %c0_136 = arith.constant 0 : index
    %208 = vector.load %arg17[%c0_135, %c0_136] : memref<1x128xf32, #tpu.memory_space<vmem>>, vector<1x128xf32>
    %c0_137 = arith.constant 0 : index
    %c0_138 = arith.constant 0 : index
    %209 = vector.load %arg18[%c0_137, %c0_138] : memref<128x128xf32, #tpu.memory_space<vmem>>, vector<128x128xf32>
    %c0_139 = arith.constant 0 : index
    %c0_140 = arith.constant 0 : index
    %210 = vector.load %arg19[%c0_139, %c0_140] : memref<1x128xf32, #tpu.memory_space<vmem>>, vector<1x128xf32>
    %211 = arith.truncf %205 : vector<256x128xf32> to vector<256x128xbf16>
    %cst_141 = arith.constant dense<0.000000e+00> : vector<16x128xf32>
    %212 = tpu.matmul %204, %211, %cst_141 {dimension_numbers = #tpu.dot_dimension_numbers<[1], [0], [0], [1], [0, 0, 1, 1], [], []>} : vector<16x256xbf16>, vector<256x128xbf16>, vector<16x128xf32> -> vector<16x128xf32>
    %213 = vector.broadcast %206 : vector<1x128xf32> to vector<16x128xf32>
    %214 = arith.addf %212, %213 : vector<16x128xf32>
    %cst_142 = arith.constant 0.000000e+00 : f32
    %215 = vector.broadcast %cst_142 : f32 to vector<16x128xf32>
    %216 = arith.maximumf %214, %215 : vector<16x128xf32>
    %217 = arith.truncf %216 : vector<16x128xf32> to vector<16x128xbf16>
    %218 = arith.truncf %207 : vector<128x128xf32> to vector<128x128xbf16>
    %cst_143 = arith.constant dense<0.000000e+00> : vector<16x128xf32>
    %219 = tpu.matmul %217, %218, %cst_143 {dimension_numbers = #tpu.dot_dimension_numbers<[1], [0], [0], [1], [0, 0, 1, 1], [], []>} : vector<16x128xbf16>, vector<128x128xbf16>, vector<16x128xf32> -> vector<16x128xf32>
    %220 = vector.broadcast %208 : vector<1x128xf32> to vector<16x128xf32>
    %221 = arith.addf %219, %220 : vector<16x128xf32>
    %222 = arith.truncf %221 : vector<16x128xf32> to vector<16x128xbf16>
    %223 = arith.truncf %209 : vector<128x128xf32> to vector<128x128xbf16>
    %cst_144 = arith.constant dense<0.000000e+00> : vector<16x128xf32>
    %224 = tpu.matmul %222, %223, %cst_144 {dimension_numbers = #tpu.dot_dimension_numbers<[1], [0], [0], [1], [0, 0, 1, 1], [], []>} : vector<16x128xbf16>, vector<128x128xbf16>, vector<16x128xf32> -> vector<16x128xf32>
    %225 = vector.broadcast %210 : vector<1x128xf32> to vector<16x128xf32>
    %226 = arith.addf %224, %225 : vector<16x128xf32>
    %227 = arith.mulf %226, %226 : vector<16x128xf32>
    %cst_145 = arith.constant dense<0.000000e+00> : vector<16xf32>
    %228 = vector.multi_reduction <add>, %227, %cst_145 [1] : vector<16x128xf32> to vector<16xf32>
    %229 = vector.shape_cast %228 : vector<16xf32> to vector<16x1xf32>
    %cst_146 = arith.constant 1.000000e-24 : f32
    %230 = vector.broadcast %cst_146 : f32 to vector<16x1xf32>
    %231 = arith.maximumf %229, %230 : vector<16x1xf32>
    %232 = math.rsqrt %231 : vector<16x1xf32>
    %233 = arith.mulf %221, %221 : vector<16x128xf32>
    %cst_147 = arith.constant dense<0.000000e+00> : vector<16xf32>
    %234 = vector.multi_reduction <add>, %233, %cst_147 [1] : vector<16x128xf32> to vector<16xf32>
    %235 = vector.shape_cast %234 : vector<16xf32> to vector<16x1xf32>
    %cst_148 = arith.constant 1.000000e-24 : f32
    %236 = vector.broadcast %cst_148 : f32 to vector<16x1xf32>
    %237 = arith.maximumf %235, %236 : vector<16x1xf32>
    %238 = math.rsqrt %237 : vector<16x1xf32>
    %239 = vector.broadcast %232 : vector<16x1xf32> to vector<16x128xf32>
    %240 = arith.mulf %226, %239 : vector<16x128xf32>
    %241 = vector.broadcast %238 : vector<16x1xf32> to vector<16x128xf32>
    %242 = arith.mulf %221, %241 : vector<16x128xf32>
    %c8_i32_149 = arith.constant 8 : i32
    %243 = tpu.dynamic_rotate %242 by %c8_i32_149 dim 0 : vector<16x128xf32>, i32 -> vector<16x128xf32>
    %244 = arith.mulf %240, %243 : vector<16x128xf32>
    %cst_150 = arith.constant dense<0.000000e+00> : vector<16xf32>
    %245 = vector.multi_reduction <add>, %244, %cst_150 [1] : vector<16x128xf32> to vector<16xf32>
    %246 = vector.shape_cast %245 : vector<16xf32> to vector<16x1xf32>
    %cst_151 = arith.constant dense<0.000000e+00> : vector<1xf32>
    %247 = vector.multi_reduction <add>, %246, %cst_151 [0] : vector<16x1xf32> to vector<1xf32>
    %248 = vector.shape_cast %247 : vector<1xf32> to vector<1x1xf32>
    %cst_152 = arith.constant 2.500000e-01 : f32
    %249 = vector.broadcast %cst_152 : f32 to vector<1x1xf32>
    %250 = arith.mulf %249, %248 : vector<1x1xf32>
    %cst_153 = arith.constant 4.000000e+00 : f32
    %251 = vector.broadcast %cst_153 : f32 to vector<1x1xf32>
    %252 = arith.subf %251, %250 : vector<1x1xf32>
    %c0_154 = arith.constant 0 : index
    %c0_155 = arith.constant 0 : index
    %253 = vector.load %arg12[%c0_154, %c0_155] : memref<1x1xf32, #tpu.memory_space<vmem>>, vector<1x1xf32>
    tpu.vector_store %arg12[%c0_154, %c0_155], %252 {strides = array<i32>} : memref<1x1xf32, #tpu.memory_space<vmem>>, vector<1x1xf32>,
    %c0_156 = arith.constant 0 : index
    %c0_157 = arith.constant 0 : index
    %254 = vector.load %arg1[%c0_156, %c0_157] : memref<8x256xbf16, #tpu.memory_space<vmem>>, vector<8x256xbf16>
    %c0_158 = arith.constant 0 : index
    %c0_159 = arith.constant 0 : index
    %255 = vector.load %arg14[%c0_158, %c0_159] : memref<256x128xf32, #tpu.memory_space<vmem>>, vector<256x128xf32>
    %256 = arith.truncf %255 : vector<256x128xf32> to vector<256x128xbf16>
    %cst_160 = arith.constant dense<0.000000e+00> : vector<8x128xf32>
    %257 = tpu.matmul %254, %256, %cst_160 {dimension_numbers = #tpu.dot_dimension_numbers<[1], [0], [0], [1], [0, 0, 1, 1], [], []>} : vector<8x256xbf16>, vector<256x128xbf16>, vector<8x128xf32> -> vector<8x128xf32>
    %c0_161 = arith.constant 0 : index
    %c0_162 = arith.constant 0 : index
    %258 = vector.load %arg15[%c0_161, %c0_162] : memref<1x128xf32, #tpu.memory_space<vmem>>, vector<1x128xf32>
    %259 = vector.broadcast %258 : vector<1x128xf32> to vector<8x128xf32>
    %260 = arith.addf %257, %259 : vector<8x128xf32>
    %cst_163 = arith.constant 0.000000e+00 : f32
    %261 = vector.broadcast %cst_163 : f32 to vector<8x128xf32>
    %262 = arith.maximumf %260, %261 : vector<8x128xf32>
    %263 = arith.truncf %262 : vector<8x128xf32> to vector<8x128xbf16>
    %c0_164 = arith.constant 0 : index
    %c0_165 = arith.constant 0 : index
    %264 = vector.load %arg9[%c0_164, %c0_165] : memref<128x128xf32, #tpu.memory_space<vmem>>, vector<128x128xf32>
    %265 = arith.truncf %264 : vector<128x128xf32> to vector<128x128xbf16>
    %cst_166 = arith.constant dense<0.000000e+00> : vector<8x128xf32>
    %266 = tpu.matmul %263, %265, %cst_166 {dimension_numbers = #tpu.dot_dimension_numbers<[1], [0], [0], [1], [0, 0, 1, 1], [], []>} : vector<8x128xbf16>, vector<128x128xbf16>, vector<8x128xf32> -> vector<8x128xf32>
    %c0_167 = arith.constant 0 : index
    %c0_168 = arith.constant 0 : index
    %267 = vector.load %arg10[%c0_167, %c0_168] : memref<1x128xf32, #tpu.memory_space<vmem>>, vector<1x128xf32>
    %268 = vector.broadcast %267 : vector<1x128xf32> to vector<8x128xf32>
    %269 = arith.addf %266, %268 : vector<8x128xf32>
    %c0_169 = arith.constant 0 : index
    %c0_170 = arith.constant 0 : index
    %270 = vector.load %arg11[%c0_169, %c0_170] : memref<8x128xf32, #tpu.memory_space<vmem>>, vector<8x128xf32>
    tpu.vector_store %arg11[%c0_169, %c0_170], %269 {strides = array<i32>} : memref<8x128xf32, #tpu.memory_space<vmem>>, vector<8x128xf32>,
    %271 = tpu.iota {dimensions = array<i32: 1>} : vector<8x128xi32>
    %c10_i32 = arith.constant 10 : i32
    %272 = vector.broadcast %c10_i32 : i32 to vector<8x128xi32>
    %273 = arith.cmpi slt, %271, %272 : vector<8x128xi32>
    %cst_171 = arith.constant -3.40282347E+38 : f32
    %274 = vector.broadcast %cst_171 : f32 to vector<8x128xf32>
    %275 = arith.select %273, %269, %274 : vector<8x128xi1>, vector<8x128xf32>
    %cst_172 = arith.constant dense<0xFF800000> : vector<8xf32>
    %276 = vector.multi_reduction <maximumf>, %275, %cst_172 [1] : vector<8x128xf32> to vector<8xf32>
    %277 = vector.shape_cast %276 : vector<8xf32> to vector<8x1xf32>
    %278 = vector.broadcast %277 : vector<8x1xf32> to vector<8x128xf32>
    %279 = arith.subf %269, %278 : vector<8x128xf32>
    %280 = math.exp %279 : vector<8x128xf32>
    %cst_173 = arith.constant 0.000000e+00 : f32
    %281 = vector.broadcast %cst_173 : f32 to vector<8x128xf32>
    %282 = arith.select %273, %280, %281 : vector<8x128xi1>, vector<8x128xf32>
    %cst_174 = arith.constant dense<0.000000e+00> : vector<8xf32>
    %283 = vector.multi_reduction <add>, %282, %cst_174 [1] : vector<8x128xf32> to vector<8xf32>
    %284 = vector.shape_cast %283 : vector<8xf32> to vector<8x1xf32>
    %285 = math.log %284 : vector<8x1xf32>
    %286 = arith.addf %277, %285 : vector<8x1xf32>
    %c0_175 = arith.constant 0 : index
    %c0_176 = arith.constant 0 : index
    %287 = vector.load %arg2[%c0_175, %c0_176] : memref<8x1xf32, #tpu.memory_space<vmem>>, vector<8x1xf32>
    %288 = arith.fptosi %287 : vector<8x1xf32> to vector<8x1xi32>
    %289 = vector.broadcast %288 : vector<8x1xi32> to vector<8x128xi32>
    %290 = arith.cmpi eq, %271, %289 : vector<8x128xi32>
    %cst_177 = arith.constant 0.000000e+00 : f32
    %291 = vector.broadcast %cst_177 : f32 to vector<8x128xf32>
    %292 = arith.select %290, %269, %291 : vector<8x128xi1>, vector<8x128xf32>
    %cst_178 = arith.constant dense<0.000000e+00> : vector<8xf32>
    %293 = vector.multi_reduction <add>, %292, %cst_178 [1] : vector<8x128xf32> to vector<8xf32>
    %294 = vector.shape_cast %293 : vector<8xf32> to vector<8x1xf32>
    %295 = arith.subf %286, %294 : vector<8x1xf32>
    %cst_179 = arith.constant dense<0.000000e+00> : vector<1xf32>
    %296 = vector.multi_reduction <add>, %295, %cst_179 [0] : vector<8x1xf32> to vector<1xf32>
    %297 = vector.shape_cast %296 : vector<1xf32> to vector<1x1xf32>
    %cst_180 = arith.constant 1.250000e-01 : f32
    %298 = vector.broadcast %cst_180 : f32 to vector<1x1xf32>
    %299 = arith.mulf %297, %298 : vector<1x1xf32>
    %c0_181 = arith.constant 0 : index
    %c0_182 = arith.constant 0 : index
    %300 = vector.load %arg13[%c0_181, %c0_182] : memref<1x1xf32, #tpu.memory_space<vmem>>, vector<1x1xf32>
    tpu.vector_store %arg13[%c0_181, %c0_182], %299 {strides = array<i32>} : memref<1x1xf32, #tpu.memory_space<vmem>>, vector<1x1xf32>,
    return
  }
}

</mosaic_0001>

<bundles_post_ra>
// kernel: jvp__.1
= control target key start
LH: loop header
LB: loop body
LE: loop exit
PB: predicated region body
PF: predicated region fallthrough
CT: control target
= control target key end

     0   :  { %19 = vsyncpa [#allocation9], 0  ;;  %s3935_s0 = inlined_call_operand.vmem [shape: bf16[16,256], index: 0, kind: input, shape index: {}]   ;;  %s3936_s1 = inlined_call_operand.vmem [shape: bf16[8,256], index: 1, kind: input, shape index: {}]   ;;  %s3937_s2 = inlined_call_operand.vmem [shape: f32[8,1], index: 2, kind: input, shape index: {}]   ;;  %s3938_s3 = inlined_call_operand.vmem [shape: f32[256,128], index: 3, kind: input, shape index: {}]   ;;  %s3939_s4 = inlined_call_operand.vmem [shape: f32[1,128], index: 4, kind: input, shape index: {}]   ;;  %s3940_s5 = inlined_call_operand.vmem [shape: f32[128,128], index: 5, kind: input, shape index: {}]   ;;  %s3941_s6 = inlined_call_operand.vmem [shape: f32[1,128], index: 6, kind: input, shape index: {}]   ;;  %s3942_s7 = inlined_call_operand.vmem [shape: f32[128,128], index: 7, kind: input, shape index: {}]   ;;  %s3943_s8 = inlined_call_operand.vmem [shape: f32[1,128], index: 8, kind: input, shape index: {}]   ;;  %s3944_s9 = inlined_call_operand.vmem [shape: f32[128,128], index: 9, kind: input, shape index: {}]   ;;  %s3945_s10 = inlined_call_operand.vmem [shape: f32[1,128], index: 10, kind: input, shape index: {}]   ;;  %s3946_s11 = inlined_call_operand.hbm [shape: f32[8,128], index: 11, kind: output, shape index: {0}]   ;;  %s3947_s12 = inlined_call_operand.hbm [shape: f32[1,1], index: 12, kind: output, shape index: {1}]   ;;  %s3948_s13 = inlined_call_operand.hbm [shape: f32[1,1], index: 13, kind: output, shape index: {2}]  }
   0x1   :  { %v2663_v0 = vld [vmem:[%s3938_s3 + $0x70] sm:$0xff]  ;;  %v2668_v1 = vld [vmem:[%s3938_s3 + $0x78] sm:$0xff]  ;;  %v2681_v5 = vld [vmem:[%s3938_s3 + $0x60] sm:$0xff] }
   0x2   :  { %v74_v2 = vld [vmem:[%s3938_s3 + $0xf0] sm:$0xff]  ;;  %v254_v3 = vpack.c.bf16 %v2668_v1, %v2663_v0  ;;  %v75_v4 = vld [vmem:[%s3938_s3 + $0xf8] sm:$0xff]  ;;  %v2686_v6 = vld [vmem:[%s3938_s3 + $0x68] sm:$0xff] }
   0x3   :  { %v262_v7 = vpack.c.bf16 %v75_v4, %v74_v2  ;;  %v72_v8 = vld [vmem:[%s3938_s3 + $0xe0] sm:$0xff]  ;;  %v73_v9 = vld [vmem:[%s3938_s3 + $0xe8] sm:$0xff]  ;;  %v253_v10 = vpack.c.bf16 %v2686_v6, %v2681_v5  ;;  %v2699_v12 = vld [vmem:[%s3938_s3 + $0x50] sm:$0xff] }
   0x4   :  { %276 = vmatpush.bf16.msra.mxu0 %v254_v3  ;;  %v261_v11 = vpack.c.bf16 %v73_v9, %v72_v8  ;;  %v2704_v13 = vld [vmem:[%s3938_s3 + $0x58] sm:$0xff]  ;;  %v70_v14 = vld [vmem:[%s3938_s3 + $0xd0] sm:$0xff]  ;;  %v2717_v18 = vld [vmem:[%s3938_s3 + $0x40] sm:$0xff] }
   0x5   :  { %290 = vmatpush.bf16.msra.mxu1 %v262_v7  ;;  %v71_v15 = vld [vmem:[%s3938_s3 + $0xd8] sm:$0xff]  ;;  %v252_v16 = vpack.c.bf16 %v2704_v13, %v2699_v12  ;;  %v2722_v19 = vld [vmem:[%s3938_s3 + $0x48] sm:$0xff]  ;;  %v68_v20 = vld [vmem:[%s3938_s3 + $0xc0] sm:$0xff] }
   0x6   :  { %v260_v17 = vpack.c.bf16 %v71_v15, %v70_v14  ;;  %v69_v21 = vld [vmem:[%s3938_s3 + $0xc8] sm:$0xff]  ;;  %v251_v22 = vpack.c.bf16 %v2722_v19, %v2717_v18  ;;  %v2735_v23 = vld [vmem:[%s3938_s3 + $0x30] sm:$0xff]  ;;  %v2740_v24 = vld [vmem:[%s3938_s3 + $0x38] sm:$0xff] }
   0x7   :  { %v259_v25 = vpack.c.bf16 %v69_v21, %v68_v20  ;;  %v2745_v26 = vld [vmem:[%s3940_s5 + $0x70] sm:$0xff]  ;;  %v2750_v27 = vld [vmem:[%s3940_s5 + $0x78] sm:$0xff]  ;;  %v2755_v28 = vld [vmem:[%s3940_s5 + $0x60] sm:$0xff]  ;;  %v250_v35 = vpack.c.bf16 %v2740_v24, %v2735_v23 }
   0x8   :  { %277 = vmatpush.bf16.msra.mxu0 %v253_v10  ;;  %v66_v29 = vld [vmem:[%s3938_s3 + $0xb0] sm:$0xff]  ;;  %v67_v30 = vld [vmem:[%s3938_s3 + $0xb8] sm:$0xff]  ;;  %v2765_v31 = vpack.c.bf16 %v2750_v27, %v2745_v26  ;;  %v2770_v32 = vld [vmem:[%s3940_s5 + $0x68] sm:$0xff] }
   0x9   :  { %291 = vmatpush.bf16.msra.mxu1 %v261_v11  ;;  %v2775_v33 = vld [vmem:[%s3938_s3 + $0x20] sm:$0xff]  ;;  %v2785_v36 = vpack.c.bf16 %v2770_v32, %v2755_v28 }
   0xa   :  { %v108_v34 = vld [vmem:[%s3939_s4] sm:$0x1]  ;;  %318 = vmatpush.bf16.msra.mxu2 %v2765_v31 }
   0xb   :  { %109 = vst [vmem:[#allocation3] sm:$0x1] %v108_v34 }
   0xc   :  { %278 = vmatpush.bf16.msra.mxu0 %v252_v16 }
   0xd   :  { %292 = vmatpush.bf16.msra.mxu1 %v260_v17 }
  0x10   :  { %279 = vmatpush.bf16.msra.mxu0 %v251_v22 }
  0x11   :  { %20 = vsyncpa [#allocation11], 0  ;;  %293 = vmatpush.bf16.msra.mxu1 %v259_v25  ;;  %v258_v37 = vpack.c.bf16 %v67_v30, %v66_v29  ;;  %v2790_v38 = vld [vmem:[%s3938_s3 + $0x28] sm:$0xff]  ;;  %v2795_v39 = vld [vmem:[%s3940_s5 + $0x50] sm:$0xff]  ;;  %319 = vmatpush.bf16.msra.mxu2 %v2785_v36  ;;  %vm449_vm15 = vcmask 130048   ;;  %s2306_s28 = sshll.u32 %s3946_s11, 4  ;;  %s2307_s28 = int_to_ptr.hbm [resolvable:$true] %s2306_s28 }
  0x12   :  { %v2800_v40 = vld [vmem:[%s3940_s5 + $0x58] sm:$0xff]  ;;  %v64_v41 = vld [vmem:[%s3938_s3 + $0xa0] sm:$0xff]  ;;  %v65_v42 = vld [vmem:[%s3938_s3 + $0xa8] sm:$0xff]  ;;  %v249_v43 = vpack.c.bf16 %v2790_v38, %v2775_v33  ;;  %s2588_s11 = smov [#allocation10]   ;;  %s2589_s14 = smov [#allocation12]  }
  0x13   :  { %v2813_v44 = vld [vmem:[%s3938_s3 + $0x10] sm:$0xff]  ;;  %v2818_v45 = vpack.c.bf16 %v2800_v40, %v2795_v39  ;;  %v257_v46 = vpack.c.bf16 %v65_v42, %v64_v41  ;;  %v2823_v47 = vld [vmem:[%s3938_s3 + $0x18] sm:$0xff]  ;;  %v2828_v48 = vld [vmem:[%s3940_s5 + $0x40] sm:$0xff]  ;;  %s2315_s29 = sshll.u32 %s2588_s11, 4  ;;  %s2326_s15 = sshll.u32 %s2589_s14, 4  ;;  %s2316_s29 = int_to_ptr.vmem [resolvable:$true] %s2315_s29  ;;  %s2327_s15 = int_to_ptr.vmem [resolvable:$true] %s2326_s15 }
  0x14   :  { %280 = vmatpush.bf16.msra.mxu0 %v250_v35  ;;  %v2833_v49 = vld [vmem:[%s3940_s5 + $0x48] sm:$0xff]  ;;  %v62_v50 = vld [vmem:[%s3938_s3 + $0x90] sm:$0xff]  ;;  %v2841_v51 = vld [vmem:[%s3938_s3 + $0x98] sm:$0xff]  ;;  %v248_v52 = vpack.c.bf16 %v2823_v47, %v2813_v44 }
  0x15   :  { %294 = vmatpush.bf16.msra.mxu1 %v258_v37  ;;  %4001 = vst [vmem:[#allocation15_spill] sm:$0xff] %v2841_v51  ;;  %320 = vmatpush.bf16.msra.mxu2 %v2818_v45  ;;  %v2848_v53 = vpack.c.bf16 %v2833_v49, %v2828_v48  ;;  %v256_v54 = vpack.c.bf16 %v2841_v51, %v62_v50  ;;  %v2854_v55 = vld [vmem:[%s3938_s3] sm:$0xff]  ;;  %v2859_v56 = vld [vmem:[%s3938_s3 + $0x8] sm:$0xff]  ;;  %v2897_v7 = vld [vmem:[%s3940_s5 + $0x30] sm:$0xff] }
  0x16   :  { %v2864_v57 = vld [vmem:[%s3938_s3 + $0x80] sm:$0xff]  ;;  %v2869_v58 = vld [vmem:[%s3938_s3 + $0x88] sm:$0xff]  ;;  %v247_v59 = vpack.c.bf16 %v2859_v56, %v2854_v55  ;;  %v2902_v8 = vld [vmem:[%s3940_s5 + $0x38] sm:$0xff] }
  0x17   :  { %4002 = vst [vmem:[#allocation16_spill] sm:$0xff] %v2864_v57  ;;  %v2348_v60 = vld [vmem:[%s3935_s0] sm:$0xf]  ;;  %v2441_v61 = vld [vmem:[%s3935_s0 + $0x4] sm:$0xf0]  ;;  %v255_v62 = vpack.c.bf16 %v2869_v58, %v2864_v57  ;;  %v2906_v9 = vpack.c.bf16 %v2902_v8, %v2897_v7  ;;  %v2927_v15 = vld [vmem:[%s3940_s5 + $0x10] sm:$0xff] }
  0x18   :  { %281 = vmatpush.bf16.msra.mxu0 %v249_v43  ;;  %4003 = vst [vmem:[#allocation17_spill] sm:$0xff] %v2869_v58  ;;  %v2440_v63 = vld [vmem:[%s3935_s0 + $0x4] sm:$0xf]  ;;  %v2350_v2 = vld [vmem:[%s3935_s0 + $0x8] sm:$0xf0]  ;;  %v2888_v3 = vor.u32 %v2441_v61, %v2348_v60  ;;  %v2932_v16 = vld [vmem:[%s3940_s5 + $0x18] sm:$0xff] }
  0x19   :  { %295 = vmatpush.bf16.msra.mxu1 %v257_v46  ;;  %321 = vmatpush.bf16.msra.mxu2 %v2848_v53  ;;  %v2890_v4 = vor.u32 %v2440_v63, %v2350_v2  ;;  %v2912_v10 = vld [vmem:[%s3940_s5 + $0x20] sm:$0xff]  ;;  %v2917_v11 = vld [vmem:[%s3940_s5 + $0x28] sm:$0xff]  ;;  %v2936_v17 = vpack.c.bf16 %v2932_v16, %v2927_v15  ;;  %v2957_v25 = vld [vmem:[%s3942_s7 + $0x70] sm:$0xff] }
  0x1a   :  { %v2921_v14 = vpack.c.bf16 %v2917_v11, %v2912_v10  ;;  %v2942_v20 = vld [vmem:[%s3940_s5] sm:$0xff]  ;;  %v2947_v21 = vld [vmem:[%s3940_s5 + $0x8] sm:$0xff]  ;;  %4004 = vst [vmem:[#allocation18_spill] sm:$0xff] %v2957_v25  ;;  %v2962_v29 = vld [vmem:[%s3942_s7 + $0x78] sm:$0xff]  ;;  %s2317_s5 = sshll.u32 %s3947_s12, 4  ;;  %s2318_s5 = int_to_ptr.hbm [resolvable:$true] %s2317_s5 }
  0x1b   :  { %v2951_v22 = vpack.c.bf16 %v2947_v21, %v2942_v20  ;;  %4005 = vst [vmem:[#allocation19_spill] sm:$0xff] %v2962_v29  ;;  %v2967_v30 = vld [vmem:[%s3942_s7 + $0x60] sm:$0xff]  ;;  %v340_v34 = vpack.c.bf16 %v2962_v29, %v2957_v25  ;;  %v2974_v35 = vld [vmem:[%s3942_s7 + $0x68] sm:$0xff]  ;;  %v2984_v42 = vld [vmem:[%s3942_s7 + $0x50] sm:$0xff] }
  0x1c   :  { %282 = vmatpush.bf16.msra.mxu0 %v248_v52  ;;  %4006 = vst [vmem:[#allocation20_spill] sm:$0xff] %v2967_v30  ;;  %v339_v37 = vpack.c.bf16 %v2974_v35, %v2967_v30  ;;  %v142_v41 = vld [vmem:[%s3941_s6] sm:$0x1]  ;;  %v2989_v43 = vld [vmem:[%s3942_s7 + $0x58] sm:$0xff]  ;;  %v3001_v52 = vld [vmem:[%s3942_s7 + $0x48] sm:$0xff] }
  0x1d   :  { %296 = vmatpush.bf16.msra.mxu1 %v256_v54  ;;  %322 = vmatpush.bf16.msra.mxu2 %v2906_v9  ;;  %4007 = vst [vmem:[#allocation21_spill] sm:$0xff] %v2974_v35  ;;  %v338_v46 = vpack.c.bf16 %v2989_v43, %v2984_v42  ;;  %v2996_v50 = vld [vmem:[%s3942_s7 + $0x40] sm:$0xff]  ;;  %v3013_v60 = vld [vmem:[%s3942_s7 + $0x38] sm:$0xff] }
  0x1e   :  { %344 = vmatpush.bf16.msra.mxu3 %v340_v34  ;;  %4008 = vst [vmem:[#allocation22_spill] sm:$0xff] %v2984_v42  ;;  %v337_v54 = vpack.c.bf16 %v3001_v52, %v2996_v50  ;;  %v2458_v61 = vld [vmem:[#allocation3] ss:$0 sm:$0xff] }
  0x1f   :  { %4009 = vst [vmem:[#allocation23_spill] sm:$0xff] %v2989_v43 }
  0x20   :  { %283 = vmatpush.bf16.msra.mxu0 %v247_v59  ;;  %143 = vst [vmem:[#allocation5] sm:$0x1] %v142_v41  ;;  %v3008_v59 = vld [vmem:[%s3942_s7 + $0x30] sm:$0xff] }
  0x21   :  { %297 = vmatpush.bf16.msra.mxu1 %v255_v62  ;;  %323 = vmatpush.bf16.msra.mxu2 %v2921_v14  ;;  %4010 = vst [vmem:[#allocation24_spill] sm:$0xff] %v2996_v50  ;;  %v336_v63 = vpack.c.bf16 %v3013_v60, %v3008_v59 }
  0x22   :  { %345 = vmatpush.bf16.msra.mxu3 %v339_v37  ;;  %4011 = vst [vmem:[#allocation25_spill] sm:$0xff] %v3001_v52 }
  0x23   :  { %284 = vmatmul.bf16.vlgmr.msra.gmra.mxu0 %v2888_v3  ;;  %4012 = vst [vmem:[#allocation26_spill] sm:$0xff] %v3008_v59 }
  0x24   :  { %298 = vmatmul.bf16.vlgmr.msra.gmra.mxu1 %v2890_v4  ;;  %4013 = vst [vmem:[#allocation27_spill] sm:$0xff] %v3013_v60 }
  0x25   :  { %324 = vmatpush.bf16.msra.mxu2 %v2936_v17  ;;  %530 = vmatpush.bf16.xpose.msrb.mxu1 %v340_v34 }
  0x26   :  { %346 = vmatpush.bf16.msra.mxu3 %v338_v46 }
  0x29   :  { %325 = vmatpush.bf16.msra.mxu2 %v2951_v22 }
  0x2a   :  { %347 = vmatpush.bf16.msra.mxu3 %v337_v54 }
  0x2d   :  { %531 = vmatpush.bf16.xpose.msrb.mxu1 %v339_v37 }
  0x2e   :  { %348 = vmatpush.bf16.msra.mxu3 %v336_v63 }
  0x35   :  { %532 = vmatpush.bf16.xpose.msrb.mxu1 %v338_v46  ;;  %v3044_v46 = vld [vmem:[%s3942_s7 + $0x10] sm:$0xff] }
  0x36   :  { %4020 = vst [vmem:[#allocation30_spill] sm:$0xff] %v3044_v46 }
  0x3d   :  { %533 = vmatpush.bf16.xpose.msrb.mxu1 %v337_v54  ;;  %v3056_v54 = vld [vmem:[%s3942_s7] sm:$0xff] }
  0x3e   :  { %4022 = vst [vmem:[#allocation32_spill] sm:$0xff] %v3056_v54 }
  0x45   :  { %534 = vmatpush.bf16.xpose.msrb.mxu1 %v336_v63  ;;  %v2459_v63 = vld [vmem:[#allocation5] ss:$0 sm:$0xff] }
  0xa0   :  { %v285_v62 = vpop.f32.mrf.mxu0 }
  0xa1   :  { %v299_v2 = vpop.f32.mrf.mxu1  ;;  %v286_v34 = vadd.f32 %v2458_v61, %v285_v62 }
  0xa3   :  { %v300_v37 = vadd.f32 %v299_v2, %v286_v34 }
  0xa5   :  { %v304_v43 = vmax.f32 %v300_v37, 0.0 }
  0xa7   :  { %vm3021_vm1 = vcmp.gt.f32.partialorder %v304_v43, 0.0 }
  0xa8   :  { %v287_v41 = vpop.f32.mrf.mxu0 }
  0xa9   :  { %v288_v52 = vadd.f32 %v2458_v61, %v287_v41  ;;  %v301_v50 = vpop.f32.mrf.mxu1  ;;  %v3061_v61 = vld [vmem:[%s3942_s7 + $0x8] sm:$0xff] }
  0xaa   :  { %4023 = vst [vmem:[#allocation33_spill] sm:$0xff] %v3061_v61  ;;  %v333_v62 = vpack.c.bf16 %v3061_v61, %v3056_v54 }
  0xab   :  { %v302_v42 = vadd.f32 %v301_v50, %v288_v52  ;;  %v3049_v50 = vld [vmem:[%s3942_s7 + $0x18] sm:$0xff] }
  0xac   :  { %4021 = vst [vmem:[#allocation31_spill] sm:$0xff] %v3049_v50  ;;  %v334_v52 = vpack.c.bf16 %v3049_v50, %v3044_v46 }
  0xad   :  { %v305_v35 = vmax.f32 %v302_v42, 0.0  ;;  %v3032_v42 = vld [vmem:[%s3942_s7 + $0x20] sm:$0xff] }
  0xae   :  { %4018 = vst [vmem:[#allocation28_spill] sm:$0xff] %v3032_v42 }
  0xaf   :  { %vm3017_vm0 = vcmp.gt.f32.partialorder %v305_v35, 0.0  ;;  %v306_v29 = vpack.c.bf16 %v305_v35, %v304_v43  ;;  %v3037_v35 = vld [vmem:[%s3942_s7 + $0x28] sm:$0xff] }
  0xb0   :  { %vm2370_vm2 = vmpackc.low %vm3017_vm0, %vm3021_vm1  ;;  %4019 = vst [vmem:[#allocation29_spill] sm:$0xff] %v3037_v35  ;;  %v335_v43 = vpack.c.bf16 %v3037_v35, %v3032_v42 }
  0xb1   :  { %326 = vmatmul.bf16.vlgmr.msra.gmra.mxu2 %v306_v29 }
  0xb2   :  { %349 = vmatpush.bf16.msra.mxu3 %v335_v43  ;;  %535 = vmatpush.bf16.xpose.msrb.mxu1 %v335_v43 }
  0xb6   :  { %350 = vmatpush.bf16.msra.mxu3 %v334_v52 }
  0xba   :  { %351 = vmatpush.bf16.msra.mxu3 %v333_v62  ;;  %536 = vmatpush.bf16.xpose.msrb.mxu1 %v334_v52 }
  0xc2   :  { %537 = vmatpush.bf16.xpose.msrb.mxu1 %v333_v62 }
  0xca   :  { %641 = vmatpush.bf16.xpose.msra.mxu1 %v2765_v31 }
  0xd2   :  { %642 = vmatpush.bf16.xpose.msra.mxu1 %v2785_v36  ;;  %v176_v36 = vld [vmem:[%s3943_s8] sm:$0x1] }
  0xd3   :  { %177 = vst [vmem:[#allocation7] sm:$0x1] %v176_v36 }
  0xda   :  { %643 = vmatpush.bf16.xpose.msra.mxu1 %v2818_v45  ;;  %v2460_v45 = vld [vmem:[#allocation7] ss:$0 sm:$0xff] }
  0xe2   :  { %644 = vmatpush.bf16.xpose.msra.mxu1 %v2848_v53 }
  0xea   :  { %645 = vmatpush.bf16.xpose.msra.mxu1 %v2906_v9 }
  0xf2   :  { %646 = vmatpush.bf16.xpose.msra.mxu1 %v2921_v14 }
  0xfa   :  { %647 = vmatpush.bf16.xpose.msra.mxu1 %v2936_v17 }
 0x102   :  { %648 = vmatpush.bf16.xpose.msra.mxu1 %v2951_v22 }
 0x134   :  { %v327_v2 = vpop.f32.mrf.mxu2 }
 0x135   :  { %v3067_v34 = vadd.f32 %v2459_v63, %v327_v2 }
 0x137   :  { %v386_v37 = vmul.f32 %v3067_v34, %v3067_v34 }
 0x139   :  { %388 = vadd.xlane.f32.xlu1 %v386_v37 }
 0x13c   :  { %v329_v41 = vpop.f32.mrf.mxu2 }
 0x13d   :  { %v3072_v43 = vadd.f32 %v2459_v63, %v329_v41 }
 0x13f   :  { %v387_v52 = vmul.f32 %v3072_v43, %v3072_v43  ;;  %v3078_v31 = vpack.c.bf16 %v3072_v43, %v3067_v34 }
 0x141   :  { %390 = vadd.xlane.f32.xlu1 %v387_v52  ;;  %352 = vmatmul.bf16.vlgmr.msra.gmra.mxu3 %v3078_v31 }
 0x17b   :  { %545 = vxpose.xlu1.c.b16.start.end [1/1] (short) %v306_v29, 128 }
 0x1ac   :  { %v389_v14 = vpop.xlane.xlu1 %388 }
 0x1ad   :  { %v392_v29 = vmax.f32 %v389_v14, 1e-24 }
 0x1af   :  { %vm400_vm10 = vweird.f32 %v392_v29 }
 0x1b4   :  { %v391_v17 = vpop.xlane.xlu1 %390 }
 0x1b5   :  { %v393_v22 = vmax.f32 %v391_v17, 1e-24 }
 0x1b7   :  { %2469 = vrsqrt.f32 %v393_v22  ;;  %vm410_vm4 = vweird.f32 %v393_v22 }
 0x1b8   :  { %2471 = vrsqrt.f32 %v392_v29 }
 0x1bd   :  { %v2470_v41 = vpop.eup %2469 }
 0x1be   :  { %v405_v52 = vmul.f32 %v2470_v41, %v393_v22  ;;  %vm411_vm3 = vweird.f32 %v2470_v41 }
 0x1bf   :  { %vm412_vm6 = vmor %vm410_vm4, %vm411_vm3 }
 0x1c0   :  { %v406_v54 = vmul.f32 %v2470_v41, %v405_v52 }
 0x1c4   :  { %v353_v62 = vpop.f32.mrf.mxu3 }
 0x1c5   :  { %v354_v53 = vadd.f32 %v2460_v45, %v353_v62  ;;  %v2472_v62 = vpop.eup %2471 }
 0x1c6   :  { %vm401_vm9 = vweird.f32 %v2472_v62 }
 0x1c7   :  { %v358_v63 = vmul.f32 %v354_v53, %v354_v53  ;;  %vm402_vm12 = vmor %vm400_vm10, %vm401_vm9 }
 0x1c9   :  { %360 = vadd.xlane.f32.xlu0 %v358_v63  ;;  %v395_v63 = vmul.f32 %v2472_v62, %v392_v29 }
 0x1cb   :  { %v396_v50 = vmul.f32 %v2472_v62, %v395_v63 }
 0x1cc   :  { %v355_v2 = vpop.f32.mrf.mxu3 }
 0x1cd   :  { %v356_v37 = vadd.f32 %v2460_v45, %v355_v2  ;;  %v407_v45 = vmul.f32 0.5, %v406_v54  ;;  %v397_v35 = vmul.f32 0.5, %v396_v50 }
 0x1cf   :  { %v359_v9 = vmul.f32 %v356_v37, %v356_v37  ;;  %v398_v52 = vsub.f32 1.5, %v397_v35 }
 0x1d1   :  { %362 = vadd.xlane.f32.xlu0 %v359_v9 }
 0x1fa   :  { %660 = vxpose.binary.xlu0.c.b16.start.end [1/2] (short) %v2890_v4, %v2888_v3, 128  ;;  %v408_v3 = vsub.f32 1.5, %v407_v45 }
 0x1fc   :  { %v409_v42 = vmul.f32 %v2470_v41, %v408_v3  ;;  %v399_v3 = vmul.f32 %v2472_v62, %v398_v52 }
 0x1fe   :  { %v413_v57 = vsel %vm412_vm6, %v2470_v41, %v409_v42 }
 0x23c   :  { %v361_v36 = vpop.xlane.xlu0 %360 }
 0x23d   :  { %v364_v61 = vmax.f32 %v361_v36, 1e-24 }
 0x23f   :  { %2473 = vrsqrt.f32 %v364_v61  ;;  %vm372_vm7 = vweird.f32 %v364_v61 }
 0x244   :  { %v363_v2 = vpop.xlane.xlu0 %362 }
 0x245   :  { %v2474_v9 = vpop.eup %2473  ;;  %v365_v46 = vmax.f32 %v363_v2, 1e-24 }
 0x246   :  { %v367_v4 = vmul.f32 %v2474_v9, %v364_v61  ;;  %vm373_vm5 = vweird.f32 %v2474_v9  ;;  %v403_v61 = vsel %vm402_vm12, %v2472_v62, %v399_v3 }
 0x247   :  { %2475 = vrsqrt.f32 %v365_v46  ;;  %vm374_vm8 = vmor %vm372_vm7, %vm373_vm5  ;;  %vm382_vm13 = vweird.f32 %v365_v46 }
 0x248   :  { %v368_v17 = vmul.f32 %v2474_v9, %v367_v4  ;;  %v417_v4 = vmul.f32 %v413_v57, %v3072_v43 }
 0x24a   :  { %v369_v14 = vmul.f32 0.5, %v368_v17 }
 0x24c   :  { %v370_v60 = vsub.f32 1.5, %v369_v14 }
 0x24d   :  { %v2476_v36 = vpop.eup %2475 }
 0x24e   :  { %v377_v54 = vmul.f32 %v2476_v36, %v365_v46  ;;  %v371_v59 = vmul.f32 %v2474_v9, %v370_v60  ;;  %vm383_vm11 = vweird.f32 %v2476_v36 }
 0x24f   :  { %vm384_vm14 = vmor %vm382_vm13, %vm383_vm11 }
 0x250   :  { %v378_v63 = vmul.f32 %v2476_v36, %v377_v54  ;;  %v375_v45 = vsel %vm374_vm8, %v2474_v9, %v371_v59  ;;  %v416_v59 = vmul.f32 %v403_v61, %v3067_v34 }
 0x251   :  { %v414_v2 = vmul.f32 %v375_v45, %v354_v53 }
 0x252   :  { %v379_v50 = vmul.f32 0.5, %v378_v63 }
 0x253   :  { %v418_v17 = vmul.f32 %v417_v4, %v414_v2 }
 0x254   :  { %v380_v22 = vsub.f32 1.5, %v379_v50 }
 0x255   :  { %420 = vadd.xlane.f32.xlu2 %v418_v17 }
 0x256   :  { %v381_v35 = vmul.f32 %v2476_v36, %v380_v22  ;;  %v246_v22 = vld [vmem:[#allocation7] sm:$0x1] }
 0x258   :  { %v385_v60 = vsel %vm384_vm14, %v2476_v36, %v381_v35 }
 0x259   :  { %v415_v42 = vmul.f32 %v385_v60, %v356_v37 }
 0x25b   :  { %v419_v53 = vmul.f32 %v416_v59, %v415_v42 }
 0x25d   :  { %422 = vadd.xlane.f32.xlu2 %v419_v53 }
 0x286   :  { %433 = vxpose.xlu2.c.b16.start.end [1/1] (short) %v3078_v31, 128 }
 0x2c8   :  { %v421_v57 = vpop.xlane.xlu2 %420 }
 0x2c9   :  { %v424_v43 = vmul.f32 %v421_v57, %v414_v2 }
 0x2cb   :  { %v426_v41 = vsub.f32 %v417_v4, %v424_v43 }
 0x2cd   :  { %v428_v14 = vmul.f32 -0.25, %v426_v41 }
 0x2cf   :  { %v430_v46 = vmul.f32 %v428_v14, %v375_v45 }
 0x2d0   :  { %v423_v29 = vpop.xlane.xlu2 %422 }
 0x2d1   :  { %v425_v9 = vmul.f32 %v423_v29, %v415_v42  ;;  %v229_v29 = vld [vmem:[#allocation5] sm:$0x1] }
 0x2d3   :  { %v427_v52 = vsub.f32 %v416_v59, %v425_v9 }
 0x2d5   :  { %v429_v54 = vmul.f32 -0.25, %v427_v52  ;;  %v668_v52 = vpop.trf.xlu0 }
 0x2d7   :  { %v431_v63 = vmul.f32 %v429_v54, %v385_v60 }
 0x2d9   :  { %v432_v62 = vpack.c.bf16 %v431_v63, %v430_v46  ;;  %v523_v50 = vadd.f32 %v431_v63, %v430_v46 }
 0x2db   :  { %481 = vmatpush.bf16.msrb.mxu0 %v432_v62  ;;  %v524_v37 = vrot.slane %v523_v50, 4  ;;  %538 = vmatmul.bf16.vlgmr.msrb.gmra.mxu1 %v432_v62 }
 0x2dd   :  { %v525_v34 = vadd.f32 %v524_v37, %v523_v50  ;;  %v669_v54 = vpop.trf.xlu0 }
 0x2df   :  { %v526_v36 = vrot.slane %v525_v34, 2 }
 0x2e1   :  { %v527_v3 = vadd.f32 %v526_v36, %v525_v34 }
 0x2e3   :  { %v528_v17 = vrot.slane %v527_v3, 1 }
 0x2e5   :  { %v529_v31 = vadd.f32 %v528_v17, %v527_v3  ;;  %v670_v63 = vpop.trf.xlu0 }
 0x2e7   :  { %v1026_v2 = vmul.f32 0.1, %v529_v31 }
 0x2e9   :  { %v1027_v4 = vsub.f32 %v246_v22, %v1026_v2 }
 0x2eb   :  { %1028 = vst [vmem:[#allocation7] sm:$0x1] %v1027_v4 }
 0x2ed   :  { %v671_v17 = vpop.trf.xlu0 }
 0x358   :  { %v539_v35 = vpop.f32.mrf.mxu1 }
 0x360   :  { %v541_v61 = vpop.f32.mrf.mxu1 }
 0x361   :  { %v634_v42 = vadd.f32 %v541_v61, %v539_v35  ;;  %v544_v59 = vpack.c.bf16 %v541_v61, %v539_v35  ;;  %v212_v61 = vld [vmem:[#allocation3] sm:$0x1] }
 0x363   :  { %v635_v45 = vrot.slane %v634_v42, 4  ;;  %592 = vmatpush.bf16.msrb.mxu2 %v544_v59  ;;  %649 = vmatmul.bf16.vlgmr.msra.gmra.mxu1 %v544_v59 }
 0x365   :  { %v636_v60 = vadd.f32 %v635_v45, %v634_v42  ;;  %v672_v42 = vpop.trf.xlu0 }
 0x367   :  { %v637_v53 = vrot.slane %v636_v60, 2 }
 0x369   :  { %v638_v57 = vadd.f32 %v637_v53, %v636_v60 }
 0x36b   :  { %v639_v43 = vrot.slane %v638_v57, 1 }
 0x36d   :  { %v640_v41 = vadd.f32 %v639_v43, %v638_v57  ;;  %v673_v25 = vpop.trf.xlu0  ;;  %v553_v43 = vpop.trf.xlu1 }
 0x36e   :  { %2362 = vmatmul.msk.bf16.vlgmr.msrb.gmra.mxu2 %vm449_vm15, %v553_v43 }
 0x36f   :  { %v975_v9 = vmul.f32 0.1, %v640_v41 }
 0x371   :  { %v976_v14 = vsub.f32 %v229_v29, %v975_v9 }
 0x373   :  { %977 = vst [vmem:[#allocation5] sm:$0x1] %v976_v14 }
 0x375   :  { %v674_v30 = vpop.trf.xlu0  ;;  %v554_v9 = vpop.trf.xlu1 }
 0x37d   :  { %v675_v60 = vpop.trf.xlu0 }
 0x37e   :  { %2363 = vmatmul.msk.bf16.gmra.mxu2 %vm449_vm15, %v554_v9 }
 0x385   :  { %v676_v53 = vpop.trf.xlu0 }
 0x38d   :  { %v677_v57 = vpop.trf.xlu0 }
 0x395   :  { %v678_v41 = vpop.trf.xlu0 }
 0x39d   :  { %v679_v29 = vpop.trf.xlu0 }
 0x3a5   :  { %v680_v14 = vpop.trf.xlu0 }
 0x3e0   :  { %v650_v46 = vpop.f32.mrf.mxu1 }
 0x3e1   :  { %v657_v50 = vsel %vm3021_vm1, %v650_v46, 0.0 }
 0x3e8   :  { %v652_v62 = vpop.f32.mrf.mxu1 }
 0x3e9   :  { %v658_v37 = vsel %vm3017_vm0, %v652_v62, 0.0  ;;  %v2371_v34 = vpack.c.bf16 %v652_v62, %v650_v46  ;;  %v681_v46 = vpop.trf.xlu0 }
 0x3ea   :  { %v821_v36 = vadd.f32 %v658_v37, %v657_v50 }
 0x3eb   :  { %2372 = vmatpush.bf16.msk.msrb.mxu1 %vm2370_vm2, %v2371_v34 }
 0x3ec   :  { %v822_v3 = vrot.slane %v821_v36, 4 }
 0x3ee   :  { %v823_v31 = vadd.f32 %v822_v3, %v821_v36  ;;  %2373 = vmatmul.msk.bf16.vlgmr.msrb.gmra.mxu1 %vm449_vm15, %v668_v52  ;;  %v555_v52 = vpop.trf.xlu1 }
 0x3ef   :  { %2364 = vmatmul.msk.bf16.gmra.mxu2 %vm449_vm15, %v555_v52 }
 0x3f0   :  { %v824_v22 = vrot.slane %v823_v31, 2 }
 0x3f2   :  { %v825_v2 = vadd.f32 %v824_v22, %v823_v31 }
 0x3f4   :  { %v826_v4 = vrot.slane %v825_v2, 1 }
 0x3f6   :  { %v827_v35 = vadd.f32 %v826_v4, %v825_v2  ;;  %v556_v62 = vpop.trf.xlu1 }
 0x3f8   :  { %v924_v59 = vmul.f32 0.1, %v827_v35 }
 0x3fa   :  { %v925_v45 = vsub.f32 %v212_v61, %v924_v59  ;;  %v441_v61 = vpop.trf.xlu2 }
 0x3fb   :  { %2354 = vmatmul.msk.bf16.vlgmr.msrb.gmra.mxu0 %vm449_vm15, %v441_v61 }
 0x3fc   :  { %926 = vst [vmem:[#allocation3] sm:$0x1] %v925_v45  ;;  %v3135_v45 = vpop.f32.mrf.mxu2 }
 0x3fe   :  { %2374 = vmatmul.msk.bf16.gmra.mxu1 %vm449_vm15, %v670_v63  ;;  %v682_v63 = vpop.trf.xlu0  ;;  %v557_v37 = vpop.trf.xlu1 }
 0x3ff   :  { %2365 = vmatmul.msk.bf16.gmra.mxu2 %vm449_vm15, %v556_v62 }
 0x406   :  { %v558_v3 = vpop.trf.xlu1  ;;  %v683_v62 = vpop.trf.xlu0 }
 0x40e   :  { %2375 = vmatmul.msk.bf16.gmra.mxu1 %vm449_vm15, %v672_v42  ;;  %v559_v2 = vpop.trf.xlu1 }
 0x40f   :  { %2366 = vmatmul.msk.bf16.gmra.mxu2 %vm449_vm15, %v557_v37 }
 0x416   :  { %v560_v35 = vpop.trf.xlu1 }
 0x41e   :  { %2376 = vmatmul.msk.bf16.gmra.mxu1 %vm449_vm15, %v674_v30 }
 0x41f   :  { %2367 = vmatmul.msk.bf16.gmra.mxu2 %vm449_vm15, %v558_v3 }
 0x42e   :  { %2377 = vmatmul.msk.bf16.gmra.mxu1 %vm449_vm15, %v676_v53 }
 0x42f   :  { %2368 = vmatmul.msk.bf16.gmra.mxu2 %vm449_vm15, %v559_v2 }
 0x43e   :  { %2378 = vmatmul.msk.bf16.gmra.mxu1 %vm449_vm15, %v678_v41 }
 0x43f   :  { %2369 = vmatmul.msk.bf16.gmra.mxu2 %vm449_vm15, %v560_v35 }
 0x44e   :  { %2379 = vmatmul.msk.bf16.gmra.mxu1 %vm449_vm15, %v680_v14 }
 0x45e   :  { %2380 = vmatmul.msk.bf16.gmra.mxu1 %vm449_vm15, %v682_v63 }
 0x46b   :  { %v3115_v50 = vpop.f32.mrf.mxu1 }
 0x46e   :  { %2381 = vmatmul.msk.bf16.gmra.mxu1 %vm449_vm15, %v669_v54 }
 0x473   :  { %v3119_v34 = vpop.f32.mrf.mxu1 }
 0x47b   :  { %v3121_v36 = vpop.f32.mrf.mxu1 }
 0x47e   :  { %2382 = vmatmul.msk.bf16.gmra.mxu1 %vm449_vm15, %v671_v17 }
 0x483   :  { %v3125_v31 = vpop.f32.mrf.mxu1 }
 0x48b   :  { %v3127_v22 = vpop.f32.mrf.mxu1 }
 0x48e   :  { %2383 = vmatmul.msk.bf16.gmra.mxu1 %vm449_vm15, %v673_v25  ;;  %v442_v25 = vpop.trf.xlu2 }
 0x48f   :  { %2355 = vmatmul.msk.bf16.gmra.mxu0 %vm449_vm15, %v442_v25 }
 0x493   :  { %v753_v54 = vpop.f32.mrf.mxu1 }
 0x496   :  { %v443_v41 = vpop.trf.xlu2 }
 0x49b   :  { %v756_v4 = vpop.f32.mrf.mxu1 }
 0x49e   :  { %2384 = vmatmul.msk.bf16.gmra.mxu1 %vm449_vm15, %v675_v60  ;;  %v3139_v60 = vpop.f32.mrf.mxu2  ;;  %v444_v63 = vpop.trf.xlu2 }
 0x49f   :  { %2356 = vmatmul.msk.bf16.gmra.mxu0 %vm449_vm15, %v443_v41 }
 0x4a3   :  { %v758_v17 = vpop.f32.mrf.mxu1 }
 0x4a6   :  { %v3141_v43 = vpop.f32.mrf.mxu2 }
 0x4ab   :  { %v761_v42 = vpop.f32.mrf.mxu1 }
 0x4ae   :  { %2385 = vmatmul.msk.bf16.gmra.mxu1 %vm449_vm15, %v677_v57  ;;  %v3145_v57 = vpop.f32.mrf.mxu2 }
 0x4af   :  { %2357 = vmatmul.msk.bf16.gmra.mxu0 %vm449_vm15, %v444_v63  ;;  %v445_v63 = vpop.trf.xlu2 }
 0x4b3   :  { %v763_v59 = vpop.f32.mrf.mxu1 }
 0x4b6   :  { %v3147_v52 = vpop.f32.mrf.mxu2 }
 0x4bb   :  { %v766_v30 = vpop.f32.mrf.mxu1 }
 0x4be   :  { %2386 = vmatmul.msk.bf16.gmra.mxu1 %vm449_vm15, %v679_v29  ;;  %v3151_v37 = vpop.f32.mrf.mxu2 }
 0x4bf   :  { %2358 = vmatmul.msk.bf16.gmra.mxu0 %vm449_vm15, %v445_v63 }
 0x4c3   :  { %v768_v53 = vpop.f32.mrf.mxu1 }
 0x4c4   :  { %v839_v51 = vmul.f32 0.1, %v768_v53 }
 0x4c6   :  { %v3159_v58 = vpop.f32.mrf.mxu2 }
 0x4cb   :  { %v771_v9 = vpop.f32.mrf.mxu1 }
 0x4cc   :  { %v840_v25 = vmul.f32 0.1, %v771_v9 }
 0x4ce   :  { %2387 = vmatmul.msk.bf16.gmra.mxu1 %vm449_vm15, %v681_v46  ;;  %v3168_v9 = vsub.f32 %v2681_v5, %v840_v25 }
 0x4d0   :  { %4024 = vst [vmem:[#allocation34_spill] sm:$0xff] %v3168_v9 }
 0x4d3   :  { %v773_v14 = vpop.f32.mrf.mxu1 }
 0x4d4   :  { %v841_v35 = vmul.f32 0.1, %v773_v14 }
 0x4db   :  { %v776_v29 = vpop.f32.mrf.mxu1 }
 0x4dc   :  { %v842_v3 = vmul.f32 0.1, %v776_v29  ;;  %v838_v29 = vmul.f32 0.1, %v766_v30  ;;  %v835_v30 = vmul.f32 0.1, %v758_v17 }
 0x4dd   :  { %v832_v17 = vmul.f32 0.1, %v3127_v22 }
 0x4de   :  { %2388 = vmatmul.msk.bf16.gmra.mxu1 %vm449_vm15, %v683_v62  ;;  %v3154_v46 = vsub.f32 %v2663_v0, %v842_v3  ;;  %v3163_v62 = vsub.f32 %v2686_v6, %v841_v35  ;;  %v3173_v3 = vsub.f32 %v2704_v13, %v839_v51  ;;  %v3178_v6 = vsub.f32 %v2699_v12, %v838_v29  ;;  %v3180_v35 = vpop.f32.mrf.mxu2 }
 0x4df   :  { %v3195_v25 = vsub.f32 %v2740_v24, %v835_v30  ;;  %v830_v24 = vmul.f32 0.1, %v3121_v36  ;;  %v3210_v22 = vsub.f32 %v2775_v33, %v832_v17  ;;  %v829_v29 = vmul.f32 0.1, %v3119_v34 }
 0x4e0   :  { %4025 = vst [vmem:[#allocation35_spill] sm:$0xff] %v3173_v3  ;;  %v1104_v53 = vpack.c.bf16 %v3163_v62, %v3168_v9  ;;  %v1103_v5 = vpack.c.bf16 %v3173_v3, %v3178_v6 }
 0x4e1   :  { %4026 = vst [vmem:[#allocation36_spill] sm:$0xff] %v3178_v6 }
 0x4e3   :  { %v778_v2 = vpop.f32.mrf.mxu1 }
 0x4e4   :  { %v843_v61 = vmul.f32 0.1, %v778_v2  ;;  %v836_v2 = vmul.f32 0.1, %v761_v42  ;;  %v833_v42 = vmul.f32 0.1, %v753_v54 }
 0x4e6   :  { %v3157_v41 = vsub.f32 %v2668_v1, %v843_v61  ;;  %v837_v1 = vmul.f32 0.1, %v763_v59  ;;  %v834_v59 = vmul.f32 0.1, %v756_v4  ;;  %v3188_v13 = vsub.f32 %v2717_v18, %v836_v2  ;;  %v446_v4 = vpop.trf.xlu2 }
 0x4e7   :  { %2359 = vmatmul.msk.bf16.gmra.mxu0 %vm449_vm15, %v446_v4  ;;  %v831_v18 = vmul.f32 0.1, %v3125_v31  ;;  %v3227_v2 = vsub.f32 %v2859_v56, %v829_v29  ;;  %v3255_v29 = vpop.f32.mrf.mxu0 }
 0x4e8   :  { %v1105_v14 = vpack.c.bf16 %v3157_v41, %v3154_v46  ;;  %v3185_v61 = vsub.f32 %v2722_v19, %v837_v1  ;;  %4028 = vst [vmem:[#allocation38_spill] sm:$0xff] %v3188_v13  ;;  %v3199_v63 = vsub.f32 %v2735_v23, %v834_v59  ;;  %v614_v19 = vpop.f32.mrf.mxu2 }
 0x4e9   :  { %v3218_v31 = vsub.f32 %v2823_v47, %v831_v18  ;;  %v2391_v47 = vld [vmem:[%s3935_s0] sm:$0xf] }
 0x4ea   :  { %1127 = vmatpush.bf16.msrb.mxu3 %v1105_v14  ;;  %4027 = vst [vmem:[#allocation37_spill] sm:$0xff] %v3185_v61  ;;  %v1102_v12 = vpack.c.bf16 %v3185_v61, %v3188_v13  ;;  %v1101_v54 = vpack.c.bf16 %v3195_v25, %v3199_v63  ;;  %v3206_v14 = vsub.f32 %v2790_v38, %v833_v42 }
 0x4eb   :  { %v3170_v0 = vpop.f32.mrf.mxu1  ;;  %v3222_v38 = vsub.f32 %v2813_v44, %v830_v24  ;;  %v2443_v44 = vld [vmem:[%s3935_s0 + $0x4] sm:$0xf0] }
 0x4ec   :  { %v1100_v1 = vpack.c.bf16 %v3206_v14, %v3210_v22 }
 0x4ed   :  { %v1099_v33 = vpack.c.bf16 %v3218_v31, %v3222_v38 }
 0x4ee   :  { %1128 = vmatpush.bf16.msrb.mxu3 %v1104_v53  ;;  %v828_v53 = vmul.f32 0.1, %v3115_v50 }
 0x4f0   :  { %v616_v36 = vpop.f32.mrf.mxu2  ;;  %v3230_v34 = vsub.f32 %v2854_v55, %v828_v53  ;;  %v447_v55 = vpop.trf.xlu2 }
 0x4f2   :  { %1129 = vmatpush.bf16.msrb.mxu3 %v1103_v5  ;;  %v1098_v30 = vpack.c.bf16 %v3227_v2, %v3230_v34  ;;  %v3242_v5 = vor.u32 %v2443_v44, %v2391_v47  ;;  %v3259_v47 = vpop.f32.mrf.mxu0 }
 0x4f3   :  { %v3190_v51 = vpop.f32.mrf.mxu1 }
 0x4f6   :  { %1130 = vmatpush.bf16.msrb.mxu3 %v1102_v12 }
 0x4f7   :  { %2360 = vmatmul.msk.bf16.gmra.mxu0 %vm449_vm15, %v447_v55 }
 0x4f8   :  { %v619_v56 = vpop.f32.mrf.mxu2  ;;  %v448_v4 = vpop.trf.xlu2 }
 0x4fa   :  { %1131 = vmatpush.bf16.msrb.mxu3 %v1101_v54 }
 0x4fb   :  { %v3212_v23 = vpop.f32.mrf.mxu1 }
 0x4fe   :  { %1132 = vmatpush.bf16.msrb.mxu3 %v1100_v1 }
 0x500   :  { %v621_v42 = vpop.f32.mrf.mxu2 }
 0x502   :  { %1133 = vmatpush.bf16.msrb.mxu3 %v1099_v33 }
 0x503   :  { %v3238_v50 = vpop.f32.mrf.mxu1 }
 0x506   :  { %1134 = vmatpush.bf16.msrb.mxu3 %v1098_v30 }
 0x507   :  { %2361 = vmatmul.msk.bf16.gmra.mxu0 %vm449_vm15, %v448_v4 }
 0x508   :  { %v624_v17 = vpop.f32.mrf.mxu2 }
 0x509   :  { %1135 = vmatmul.bf16.vlgmr.msrb.gmra.mxu3 %v3242_v5  ;;  %v939_v44 = vmul.f32 0.1, %v624_v17 }
 0x50b   :  { %v3246_v59 = vpop.f32.mrf.mxu1  ;;  %v3268_v6 = vsub.f32 %v2755_v28, %v939_v44  ;;  %v935_v28 = vmul.f32 0.1, %v614_v19 }
 0x50d   :  { %4029 = vst [vmem:[#allocation39_spill] sm:$0xff] %v3268_v6 }
 0x510   :  { %v626_v54 = vpop.f32.mrf.mxu2 }
 0x511   :  { %v940_v30 = vmul.f32 0.1, %v626_v54  ;;  %v3279_v54 = vpop.f32.mrf.mxu0 }
 0x513   :  { %v3248_v12 = vpop.f32.mrf.mxu1  ;;  %v3271_v3 = vsub.f32 %v2770_v32, %v940_v30 }
 0x515   :  { %4030 = vst [vmem:[#allocation40_spill] sm:$0xff] %v3271_v3 }
 0x518   :  { %v629_v1 = vpop.f32.mrf.mxu2 }
 0x519   :  { %v941_v33 = vmul.f32 0.1, %v629_v1  ;;  %v938_v1 = vmul.f32 0.1, %v621_v42  ;;  %v3299_v42 = vpop.f32.mrf.mxu0 }
 0x51b   :  { %v3251_v18 = vpop.f32.mrf.mxu1  ;;  %v3262_v13 = vsub.f32 %v2745_v26, %v941_v33  ;;  %v937_v26 = vmul.f32 0.1, %v619_v56  ;;  %v936_v33 = vmul.f32 0.1, %v616_v36  ;;  %v3291_v44 = vsub.f32 %v2800_v40, %v938_v1 }
 0x51c   :  { %v933_v36 = vmul.f32 0.1, %v3159_v58 }
 0x51d   :  { %v3288_v32 = vsub.f32 %v2795_v39, %v937_v26  ;;  %4032 = vst [vmem:[#allocation42_spill] sm:$0xff] %v3291_v44  ;;  %v3297_v56 = vsub.f32 %v2833_v49, %v936_v33  ;;  %v934_v39 = vmul.f32 0.1, %v3180_v35  ;;  %v932_v49 = vmul.f32 0.1, %v3151_v37 }
 0x51e   :  { %v3315_v26 = vsub.f32 %v2897_v7, %v933_v36  ;;  %v929_v35 = vmul.f32 0.1, %v3141_v43  ;;  %v928_v37 = vmul.f32 0.1, %v3139_v60 }
 0x51f   :  { %4031 = vst [vmem:[#allocation41_spill] sm:$0xff] %v3288_v32  ;;  %v3303_v19 = vpack.c.bf16 %v3291_v44, %v3288_v32  ;;  %v3318_v1 = vsub.f32 %v2902_v8, %v934_v39  ;;  %v927_v8 = vmul.f32 0.1, %v3135_v45  ;;  %v2498_v44 = vld [vmem:[%s3938_s3 + $0xf8] sm:$0xff] }
 0x520   :  { %v631_v55 = vpop.f32.mrf.mxu2  ;;  %4034 = vst [vmem:[#allocation44_spill] sm:$0xff] %v3297_v56  ;;  %v3338_v36 = vsub.f32 %v2927_v15, %v929_v35  ;;  %v3354_v45 = vsub.f32 %v2947_v21, %v928_v37 }
 0x521   :  { %v942_v4 = vmul.f32 0.1, %v631_v55  ;;  %v3294_v55 = vsub.f32 %v2828_v48, %v935_v28  ;;  %v931_v48 = vmul.f32 0.1, %v3147_v52  ;;  %v3321_v58 = vpop.f32.mrf.mxu0  ;;  %v930_v28 = vmul.f32 0.1, %v3145_v57 }
 0x522   :  { %v3329_v52 = vsub.f32 %v2917_v11, %v932_v49  ;;  %v3333_v7 = vpack.c.bf16 %v3318_v1, %v3315_v26  ;;  %v3351_v39 = vsub.f32 %v2942_v20, %v927_v8 }
 0x523   :  { %v3253_v24 = vpop.f32.mrf.mxu1  ;;  %v3265_v61 = vsub.f32 %v2750_v27, %v942_v4  ;;  %v3284_v27 = vpack.c.bf16 %v3271_v3, %v3268_v6  ;;  %4033 = vst [vmem:[#allocation43_spill] sm:$0xff] %v3294_v55  ;;  %v3310_v40 = vpack.c.bf16 %v3297_v56, %v3294_v55  ;;  %v3326_v33 = vsub.f32 %v2912_v10, %v931_v48  ;;  %v2497_v56 = vld [vmem:[%s3938_s3 + $0xf0] sm:$0xff] }
 0x524   :  { %v3341_v43 = vsub.f32 %v2932_v16, %v930_v28  ;;  %v3364_v16 = vpack.c.bf16 %v3354_v45, %v3351_v39 }
 0x525   :  { %v3277_v17 = vpack.c.bf16 %v3265_v61, %v3262_v13  ;;  %v3346_v10 = vpack.c.bf16 %v3329_v52, %v3326_v33 }
 0x526   :  { %v3359_v15 = vpack.c.bf16 %v3341_v43, %v3338_v36 }
 0x527   :  { %1169 = vmatpush.bf16.msra.mxu0 %v3277_v17 }
 0x529   :  { %v3348_v57 = vpop.f32.mrf.mxu0 }
 0x52b   :  { %v3257_v53 = vpop.f32.mrf.mxu1  ;;  %1170 = vmatpush.bf16.msra.mxu0 %v3284_v27 }
 0x52f   :  { %1171 = vmatpush.bf16.msra.mxu0 %v3303_v19 }
 0x531   :  { %v3366_v48 = vpop.f32.mrf.mxu0 }
 0x533   :  { %v3273_v9 = vpop.f32.mrf.mxu1  ;;  %1172 = vmatpush.bf16.msra.mxu0 %v3310_v40 }
 0x537   :  { %1173 = vmatpush.bf16.msra.mxu0 %v3333_v7 }
 0x539   :  { %v3369_v21 = vpop.f32.mrf.mxu0 }
 0x53b   :  { %v806_v30 = vpop.f32.mrf.mxu1  ;;  %1174 = vmatpush.bf16.msra.mxu0 %v3346_v10 }
 0x53f   :  { %1175 = vmatpush.bf16.msra.mxu0 %v3359_v15 }
 0x541   :  { %v3371_v37 = vpop.f32.mrf.mxu0 }
 0x543   :  { %v808_v4 = vpop.f32.mrf.mxu1  ;;  %1176 = vmatpush.bf16.msra.mxu0 %v3364_v16 }
 0x544   :  { %v855_v3 = vmul.f32 0.1, %v808_v4  ;;  %v2501_v4 = vld [vmem:[%s3938_s3 + $0xd8] sm:$0xff] }
 0x54b   :  { %v811_v11 = vpop.f32.mrf.mxu1 }
 0x54c   :  { %v856_v55 = vmul.f32 0.1, %v811_v11 }
 0x553   :  { %v813_v60 = vpop.f32.mrf.mxu1 }
 0x554   :  { %v857_v28 = vmul.f32 0.1, %v813_v60  ;;  %v2499_v60 = vld [vmem:[%s3938_s3 + $0xe8] sm:$0xff] }
 0x55b   :  { %v816_v20 = vpop.f32.mrf.mxu1 }
 0x55c   :  { %v858_v49 = vmul.f32 0.1, %v816_v20  ;;  %v3386_v20 = vsub.f32 %v2499_v60, %v857_v28  ;;  %v3403_v60 = vpop.f32.mrf.mxu0 }
 0x55e   :  { %v3376_v32 = vsub.f32 %v2497_v56, %v858_v49  ;;  %4037 = vst [vmem:[#allocation47_spill] sm:$0xff] %v3386_v20  ;;  %v2500_v56 = vld [vmem:[%s3938_s3 + $0xe0] sm:$0xff] }
 0x55f   :  { %v3393_v49 = vsub.f32 %v2500_v56, %v856_v55  ;;  %v2502_v55 = vld [vmem:[%s3938_s3 + $0xd0] sm:$0xff] }
 0x560   :  { %4035 = vst [vmem:[#allocation45_spill] sm:$0xff] %v3376_v32 }
 0x561   :  { %4038 = vst [vmem:[#allocation48_spill] sm:$0xff] %v3393_v49  ;;  %v1112_v28 = vpack.c.bf16 %v3386_v20, %v3393_v49  ;;  %v2504_v49 = vld [vmem:[%s3938_s3 + $0xc0] sm:$0xff] }
 0x562   :  { %v4051_v20 = vld [vmem:[#allocation18_spill] sm:$0xff] }
 0x563   :  { %v818_v35 = vpop.f32.mrf.mxu1 }
 0x564   :  { %v859_v8 = vmul.f32 0.1, %v818_v35  ;;  %v854_v35 = vmul.f32 0.1, %v806_v30  ;;  %v852_v30 = vmul.f32 0.1, %v3257_v53 }
 0x565   :  { %v850_v53 = vmul.f32 0.1, %v3251_v18  ;;  %v848_v18 = vmul.f32 0.1, %v3246_v59  ;;  %v846_v59 = vmul.f32 0.1, %v3212_v23 }
 0x566   :  { %v3381_v6 = vsub.f32 %v2498_v44, %v859_v8  ;;  %v853_v44 = vmul.f32 0.1, %v3273_v9  ;;  %v3399_v8 = vsub.f32 %v2501_v4, %v855_v3  ;;  %v851_v9 = vmul.f32 0.1, %v3253_v24  ;;  %v2503_v3 = vld [vmem:[%s3938_s3 + $0xc8] sm:$0xff]  ;;  %v2509_v23 = vld [vmem:[%s3938_s3 + $0x90] sm:$0xff] }
 0x567   :  { %v849_v24 = vmul.f32 0.1, %v3248_v12  ;;  %v847_v12 = vmul.f32 0.1, %v3238_v50  ;;  %v845_v50 = vmul.f32 0.1, %v3190_v51 }
 0x568   :  { %4036 = vst [vmem:[#allocation46_spill] sm:$0xff] %v3381_v6  ;;  %v1113_v11 = vpack.c.bf16 %v3381_v6, %v3376_v32  ;;  %v3415_v56 = vsub.f32 %v2503_v3, %v853_v44  ;;  %v508_v3 = vpop.f32.mrf.mxu0 }
 0x569   :  { %4039 = vst [vmem:[#allocation49_spill] sm:$0xff] %v3399_v8 }
 0x56a   :  { %1141 = vmatpush.bf16.msra.mxu3 %v1113_v11  ;;  %v3409_v11 = vsub.f32 %v2502_v55, %v854_v35  ;;  %4041 = vst [vmem:[#allocation51_spill] sm:$0xff] %v3415_v56  ;;  %v3423_v35 = vsub.f32 %v2504_v49, %v852_v30  ;;  %v2506_v49 = vld [vmem:[%s3938_s3 + $0xb0] sm:$0xff] }
 0x56b   :  { %v3437_v30 = vsub.f32 %v2506_v49, %v850_v53 }
 0x56c   :  { %4040 = vst [vmem:[#allocation50_spill] sm:$0xff] %v3409_v11  ;;  %v1111_v4 = vpack.c.bf16 %v3399_v8, %v3409_v11  ;;  %v1110_v55 = vpack.c.bf16 %v3415_v56, %v3423_v35  ;;  %v844_v56 = vmul.f32 0.1, %v3170_v0  ;;  %v3463_v11 = vsub.f32 %v2509_v23, %v846_v59  ;;  %v2442_v0 = vld [vmem:[%s3935_s0 + $0x4] sm:$0xf] }
 0x56d   :  { %4042 = vst [vmem:[#allocation52_spill] sm:$0xff] %v3423_v35  ;;  %v2508_v35 = vld [vmem:[%s3938_s3 + $0xa0] sm:$0xff]  ;;  %v2393_v59 = vld [vmem:[%s3935_s0 + $0x8] sm:$0xf0] }
 0x56e   :  { %1142 = vmatpush.bf16.msra.mxu3 %v1112_v28  ;;  %v2505_v28 = vld [vmem:[%s3938_s3 + $0xb8] sm:$0xff]  ;;  %4044 = vst [vmem:[#allocation54_spill] sm:$0xff] %v3437_v30  ;;  %v3451_v53 = vsub.f32 %v2508_v35, %v848_v18 }
 0x56f   :  { %v3429_v44 = vsub.f32 %v2505_v28, %v851_v9  ;;  %v2507_v9 = vld [vmem:[%s3938_s3 + $0xa8] sm:$0xff]  ;;  %v4049_v35 = vld [vmem:[#allocation17_spill] sm:$0xff] }
 0x570   :  { %4046 = vst [vmem:[#allocation56_spill] sm:$0xff] %v3451_v53  ;;  %v3466_v18 = vsub.f32 %v4049_v35, %v845_v50 }
 0x571   :  { %4043 = vst [vmem:[#allocation53_spill] sm:$0xff] %v3429_v44  ;;  %v1109_v28 = vpack.c.bf16 %v3429_v44, %v3437_v30  ;;  %v4052_v44 = vld [vmem:[#allocation19_spill] sm:$0xff] }
 0x572   :  { %1143 = vmatpush.bf16.msra.mxu3 %v1111_v4  ;;  %v3443_v4 = vsub.f32 %v2507_v9, %v849_v24  ;;  %v510_v9 = vpop.f32.mrf.mxu0 }
 0x574   :  { %4045 = vst [vmem:[#allocation55_spill] sm:$0xff] %v3443_v4  ;;  %v1108_v24 = vpack.c.bf16 %v3443_v4, %v3451_v53  ;;  %v988_v4 = vmul.f32 0.1, %v508_v3  ;;  %v989_v53 = vmul.f32 0.1, %v510_v9 }
 0x576   :  { %1144 = vmatpush.bf16.msra.mxu3 %v1110_v55  ;;  %v4047_v55 = vld [vmem:[#allocation15_spill] sm:$0xff] }
 0x577   :  { %v3455_v49 = vsub.f32 %v4047_v55, %v847_v12  ;;  %v4050_v12 = vld [vmem:[#allocation16_spill] sm:$0xff] }
 0x579   :  { %4048 = vst [vmem:[#allocation15_spill] sm:$0xff] %v3455_v49  ;;  %v1107_v51 = vpack.c.bf16 %v3455_v49, %v3463_v11 }
 0x57a   :  { %1145 = vmatpush.bf16.msra.mxu3 %v1109_v28  ;;  %v3471_v28 = vsub.f32 %v4050_v12, %v844_v56  ;;  %v513_v50 = vpop.f32.mrf.mxu0 }
 0x57b   :  { %v990_v12 = vmul.f32 0.1, %v513_v50  ;;  %v987_v50 = vmul.f32 0.1, %v3403_v60 }
 0x57c   :  { %v1106_v55 = vpack.c.bf16 %v3466_v18, %v3471_v28 }
 0x57e   :  { %1146 = vmatpush.bf16.msra.mxu3 %v1108_v24  ;;  %v3481_v24 = vor.u32 %v2442_v0, %v2393_v59  ;;  %v4053_v0 = vld [vmem:[#allocation20_spill] sm:$0xff] }
 0x57f   :  { %v3491_v59 = vsub.f32 %v4053_v0, %v990_v12 }
 0x582   :  { %1147 = vmatpush.bf16.msra.mxu3 %v1107_v51  ;;  %v515_v56 = vpop.f32.mrf.mxu0 }
 0x583   :  { %v991_v8 = vmul.f32 0.1, %v515_v56  ;;  %v4055_v56 = vld [vmem:[#allocation22_spill] sm:$0xff] }
 0x586   :  { %1148 = vmatpush.bf16.msra.mxu3 %v1106_v55  ;;  %v4054_v55 = vld [vmem:[#allocation21_spill] sm:$0xff] }
 0x587   :  { %v3494_v49 = vsub.f32 %v4054_v55, %v991_v8  ;;  %v984_v8 = vmul.f32 0.1, %v3366_v48  ;;  %v4060_v55 = vld [vmem:[#allocation26_spill] sm:$0xff]  ;;  %v4062_v48 = vld [vmem:[#allocation27_spill] sm:$0xff] }
 0x589   :  { %1149 = vmatmul.bf16.vlgmr.msra.gmra.mxu3 %v3481_v24  ;;  %v1190_v9 = vpack.c.bf16 %v3494_v49, %v3491_v59 }
 0x58a   :  { %v518_v23 = vpop.f32.mrf.mxu0 }
 0x58b   :  { %v992_v35 = vmul.f32 0.1, %v518_v23 }
 0x58d   :  { %v3485_v6 = vsub.f32 %v4051_v20, %v992_v35  ;;  %v986_v20 = vmul.f32 0.1, %v3371_v37  ;;  %v985_v35 = vmul.f32 0.1, %v3369_v21  ;;  %v4059_v37 = vld [vmem:[#allocation25_spill] sm:$0xff] }
 0x58e   :  { %v3514_v0 = vsub.f32 %v4059_v37, %v987_v50  ;;  %v980_v50 = vmul.f32 0.1, %v3279_v54  ;;  %v4068_v37 = vld [vmem:[#allocation30_spill] sm:$0xff]  ;;  %v4070_v54 = vld [vmem:[#allocation31_spill] sm:$0xff] }
 0x58f   :  { %v3524_v21 = vsub.f32 %v4062_v48, %v985_v35  ;;  %v979_v35 = vmul.f32 0.1, %v3259_v47 }
 0x591   :  { %4063 = vst [vmem:[#allocation18_spill] sm:$0xff] %v3524_v21 }
 0x592   :  { %v520_v51 = vpop.f32.mrf.mxu0 }
 0x593   :  { %v993_v32 = vmul.f32 0.1, %v520_v51  ;;  %v4057_v51 = vld [vmem:[#allocation24_spill] sm:$0xff] }
 0x594   :  { %v3511_v12 = vsub.f32 %v4057_v51, %v986_v20 }
 0x595   :  { %v3488_v30 = vsub.f32 %v4052_v44, %v993_v32  ;;  %v3501_v32 = vsub.f32 %v4055_v56, %v988_v4  ;;  %v4056_v44 = vld [vmem:[#allocation23_spill] sm:$0xff]  ;;  %v982_v4 = vmul.f32 0.1, %v3321_v58  ;;  %v981_v56 = vmul.f32 0.1, %v3299_v42  ;;  %v4066_v58 = vld [vmem:[#allocation29_spill] sm:$0xff] }
 0x596   :  { %v3504_v3 = vsub.f32 %v4056_v44, %v989_v53  ;;  %4058 = vst [vmem:[#allocation17_spill] sm:$0xff] %v3511_v12  ;;  %v983_v53 = vmul.f32 0.1, %v3348_v57  ;;  %v1188_v20 = vpack.c.bf16 %v3514_v0, %v3511_v12  ;;  %v4064_v44 = vld [vmem:[#allocation28_spill] sm:$0xff] }
 0x597   :  { %v1191_v23 = vpack.c.bf16 %v3488_v30, %v3485_v6  ;;  %v3544_v42 = vsub.f32 %v4070_v54, %v981_v56 }
 0x598   :  { %v1189_v60 = vpack.c.bf16 %v3504_v3, %v3501_v32  ;;  %v3534_v51 = vsub.f32 %v4066_v58, %v983_v53  ;;  %v4072_v53 = vld [vmem:[#allocation32_spill] sm:$0xff] }
 0x599   :  { %1380 = vmatpush.bf16.xpose.msrb.mxu0 %v1191_v23  ;;  %1195 = vmatpush.bf16.msra.mxu2 %v1191_v23  ;;  %v3521_v23 = vsub.f32 %v4060_v55, %v984_v8  ;;  %v978_v8 = vmul.f32 0.1, %v3255_v29  ;;  %v3541_v55 = vsub.f32 %v4068_v37, %v980_v50  ;;  %4071 = vst [vmem:[#allocation22_spill] sm:$0xff] %v3544_v42 }
 0x59a   :  { %4067 = vst [vmem:[#allocation20_spill] sm:$0xff] %v3534_v51 }
 0x59b   :  { %4061 = vst [vmem:[#allocation16_spill] sm:$0xff] %v3521_v23  ;;  %v1187_v57 = vpack.c.bf16 %v3524_v21, %v3521_v23  ;;  %v3549_v48 = vsub.f32 %v4072_v53, %v978_v8  ;;  %v1185_v29 = vpack.c.bf16 %v3544_v42, %v3541_v55  ;;  %v2461_v8 = vld [vmem:[#allocation3] ss:$0 sm:$0xff] }
 0x59c   :  { %4069 = vst [vmem:[#allocation21_spill] sm:$0xff] %v3541_v55 }
 0x59d   :  { %1196 = vmatpush.bf16.msra.mxu2 %v1190_v9  ;;  %4073 = vst [vmem:[#allocation23_spill] sm:$0xff] %v3549_v48 }
 0x5a1   :  { %1381 = vmatpush.bf16.xpose.msrb.mxu0 %v1190_v9  ;;  %1197 = vmatpush.bf16.msra.mxu2 %v1189_v60  ;;  %v3531_v9 = vsub.f32 %v4064_v44, %v982_v4  ;;  %v4074_v44 = vld [vmem:[#allocation33_spill] sm:$0xff] }
 0x5a2   :  { %v3552_v58 = vsub.f32 %v4074_v44, %v979_v35 }
 0x5a3   :  { %4065 = vst [vmem:[#allocation19_spill] sm:$0xff] %v3531_v9  ;;  %v1186_v4 = vpack.c.bf16 %v3534_v51, %v3531_v9 }
 0x5a4   :  { %4075 = vst [vmem:[#allocation24_spill] sm:$0xff] %v3552_v58  ;;  %v1184_v47 = vpack.c.bf16 %v3552_v58, %v3549_v48 }
 0x5a5   :  { %1198 = vmatpush.bf16.msra.mxu2 %v1188_v20 }
 0x5a9   :  { %1382 = vmatpush.bf16.xpose.msrb.mxu0 %v1189_v60  ;;  %1199 = vmatpush.bf16.msra.mxu2 %v1187_v57  ;;  %v1136_v60 = vpop.f32.mrf.mxu3 }
 0x5aa   :  { %v1137_v35 = vadd.f32 %v2461_v8, %v1136_v60 }
 0x5ad   :  { %1200 = vmatpush.bf16.msra.mxu2 %v1186_v4 }
 0x5b1   :  { %1383 = vmatpush.bf16.xpose.msrb.mxu0 %v1188_v20  ;;  %1201 = vmatpush.bf16.msra.mxu2 %v1185_v29  ;;  %v1138_v50 = vpop.f32.mrf.mxu3 }
 0x5b2   :  { %v1139_v54 = vadd.f32 %v2461_v8, %v1138_v50 }
 0x5b5   :  { %1202 = vmatpush.bf16.msra.mxu2 %v1184_v47 }
 0x5b9   :  { %1384 = vmatpush.bf16.xpose.msrb.mxu0 %v1187_v57 }
 0x5c1   :  { %1385 = vmatpush.bf16.xpose.msrb.mxu0 %v1186_v4 }
 0x5c9   :  { %1386 = vmatpush.bf16.xpose.msrb.mxu0 %v1185_v29 }
 0x5d1   :  { %1387 = vmatpush.bf16.xpose.msrb.mxu0 %v1184_v47 }
 0x60c   :  { %v1150_v56 = vpop.f32.mrf.mxu3 }
 0x60d   :  { %v1151_v37 = vadd.f32 %v1150_v56, %v1137_v35 }
 0x60f   :  { %v1155_v44 = vmax.f32 %v1151_v37, 0.0 }
 0x611   :  { %vm3560_vm0 = vcmp.gt.f32.partialorder %v1155_v44, 0.0 }
 0x614   :  { %v1152_v53 = vpop.f32.mrf.mxu3 }
 0x615   :  { %v1153_v55 = vadd.f32 %v1152_v53, %v1139_v54 }
 0x617   :  { %v1156_v20 = vmax.f32 %v1153_v55, 0.0  ;;  %v2462_v55 = vld [vmem:[#allocation5] ss:$0 sm:$0xff] }
 0x619   :  { %v3558_v42 = vpack.c.bf16 %v1156_v20, %v1155_v44  ;;  %vm3564_vm1 = vcmp.gt.f32.partialorder %v1156_v20, 0.0 }
 0x61a   :  { %vm2413_vm2 = vmpackc.low %vm3564_vm1, %vm3560_vm0 }
 0x61b   :  { %1177 = vmatmul.bf16.vlgmr.msra.gmra.mxu0 %v3558_v42 }
 0x61c   :  { %1491 = vmatpush.bf16.xpose.msra.mxu0 %v3277_v17 }
 0x624   :  { %1492 = vmatpush.bf16.xpose.msra.mxu0 %v3284_v27 }
 0x62c   :  { %1493 = vmatpush.bf16.xpose.msra.mxu0 %v3303_v19 }
 0x634   :  { %1494 = vmatpush.bf16.xpose.msra.mxu0 %v3310_v40 }
 0x63c   :  { %1495 = vmatpush.bf16.xpose.msra.mxu0 %v3333_v7  ;;  %v2463_v7 = vld [vmem:[#allocation7] ss:$0 sm:$0xff] }
 0x644   :  { %1496 = vmatpush.bf16.xpose.msra.mxu0 %v3346_v10 }
 0x64c   :  { %1497 = vmatpush.bf16.xpose.msra.mxu0 %v3359_v15 }
 0x654   :  { %1498 = vmatpush.bf16.xpose.msra.mxu0 %v3364_v16 }
 0x698   :  { %v1178_v4 = vpop.f32.mrf.mxu0 }
 0x699   :  { %v3581_v29 = vadd.f32 %v2462_v55, %v1178_v4 }
 0x69b   :  { %v1237_v17 = vmul.f32 %v3581_v29, %v3581_v29 }
 0x69d   :  { %1239 = vadd.xlane.f32.xlu1 %v1237_v17 }
 0x6a0   :  { %v1180_v27 = vpop.f32.mrf.mxu0 }
 0x6a1   :  { %v3585_v19 = vadd.f32 %v2462_v55, %v1180_v27 }
 0x6a3   :  { %v1183_v40 = vpack.c.bf16 %v3585_v19, %v3581_v29  ;;  %v1238_v56 = vmul.f32 %v3585_v19, %v3585_v19 }
 0x6a5   :  { %1203 = vmatmul.bf16.vlgmr.msra.gmra.mxu2 %v1183_v40 }
 0x710   :  { %v1240_v8 = vpop.xlane.xlu1 %1239 }
 0x711   :  { %v1243_v35 = vmax.f32 %v1240_v8, 1e-24 }
 0x713   :  { %2477 = vrsqrt.f32 %v1243_v35  ;;  %vm1251_vm5 = vweird.f32 %v1243_v35 }
 0x719   :  { %v2478_v53 = vpop.eup %2477 }
 0x71a   :  { %v1246_v44 = vmul.f32 %v2478_v53, %v1243_v35  ;;  %vm1252_vm3 = vweird.f32 %v2478_v53 }
 0x71b   :  { %vm1253_vm7 = vmor %vm1251_vm5, %vm1252_vm3 }
 0x728   :  { %v1204_v10 = vpop.f32.mrf.mxu2 }
 0x729   :  { %v3589_v15 = vadd.f32 %v2463_v7, %v1204_v10 }
 0x72b   :  { %v1209_v16 = vmul.f32 %v3589_v15, %v3589_v15 }
 0x72d   :  { %1211 = vadd.xlane.f32.xlu0 %v1209_v16 }
 0x730   :  { %v1206_v47 = vpop.f32.mrf.mxu2 }
 0x731   :  { %v1207_v60 = vadd.f32 %v2463_v7, %v1206_v47  ;;  %v1247_v7 = vmul.f32 %v2478_v53, %v1246_v44 }
 0x733   :  { %v1210_v50 = vmul.f32 %v1207_v60, %v1207_v60  ;;  %v1248_v47 = vmul.f32 0.5, %v1247_v7 }
 0x735   :  { %1213 = vadd.xlane.f32.xlu2 %v1210_v50  ;;  %1241 = vadd.xlane.f32.xlu0 %v1238_v56  ;;  %v1249_v8 = vsub.f32 1.5, %v1248_v47 }
 0x737   :  { %v1250_v12 = vmul.f32 %v2478_v53, %v1249_v8 }
 0x75e   :  { %1284 = vxpose.xlu0.c.b16.start.end [1/1] (short) %v1183_v40, 128 }
 0x7a0   :  { %v1212_v37 = vpop.xlane.xlu0 %1211 }
 0x7a1   :  { %v1215_v54 = vmax.f32 %v1212_v37, 1e-24 }
 0x7a3   :  { %2479 = vrsqrt.f32 %v1215_v54  ;;  %vm1223_vm8 = vweird.f32 %v1215_v54 }
 0x7a8   :  { %v1214_v20 = vpop.xlane.xlu2 %1213  ;;  %v1242_v55 = vpop.xlane.xlu0 %1241 }
 0x7a9   :  { %v2480_v4 = vpop.eup %2479  ;;  %v1216_v17 = vmax.f32 %v1214_v20, 1e-24  ;;  %v1244_v27 = vmax.f32 %v1242_v55, 1e-24 }
 0x7aa   :  { %v1218_v10 = vmul.f32 %v2480_v4, %v1215_v54  ;;  %vm1224_vm4 = vweird.f32 %v2480_v4 }
 0x7ab   :  { %2481 = vrsqrt.f32 %v1216_v17  ;;  %vm1225_vm10 = vmor %vm1223_vm8, %vm1224_vm4  ;;  %vm1233_vm11 = vweird.f32 %v1216_v17  ;;  %vm1261_vm13 = vweird.f32 %v1244_v27 }
 0x7ac   :  { %v1219_v16 = vmul.f32 %v2480_v4, %v1218_v10  ;;  %2483 = vrsqrt.f32 %v1244_v27 }
 0x7ae   :  { %v1220_v40 = vmul.f32 0.5, %v1219_v16  ;;  %v1254_v16 = vsel %vm1253_vm7, %v2478_v53, %v1250_v12 }
 0x7b0   :  { %v1221_v37 = vsub.f32 1.5, %v1220_v40 }
 0x7b1   :  { %v2482_v50 = vpop.eup %2481 }
 0x7b2   :  { %v2484_v56 = vpop.eup %2483  ;;  %v1228_v58 = vmul.f32 %v2482_v50, %v1216_v17  ;;  %v1222_v44 = vmul.f32 %v2480_v4, %v1221_v37  ;;  %vm1234_vm6 = vweird.f32 %v2482_v50 }
 0x7b3   :  { %v1256_v9 = vmul.f32 %v2484_v56, %v1244_v27  ;;  %vm1262_vm9 = vweird.f32 %v2484_v56  ;;  %vm1235_vm12 = vmor %vm1233_vm11, %vm1234_vm6 }
 0x7b4   :  { %v1229_v51 = vmul.f32 %v2482_v50, %v1228_v58  ;;  %vm1263_vm14 = vmor %vm1261_vm13, %vm1262_vm9 }
 0x7b5   :  { %v1257_v23 = vmul.f32 %v2484_v56, %v1256_v9  ;;  %v1226_v9 = vsel %vm1225_vm10, %v2480_v4, %v1222_v44 }
 0x7b6   :  { %v1230_v21 = vmul.f32 0.5, %v1229_v51 }
 0x7b7   :  { %v1258_v20 = vmul.f32 0.5, %v1257_v23  ;;  %v1267_v23 = vmul.f32 %v1254_v16, %v3581_v29 }
 0x7b8   :  { %v1231_v55 = vsub.f32 1.5, %v1230_v21  ;;  %v1265_v21 = vmul.f32 %v1226_v9, %v3589_v15 }
 0x7b9   :  { %v1259_v7 = vsub.f32 1.5, %v1258_v20 }
 0x7ba   :  { %v1232_v10 = vmul.f32 %v2482_v50, %v1231_v55 }
 0x7bb   :  { %v1260_v58 = vmul.f32 %v2484_v56, %v1259_v7 }
 0x7bc   :  { %v1236_v51 = vsel %vm1235_vm12, %v2482_v50, %v1232_v10 }
 0x7bd   :  { %v1266_v47 = vmul.f32 %v1236_v51, %v1207_v60  ;;  %v1264_v35 = vsel %vm1263_vm14, %v2484_v56, %v1260_v58  ;;  %vm2134_vm14 = vcmask 0  }
 0x7be   :  { %v1268_v54 = vmul.f32 %v1264_v35, %v3585_v19 }
 0x7bf   :  { %v1270_v40 = vmul.f32 %v1267_v23, %v1266_v47 }
 0x7c0   :  { %v1269_v8 = vmul.f32 %v1268_v54, %v1265_v21 }
 0x7c1   :  { %1273 = vadd.xlane.f32.xlu2 %v1270_v40 }
 0x7c2   :  { %1271 = vadd.xlane.f32.xlu1 %v1269_v8 }
 0x7ea   :  { %1395 = vxpose.xlu2.c.b16.start.end [1/1] (short) %v3558_v42, 128 }
 0x7fc   :  { %1510 = vxpose.binary.xlu1.c.b16.start.end [1/2] (short) %v3481_v24, %v3242_v5, 128 }
 0x80a   :  { %v1292_v12 = vpop.trf.xlu0 }
 0x81a   :  { %v1293_v53 = vpop.trf.xlu0 }
 0x82a   :  { %v1294_v27 = vpop.trf.xlu0 }
 0x834   :  { %v1274_v4 = vpop.xlane.xlu2 %1273 }
 0x835   :  { %v1276_v60 = vmul.f32 %v1274_v4, %v1266_v47  ;;  %v1272_v17 = vpop.xlane.xlu1 %1271 }
 0x836   :  { %v1275_v29 = vmul.f32 %v1272_v17, %v1265_v21 }
 0x837   :  { %v1278_v50 = vsub.f32 %v1267_v23, %v1276_v60  ;;  %v1097_v23 = vld [vmem:[#allocation7] sm:$0x1] }
 0x838   :  { %v1277_v15 = vsub.f32 %v1268_v54, %v1275_v29 }
 0x839   :  { %v1280_v56 = vmul.f32 -0.25, %v1278_v50 }
 0x83a   :  { %v1279_v19 = vmul.f32 -0.25, %v1277_v15  ;;  %v1295_v42 = vpop.trf.xlu0 }
 0x83b   :  { %v1282_v37 = vmul.f32 %v1280_v56, %v1236_v51 }
 0x83c   :  { %v1281_v20 = vmul.f32 %v1279_v19, %v1226_v9  ;;  %v1080_v19 = vld [vmem:[#allocation5] sm:$0x1] }
 0x83e   :  { %v1283_v44 = vpack.c.bf16 %v1282_v37, %v1281_v20  ;;  %v1373_v55 = vadd.f32 %v1282_v37, %v1281_v20 }
 0x840   :  { %v1374_v7 = vrot.slane %v1373_v55, 4  ;;  %1331 = vmatpush.bf16.msrb.mxu2 %v1283_v44  ;;  %2446 = vmatpush.bf16.msrb.mxu3 %v1283_v44 }
 0x841   :  { %1388 = vmatmul.bf16.vlgmr.msrb.gmra.mxu0 %v1283_v44 }
 0x842   :  { %v1375_v5 = vadd.f32 %v1374_v7, %v1373_v55 }
 0x843   :  { %2397 = vmatmul.msk.bf16.vlgmr.msrb.gmra.mxu2 %vm449_vm15, %v1292_v12  ;;  %2400 = vmatmul.msk.bf16.vlgmr.msrb.gmra.mxu3 %vm449_vm15, %v1295_v42 }
 0x844   :  { %v1376_v24 = vrot.slane %v1375_v5, 2 }
 0x846   :  { %v1377_v10 = vadd.f32 %v1376_v24, %v1375_v5 }
 0x848   :  { %v1378_v16 = vrot.slane %v1377_v10, 1 }
 0x84a   :  { %v1379_v58 = vadd.f32 %v1378_v16, %v1377_v10  ;;  %v1296_v9 = vpop.trf.xlu0 }
 0x84c   :  { %v1876_v47 = vmul.f32 0.1, %v1379_v58 }
 0x84e   :  { %v1877_v51 = vsub.f32 %v1097_v23, %v1876_v47 }
 0x850   :  { %1878 = vst [vmem:[#allocation7] sm:$0x1] %v1877_v51 }
 0x853   :  { %2398 = vmatmul.msk.bf16.gmra.mxu2 %vm449_vm15, %v1293_v53  ;;  %2401 = vmatmul.msk.bf16.gmra.mxu3 %vm449_vm15, %v1296_v9 }
 0x85a   :  { %v1297_v35 = vpop.trf.xlu0 }
 0x863   :  { %2399 = vmatmul.msk.bf16.gmra.mxu2 %vm449_vm15, %v1294_v27  ;;  %2402 = vmatmul.msk.bf16.gmra.mxu3 %vm449_vm15, %v1297_v35 }
 0x86a   :  { %v1298_v21 = vpop.trf.xlu0 }
 0x873   :  { %2403 = vmatmul.msk.bf16.gmra.mxu3 %vm449_vm15, %v1298_v21 }
 0x87a   :  { %v1299_v54 = vpop.trf.xlu0 }
 0x883   :  { %2404 = vmatmul.msk.bf16.gmra.mxu3 %vm449_vm15, %v1299_v54 }
 0x88b   :  { %v1403_v53 = vpop.trf.xlu2 }
 0x89b   :  { %v1404_v20 = vpop.trf.xlu2 }
 0x8a8   :  { %v1518_v47 = vpop.trf.xlu1 }
 0x8ab   :  { %v1405_v44 = vpop.trf.xlu2 }
 0x8b0   :  { %v3627_v9 = vpop.trf.xlu1 }
 0x8b8   :  { %v1520_v54 = vpop.trf.xlu1 }
 0x8bb   :  { %v1406_v55 = vpop.trf.xlu2 }
 0x8be   :  { %v1389_v40 = vpop.f32.mrf.mxu0 }
 0x8c6   :  { %v1391_v8 = vpop.f32.mrf.mxu0  ;;  %v3614_v42 = vpop.f32.mrf.mxu2 }
 0x8c7   :  { %v1394_v12 = vpack.c.bf16 %v1391_v8, %v1389_v40  ;;  %v1484_v4 = vadd.f32 %v1391_v8, %v1389_v40  ;;  %4080 = vst [vmem:[#allocation25_spill] sm:$0xff] %v3614_v42  ;;  %v4085_v42 = vld [vmem:[#allocation34_spill] sm:$0xff] }
 0x8c9   :  { %v1485_v60 = vrot.slane %v1484_v4, 4  ;;  %1442 = vmatpush.bf16.msra.mxu2 %v1394_v12  ;;  %1499 = vmatmul.bf16.vlgmr.msra.gmra.mxu0 %v1394_v12 }
 0x8cb   :  { %v1486_v17 = vadd.f32 %v1485_v60, %v1484_v4  ;;  %v1407_v7 = vpop.trf.xlu2 }
 0x8cc   :  { %2405 = vmatmul.msk.bf16.vlgmr.msra.gmra.mxu2 %vm449_vm15, %v1403_v53 }
 0x8cd   :  { %v1487_v29 = vrot.slane %v1486_v17, 2 }
 0x8ce   :  { %v3617_v24 = vpop.f32.mrf.mxu2 }
 0x8cf   :  { %v1488_v27 = vadd.f32 %v1487_v29, %v1486_v17  ;;  %4081 = vst [vmem:[#allocation26_spill] sm:$0xff] %v3617_v24  ;;  %v3640_v29 = vpop.trf.xlu1 }
 0x8d1   :  { %v1489_v50 = vrot.slane %v1488_v27, 1 }
 0x8d3   :  { %v1490_v15 = vadd.f32 %v1489_v50, %v1488_v27 }
 0x8d5   :  { %v1825_v56 = vmul.f32 0.1, %v1490_v15 }
 0x8d6   :  { %v3619_v10 = vpop.f32.mrf.mxu2 }
 0x8d7   :  { %v1826_v37 = vsub.f32 %v1080_v19, %v1825_v56  ;;  %4082 = vst [vmem:[#allocation27_spill] sm:$0xff] %v3619_v10  ;;  %v4086_v10 = vld [vmem:[#allocation35_spill] sm:$0xff] }
 0x8d9   :  { %1827 = vst [vmem:[#allocation5] sm:$0x1] %v1826_v37 }
 0x8db   :  { %v1408_v5 = vpop.trf.xlu2 }
 0x8dc   :  { %2406 = vmatmul.msk.bf16.gmra.mxu2 %vm449_vm15, %v1404_v20 }
 0x8de   :  { %v3622_v58 = vpop.f32.mrf.mxu2 }
 0x8df   :  { %4083 = vst [vmem:[#allocation28_spill] sm:$0xff] %v3622_v58 }
 0x8e6   :  { %v3625_v51 = vpop.f32.mrf.mxu2 }
 0x8e7   :  { %4084 = vst [vmem:[#allocation29_spill] sm:$0xff] %v3625_v51 }
 0x8eb   :  { %v1409_v16 = vpop.trf.xlu2 }
 0x8ec   :  { %2407 = vmatmul.msk.bf16.gmra.mxu2 %vm449_vm15, %v1405_v44 }
 0x8ee   :  { %v3629_v21 = vpop.f32.mrf.mxu2 }
 0x8fb   :  { %v1410_v23 = vpop.trf.xlu2 }
 0x8fc   :  { %2408 = vmatmul.msk.bf16.gmra.mxu2 %vm449_vm15, %v1406_v55 }
 0x90c   :  { %2409 = vmatmul.msk.bf16.gmra.mxu2 %vm449_vm15, %v1407_v7  ;;  %v1522_v7 = vpop.trf.xlu1 }
 0x91c   :  { %2410 = vmatmul.msk.bf16.gmra.mxu2 %vm449_vm15, %v1408_v5 }
 0x92c   :  { %2411 = vmatmul.msk.bf16.gmra.mxu2 %vm449_vm15, %v1409_v16  ;;  %v1063_v16 = vld [vmem:[#allocation3] sm:$0x1] }
 0x93c   :  { %2412 = vmatmul.msk.bf16.gmra.mxu2 %vm449_vm15, %v1410_v23 }
 0x946   :  { %v1500_v35 = vpop.f32.mrf.mxu0 }
 0x947   :  { %v1507_v8 = vsel %vm3560_vm0, %v1500_v35, 0.0 }
 0x94e   :  { %v1502_v40 = vpop.f32.mrf.mxu0 }
 0x94f   :  { %v1508_v12 = vsel %vm3564_vm1, %v1502_v40, 0.0  ;;  %v2414_v4 = vpack.c.bf16 %v1502_v40, %v1500_v35  ;;  %v1444_v60 = vpop.f32.mrf.mxu2 }
 0x950   :  { %v1671_v53 = vadd.f32 %v1508_v12, %v1507_v8  ;;  %v1777_v15 = vmul.f32 0.1, %v1444_v60  ;;  %v1523_v8 = vpop.trf.xlu1 }
 0x951   :  { %2415 = vmatpush.bf16.msk.msra.mxu3 %vm2413_vm2, %v2414_v4 }
 0x952   :  { %v1672_v17 = vrot.slane %v1671_v53, 4  ;;  %v1793_v44 = vsub.f32 %v3351_v39, %v1777_v15 }
 0x954   :  { %v1673_v27 = vadd.f32 %v1672_v17, %v1671_v53  ;;  %2416 = vmatmul.msk.bf16.vlgmr.msra.gmra.mxu3 %vm449_vm15, %v1518_v47  ;;  %v3653_v17 = vpop.f32.mrf.mxu3 }
 0x956   :  { %v1674_v50 = vrot.slane %v1673_v27, 2 }
 0x957   :  { %v1446_v56 = vpop.f32.mrf.mxu2 }
 0x958   :  { %v1675_v19 = vadd.f32 %v1674_v50, %v1673_v27  ;;  %v1778_v37 = vmul.f32 0.1, %v1446_v56  ;;  %v1524_v53 = vpop.trf.xlu1 }
 0x95a   :  { %v1676_v20 = vrot.slane %v1675_v19, 1  ;;  %v1794_v57 = vsub.f32 %v3354_v45, %v1778_v37 }
 0x95c   :  { %v1677_v55 = vadd.f32 %v1676_v20, %v1675_v19  ;;  %v3645_v48 = vpack.c.bf16 %v1794_v57, %v1793_v44 }
 0x95e   :  { %v1774_v5 = vmul.f32 0.1, %v1677_v55 }
 0x95f   :  { %v1449_v23 = vpop.f32.mrf.mxu2 }
 0x960   :  { %v1775_v35 = vsub.f32 %v1063_v16, %v1774_v5  ;;  %v1779_v47 = vmul.f32 0.1, %v1449_v23  ;;  %v1525_v19 = vpop.trf.xlu1 }
 0x962   :  { %1776 = vst [vmem:[#allocation3] sm:$0x1] %v1775_v35  ;;  %v1795_v4 = vsub.f32 %v3338_v36, %v1779_v47  ;;  %v3659_v36 = vpop.f32.mrf.mxu3 }
 0x964   :  { %2417 = vmatmul.msk.bf16.gmra.mxu3 %vm449_vm15, %v1520_v54 }
 0x967   :  { %v1451_v40 = vpop.f32.mrf.mxu2 }
 0x968   :  { %v1780_v12 = vmul.f32 0.1, %v1451_v40  ;;  %v1526_v20 = vpop.trf.xlu1 }
 0x96a   :  { %v1796_v39 = vsub.f32 %v3341_v43, %v1780_v12 }
 0x96c   :  { %v3650_v45 = vpack.c.bf16 %v1796_v39, %v1795_v4 }
 0x96f   :  { %v1454_v60 = vpop.f32.mrf.mxu2 }
 0x970   :  { %v1781_v27 = vmul.f32 0.1, %v1454_v60 }
 0x972   :  { %v1797_v54 = vsub.f32 %v3326_v33, %v1781_v27 }
 0x974   :  { %2418 = vmatmul.msk.bf16.gmra.mxu3 %vm449_vm15, %v1522_v7  ;;  %v3662_v7 = vpop.f32.mrf.mxu3 }
 0x977   :  { %v1456_v50 = vpop.f32.mrf.mxu2 }
 0x978   :  { %v1782_v15 = vmul.f32 0.1, %v1456_v50 }
 0x97a   :  { %v1798_v56 = vsub.f32 %v3329_v52, %v1782_v15  ;;  %v1527_v52 = vpop.trf.xlu1 }
 0x97c   :  { %v3657_v37 = vpack.c.bf16 %v1798_v56, %v1797_v54  ;;  %v3668_v23 = vpop.f32.mrf.mxu3 }
 0x97f   :  { %v1459_v43 = vpop.f32.mrf.mxu2 }
 0x980   :  { %v1783_v44 = vmul.f32 0.1, %v1459_v43 }
 0x982   :  { %v1799_v5 = vsub.f32 %v3315_v26, %v1783_v44  ;;  %v1528_v35 = vpop.trf.xlu1 }
 0x984   :  { %2419 = vmatmul.msk.bf16.gmra.mxu3 %vm449_vm15, %v1524_v53  ;;  %v3671_v47 = vpop.f32.mrf.mxu3 }
 0x987   :  { %v1461_v57 = vpop.f32.mrf.mxu2 }
 0x988   :  { %v1784_v55 = vmul.f32 0.1, %v1461_v57 }
 0x98a   :  { %v1800_v33 = vsub.f32 %v3318_v1, %v1784_v55  ;;  %v1529_v40 = vpop.trf.xlu1 }
 0x98c   :  { %v3666_v16 = vpack.c.bf16 %v1800_v33, %v1799_v5  ;;  %v3674_v12 = vpop.f32.mrf.mxu3 }
 0x992   :  { %v1530_v4 = vpop.trf.xlu1 }
 0x994   :  { %2420 = vmatmul.msk.bf16.gmra.mxu3 %vm449_vm15, %v1526_v20  ;;  %v3676_v39 = vpop.f32.mrf.mxu3 }
 0x99a   :  { %v1531_v26 = vpop.trf.xlu1 }
 0x99c   :  { %v3679_v1 = vpop.f32.mrf.mxu3 }
 0x9a2   :  { %v1532_v60 = vpop.trf.xlu1 }
 0x9a4   :  { %2421 = vmatmul.msk.bf16.gmra.mxu3 %vm449_vm15, %v1528_v35  ;;  %v3682_v53 = vpop.f32.mrf.mxu3 }
 0x9ac   :  { %v3684_v27 = vpop.f32.mrf.mxu3 }
 0x9b4   :  { %2422 = vmatmul.msk.bf16.gmra.mxu3 %vm449_vm15, %v1530_v4 }
 0x9c4   :  { %2423 = vmatmul.msk.bf16.gmra.mxu3 %vm449_vm15, %v1532_v60 }
 0x9d4   :  { %2424 = vmatmul.msk.bf16.gmra.mxu3 %vm449_vm15, %v3627_v9 }
 0x9d7   :  { %v1591_v50 = vpop.f32.mrf.mxu3 }
 0x9d8   :  { %v1678_v15 = vmul.f32 0.1, %v1591_v50 }
 0x9da   :  { %v1710_v43 = vsub.f32 %v3230_v34, %v1678_v15 }
 0x9df   :  { %v1593_v54 = vpop.f32.mrf.mxu3 }
 0x9e0   :  { %v1679_v56 = vmul.f32 0.1, %v1593_v54 }
 0x9e2   :  { %v1711_v20 = vsub.f32 %v3227_v2, %v1679_v56 }
 0x9e4   :  { %2425 = vmatmul.msk.bf16.gmra.mxu3 %vm449_vm15, %v3640_v29  ;;  %v3692_v44 = vpack.c.bf16 %v1711_v20, %v1710_v43 }
 0x9e7   :  { %v1596_v57 = vpop.f32.mrf.mxu3 }
 0x9e8   :  { %v1680_v55 = vmul.f32 0.1, %v1596_v57 }
 0x9ea   :  { %v1712_v35 = vsub.f32 %v3222_v38, %v1680_v55 }
 0x9ef   :  { %v1598_v5 = vpop.f32.mrf.mxu3 }
 0x9f0   :  { %v1681_v33 = vmul.f32 0.1, %v1598_v5 }
 0x9f2   :  { %v1713_v9 = vsub.f32 %v3218_v31, %v1681_v33 }
 0x9f4   :  { %2426 = vmatmul.msk.bf16.gmra.mxu3 %vm449_vm15, %v1523_v8  ;;  %v3697_v4 = vpack.c.bf16 %v1713_v9, %v1712_v35 }
 0x9f7   :  { %v1601_v34 = vpop.f32.mrf.mxu3 }
 0x9f8   :  { %v1682_v60 = vmul.f32 0.1, %v1601_v34 }
 0x9fa   :  { %v1714_v29 = vsub.f32 %v3210_v22, %v1682_v60  ;;  %v3707_v22 = vpop.f32.mrf.mxu2 }
 0x9ff   :  { %v1603_v2 = vpop.f32.mrf.mxu3 }
 0xa00   :  { %v1683_v50 = vmul.f32 0.1, %v1603_v2 }
 0xa02   :  { %v1715_v15 = vsub.f32 %v3206_v14, %v1683_v50 }
 0xa04   :  { %2427 = vmatmul.msk.bf16.gmra.mxu3 %vm449_vm15, %v1525_v19  ;;  %v3702_v54 = vpack.c.bf16 %v1715_v15, %v1714_v29  ;;  %v3710_v19 = vpop.f32.mrf.mxu2 }
 0xa07   :  { %v1606_v56 = vpop.f32.mrf.mxu3 }
 0xa08   :  { %v1684_v38 = vmul.f32 0.1, %v1606_v56 }
 0xa0a   :  { %v1716_v8 = vsub.f32 %v3199_v63, %v1684_v38 }
 0xa0c   :  { %v3712_v35 = vpop.f32.mrf.mxu2 }
 0xa0f   :  { %v1608_v43 = vpop.f32.mrf.mxu3 }
 0xa10   :  { %v1685_v31 = vmul.f32 0.1, %v1608_v43 }
 0xa12   :  { %v1717_v20 = vsub.f32 %v3195_v25, %v1685_v31 }
 0xa14   :  { %2428 = vmatmul.msk.bf16.gmra.mxu3 %vm449_vm15, %v1527_v52  ;;  %v1951_v57 = vpack.c.bf16 %v1717_v20, %v1716_v8  ;;  %v3715_v9 = vpop.f32.mrf.mxu2  ;;  %v1533_v52 = vpop.trf.xlu1 }
 0xa17   :  { %v1611_v55 = vpop.f32.mrf.mxu3 }
 0xa18   :  { %v1686_v58 = vmul.f32 0.1, %v1611_v55 }
 0xa1c   :  { %v1474_v60 = vpop.f32.mrf.mxu2 }
 0xa1f   :  { %v1613_v5 = vpop.f32.mrf.mxu3 }
 0xa24   :  { %2429 = vmatmul.msk.bf16.gmra.mxu3 %vm449_vm15, %v1529_v40  ;;  %v1476_v15 = vpop.f32.mrf.mxu2 }
 0xa27   :  { %v1616_v14 = vpop.f32.mrf.mxu3 }
 0xa28   :  { %v1688_v20 = vmul.f32 0.1, %v1616_v14 }
 0xa2f   :  { %v1618_v33 = vpop.f32.mrf.mxu3 }
 0xa34   :  { %2430 = vmatmul.msk.bf16.gmra.mxu3 %vm449_vm15, %v1531_v26  ;;  %v1689_v26 = vmul.f32 0.1, %v1618_v33 }
 0xa37   :  { %v1621_v63 = vpop.f32.mrf.mxu3 }
 0xa38   :  { %v1690_v56 = vmul.f32 0.1, %v1621_v63  ;;  %v4087_v63 = vld [vmem:[#allocation36_spill] sm:$0xff] }
 0xa39   :  { %v1720_v51 = vsub.f32 %v4087_v63, %v1688_v20 }
 0xa3a   :  { %v1722_v24 = vsub.f32 %v4085_v42, %v1690_v56 }
 0xa3f   :  { %v1623_v25 = vpop.f32.mrf.mxu3 }
 0xa40   :  { %v1691_v40 = vmul.f32 0.1, %v1623_v25  ;;  %v1721_v25 = vsub.f32 %v4086_v10, %v1689_v26 }
 0xa42   :  { %v1723_v31 = vsub.f32 %v3163_v62, %v1691_v40  ;;  %v1953_v62 = vpack.c.bf16 %v1721_v25, %v1720_v51 }
 0xa44   :  { %2431 = vmatmul.msk.bf16.gmra.mxu3 %vm449_vm15, %v1533_v52 }
 0xa47   :  { %v1626_v34 = vpop.f32.mrf.mxu3 }
 0xa48   :  { %v1692_v2 = vmul.f32 0.1, %v1626_v34  ;;  %v1687_v34 = vmul.f32 0.1, %v1613_v5 }
 0xa4a   :  { %v1724_v38 = vsub.f32 %v3154_v46, %v1692_v2  ;;  %v1479_v46 = vpop.f32.mrf.mxu2  ;;  %v4089_v2 = vld [vmem:[#allocation38_spill] sm:$0xff] }
 0xa4b   :  { %v1718_v14 = vsub.f32 %v4089_v2, %v1686_v58  ;;  %v3735_v58 = vld [vmem:[%s3936_s1] sm:$0xff]  ;;  %v1786_v2 = vmul.f32 0.1, %v3710_v19  ;;  %s2328_s1 = sshll.u32 %s3948_s13, 4  ;;  %s2329_s1 = int_to_ptr.hbm [resolvable:$true] %s2328_s1 }
 0xa4c   :  { %v2190_v26 = vunpack.c.l.b16 %v3735_v58 }
 0xa4f   :  { %v1628_v50 = vpop.f32.mrf.mxu3 }
 0xa50   :  { %v1693_v29 = vmul.f32 0.1, %v1628_v50  ;;  %v1954_v50 = vpack.c.bf16 %v1723_v31, %v1722_v24 }
 0xa52   :  { %v1725_v43 = vsub.f32 %v3157_v41, %v1693_v29  ;;  %v4088_v41 = vld [vmem:[#allocation37_spill] sm:$0xff]  ;;  %v1481_v56 = vpop.f32.mrf.mxu2 }
 0xa53   :  { %v1719_v33 = vsub.f32 %v4088_v41, %v1687_v34  ;;  %v4090_v34 = vld [vmem:[#allocation40_spill] sm:$0xff]  ;;  %v4091_v41 = vld [vmem:[#allocation15_spill] sm:$0xff] }
 0xa54   :  { %v1955_v8 = vpack.c.bf16 %v1725_v43, %v1724_v38  ;;  %v1792_v38 = vmul.f32 0.1, %v1481_v56  ;;  %v4096_v56 = vld [vmem:[#allocation43_spill] sm:$0xff] }
 0xa55   :  { %v1952_v5 = vpack.c.bf16 %v1719_v33, %v1718_v14  ;;  %v4093_v14 = vld [vmem:[#allocation42_spill] sm:$0xff] }
 0xa56   :  { %1977 = vmatpush.bf16.msrb.mxu2 %v1955_v8  ;;  %2196 = vmatpush.bf16.msra.mxu1 %v1955_v8  ;;  %v1808_v43 = vsub.f32 %v3265_v61, %v1792_v38  ;;  %v1789_v8 = vmul.f32 0.1, %v1474_v60  ;;  %v1788_v61 = vmul.f32 0.1, %v3715_v9  ;;  %v1787_v60 = vmul.f32 0.1, %v3712_v35 }
 0xa57   :  { %v1631_v52 = vpop.f32.mrf.mxu3 }
 0xa58   :  { %v1694_v40 = vmul.f32 0.1, %v1631_v52 }
 0xa5a   :  { %1978 = vmatpush.bf16.msrb.mxu2 %v1954_v50  ;;  %2197 = vmatpush.bf16.msra.mxu1 %v1954_v50  ;;  %v1726_v10 = vsub.f32 %v3471_v28, %v1694_v40  ;;  %v1791_v28 = vmul.f32 0.1, %v1479_v46  ;;  %v1804_v40 = vsub.f32 %v4093_v14, %v1788_v61  ;;  %v4099_v61 = vld [vmem:[#allocation54_spill] sm:$0xff]  ;;  %v4101_v14 = vld [vmem:[#allocation45_spill] sm:$0xff] }
 0xa5e   :  { %1979 = vmatpush.bf16.msrb.mxu2 %v1953_v62  ;;  %2198 = vmatpush.bf16.msra.mxu1 %v1953_v62 }
 0xa5f   :  { %v1633_v42 = vpop.f32.mrf.mxu3 }
 0xa60   :  { %v1695_v29 = vmul.f32 0.1, %v1633_v42  ;;  %v1785_v42 = vmul.f32 0.1, %v3707_v22 }
 0xa62   :  { %v1727_v24 = vsub.f32 %v3466_v18, %v1695_v29  ;;  %1980 = vmatpush.bf16.msrb.mxu2 %v1952_v5  ;;  %2199 = vmatpush.bf16.msra.mxu1 %v1952_v5  ;;  %v1790_v18 = vmul.f32 0.1, %v1476_v15  ;;  %v1807_v15 = vsub.f32 %v3262_v13, %v1791_v28  ;;  %v4092_v13 = vld [vmem:[#allocation39_spill] sm:$0xff]  ;;  %v4094_v29 = vld [vmem:[#allocation41_spill] sm:$0xff] }
 0xa63   :  { %v1805_v62 = vsub.f32 %v4092_v13, %v1789_v8  ;;  %v1803_v5 = vsub.f32 %v4094_v29, %v1787_v60  ;;  %v4103_v29 = vld [vmem:[#allocation47_spill] sm:$0xff] }
 0xa64   :  { %v3728_v55 = vpack.c.bf16 %v1727_v24, %v1726_v10  ;;  %v1806_v25 = vsub.f32 %v4090_v34, %v1790_v18  ;;  %v2015_v50 = vpack.c.bf16 %v1808_v43, %v1807_v15  ;;  %v4097_v43 = vld [vmem:[#allocation56_spill] sm:$0xff]  ;;  %v4100_v34 = vld [vmem:[#allocation53_spill] sm:$0xff] }
 0xa65   :  { %v2013_v24 = vpack.c.bf16 %v1804_v40, %v1803_v5  ;;  %v4102_v40 = vld [vmem:[#allocation46_spill] sm:$0xff] }
 0xa66   :  { %1981 = vmatpush.bf16.msrb.mxu2 %v1951_v57  ;;  %2200 = vmatpush.bf16.msra.mxu1 %v1951_v57  ;;  %v2445_v57 = vld [vmem:[%s3935_s0 + $0x4] sm:$0xf0] }
 0xa67   :  { %v1636_v51 = vpop.f32.mrf.mxu3 }
 0xa68   :  { %v1696_v31 = vmul.f32 0.1, %v1636_v51  ;;  %v1801_v51 = vsub.f32 %v4096_v56, %v1785_v42 }
 0xa6a   :  { %1982 = vmatpush.bf16.msrb.mxu2 %v3702_v54  ;;  %2201 = vmatpush.bf16.msra.mxu1 %v3702_v54  ;;  %v2434_v54 = vld [vmem:[%s3935_s0] sm:$0xf]  ;;  %v1728_v46 = vsub.f32 %v3463_v11, %v1696_v31  ;;  %v2014_v11 = vpack.c.bf16 %v1806_v25, %v1805_v62  ;;  %v4098_v31 = vld [vmem:[#allocation55_spill] sm:$0xff] }
 0xa6b   :  { %v2435_v63 = vor.u32 %v2445_v57, %v2434_v54 }
 0xa6e   :  { %1983 = vmatpush.bf16.msrb.mxu2 %v3697_v4  ;;  %2202 = vmatpush.bf16.msra.mxu1 %v3697_v4  ;;  %v2192_v4 = vpack.c.b16 %v2190_v26, %v2190_v26 }
 0xa6f   :  { %v1638_v20 = vpop.f32.mrf.mxu3 }
 0xa70   :  { %v1697_v52 = vmul.f32 0.1, %v1638_v20 }
 0xa72   :  { %v1729_v33 = vsub.f32 %v4091_v41, %v1697_v52  ;;  %1984 = vmatpush.bf16.msrb.mxu2 %v3692_v44  ;;  %2203 = vmatpush.bf16.msra.mxu1 %v3692_v44  ;;  %v4095_v44 = vld [vmem:[#allocation44_spill] sm:$0xff] }
 0xa73   :  { %v1802_v35 = vsub.f32 %v4095_v44, %v1786_v2 }
 0xa74   :  { %v3756_v9 = vpack.c.bf16 %v1729_v33, %v1728_v46 }
 0xa75   :  { %1985 = vmatmul.bf16.vlgmr.msrb.gmra.mxu2 %v2435_v63  ;;  %2204 = vmatmul.bf16.vlgmr.msra.gmra.mxu1 %v2192_v4  ;;  %v2012_v38 = vpack.c.bf16 %v1802_v35, %v1801_v51  ;;  %v4104_v35 = vld [vmem:[#allocation48_spill] sm:$0xff]  ;;  %v4105_v51 = vld [vmem:[#allocation49_spill] sm:$0xff] }
 0xa76   :  { %2019 = vmatpush.bf16.msra.mxu2 %v2015_v50 }
 0xa77   :  { %v1641_v10 = vpop.f32.mrf.mxu3 }
 0xa78   :  { %v1698_v28 = vmul.f32 0.1, %v1641_v10 }
 0xa7a   :  { %2020 = vmatpush.bf16.msra.mxu2 %v2014_v11  ;;  %v1730_v26 = vsub.f32 %v4097_v43, %v1698_v28 }
 0xa7e   :  { %2021 = vmatpush.bf16.msra.mxu2 %v2013_v24 }
 0xa7f   :  { %v1643_v19 = vpop.f32.mrf.mxu3 }
 0xa80   :  { %v1699_v18 = vmul.f32 0.1, %v1643_v19 }
 0xa82   :  { %2022 = vmatpush.bf16.msra.mxu2 %v2012_v38  ;;  %v1731_v54 = vsub.f32 %v4098_v31, %v1699_v18  ;;  %v4106_v18 = vld [vmem:[#allocation50_spill] sm:$0xff] }
 0xa84   :  { %v1958_v22 = vpack.c.bf16 %v1731_v54, %v1730_v26  ;;  %v4107_v26 = vld [vmem:[#allocation51_spill] sm:$0xff] }
 0xa86   :  { %2023 = vmatpush.bf16.msra.mxu2 %v3666_v16 }
 0xa87   :  { %v1646_v57 = vpop.f32.mrf.mxu3 }
 0xa88   :  { %v1700_v8 = vmul.f32 0.1, %v1646_v57  ;;  %v4108_v57 = vld [vmem:[#allocation52_spill] sm:$0xff] }
 0xa8a   :  { %2024 = vmatpush.bf16.msra.mxu2 %v3657_v37  ;;  %v1732_v52 = vsub.f32 %v4099_v61, %v1700_v8  ;;  %v1842_v61 = vmul.f32 0.1, %v3682_v53 }
 0xa8c   :  { %v1858_v53 = vsub.f32 %v3485_v6, %v1842_v61  ;;  %v2465_v61 = vld [vmem:[#allocation3] ss:$0 sm:$0xff] }
 0xa8e   :  { %2025 = vmatpush.bf16.msra.mxu2 %v3650_v45 }
 0xa8f   :  { %v1648_v15 = vpop.f32.mrf.mxu3 }
 0xa90   :  { %v1701_v20 = vmul.f32 0.1, %v1648_v15 }
 0xa92   :  { %2026 = vmatpush.bf16.msra.mxu2 %v3645_v48  ;;  %v1733_v25 = vsub.f32 %v4100_v34, %v1701_v20  ;;  %v1843_v20 = vmul.f32 0.1, %v3684_v27  ;;  %v2436_v27 = vld [vmem:[%s3935_s0 + $0x8] sm:$0xf0] }
 0xa94   :  { %v1959_v50 = vpack.c.bf16 %v1733_v25, %v1732_v52  ;;  %v1841_v52 = vmul.f32 0.1, %v3679_v1  ;;  %v1859_v34 = vsub.f32 %v3488_v30, %v1843_v20  ;;  %v2444_v25 = vld [vmem:[%s3935_s0 + $0x4] sm:$0xf]  ;;  %v1839_v1 = vmul.f32 0.1, %v3674_v12 }
 0xa96   :  { %v1857_v30 = vsub.f32 %v3494_v49, %v1841_v52  ;;  %v1855_v6 = vsub.f32 %v3504_v3, %v1839_v1  ;;  %v1836_v49 = vmul.f32 0.1, %v3662_v7  ;;  %v4111_v7 = vld [vmem:[#allocation16_spill] sm:$0xff] }
 0xa97   :  { %v1651_v63 = vpop.f32.mrf.mxu3 }
 0xa98   :  { %v1702_v19 = vmul.f32 0.1, %v1651_v63  ;;  %v2439_v63 = vor.u32 %v2444_v25, %v2436_v27 }
 0xa9a   :  { %v1734_v8 = vsub.f32 %v4108_v57, %v1702_v19  ;;  %v2238_v57 = vld [vmem:[%s3944_s9 + $0x70] sm:$0xff] }
 0xa9f   :  { %v1653_v4 = vpop.f32.mrf.mxu3 }
 0xaa0   :  { %v1703_v56 = vmul.f32 0.1, %v1653_v4  ;;  %v1838_v4 = vmul.f32 0.1, %v3671_v47 }
 0xaa2   :  { %v1735_v31 = vsub.f32 %v4107_v26, %v1703_v56 }
 0xaa4   :  { %v1960_v15 = vpack.c.bf16 %v1735_v31, %v1734_v8  ;;  %v2239_v8 = vld [vmem:[%s3944_s9 + $0x78] sm:$0xff] }
 0xaa5   :  { %v2247_v20 = vpack.c.bf16 %v2239_v8, %v2238_v57 }
 0xaa7   :  { %v1656_v46 = vpop.f32.mrf.mxu3 }
 0xaa8   :  { %v1704_v44 = vmul.f32 0.1, %v1656_v46 }
 0xaaa   :  { %v1736_v43 = vsub.f32 %v4106_v18, %v1704_v44  ;;  %v4118_v44 = vld [vmem:[#allocation22_spill] sm:$0xff] }
 0xaaf   :  { %v1658_v16 = vpop.f32.mrf.mxu3 }
 0xab0   :  { %v1705_v42 = vmul.f32 0.1, %v1658_v16  ;;  %v1854_v16 = vsub.f32 %v3501_v32, %v1838_v4  ;;  %v4112_v32 = vld [vmem:[#allocation29_spill] sm:$0xff] }
 0xab2   :  { %v1737_v38 = vsub.f32 %v4105_v51, %v1705_v42  ;;  %v4116_v42 = vld [vmem:[#allocation19_spill] sm:$0xff]  ;;  %v4120_v51 = vld [vmem:[#allocation21_spill] sm:$0xff] }
 0xab4   :  { %v1961_v54 = vpack.c.bf16 %v1737_v38, %v1736_v43  ;;  %v4122_v43 = vld [vmem:[#allocation23_spill] sm:$0xff] }
 0xab7   :  { %v1661_v41 = vpop.f32.mrf.mxu3 }
 0xab8   :  { %v1706_v2 = vmul.f32 0.1, %v1661_v41  ;;  %v1835_v41 = vmul.f32 0.1, %v3659_v36  ;;  %v4113_v36 = vld [vmem:[#allocation28_spill] sm:$0xff] }
 0xaba   :  { %v1738_v24 = vsub.f32 %v4104_v35, %v1706_v2  ;;  %v1832_v2 = vmul.f32 0.1, %v4112_v32 }
 0xabf   :  { %v1663_v33 = vpop.f32.mrf.mxu3 }
 0xac0   :  { %v1707_v45 = vmul.f32 0.1, %v1663_v33  ;;  %v2039_v33 = vpack.c.bf16 %v1855_v6, %v1854_v16  ;;  %v2232_v16 = vld [vmem:[%s3944_s9 + $0x40] sm:$0xff] }
 0xac2   :  { %v1739_v5 = vsub.f32 %v4103_v29, %v1707_v45  ;;  %v1848_v29 = vsub.f32 %v4116_v42, %v1832_v2  ;;  %v2466_v2 = vld [vmem:[#allocation5] ss:$0 sm:$0xff] }
 0xac4   :  { %v1962_v28 = vpack.c.bf16 %v1739_v5, %v1738_v24  ;;  %v4117_v5 = vld [vmem:[#allocation26_spill] sm:$0xff]  ;;  %v4119_v24 = vld [vmem:[#allocation25_spill] sm:$0xff] }
 0xac5   :  { %v1828_v56 = vmul.f32 0.1, %v4119_v24  ;;  %v2467_v24 = vld [vmem:[#allocation7] ss:$0 sm:$0xff] }
 0xac7   :  { %v1666_v60 = vpop.f32.mrf.mxu3  ;;  %v1844_v26 = vsub.f32 %v4122_v43, %v1828_v56 }
 0xac8   :  { %v1708_v37 = vmul.f32 0.1, %v1666_v60  ;;  %v4109_v60 = vld [vmem:[#allocation17_spill] sm:$0xff] }
 0xaca   :  { %v1740_v48 = vsub.f32 %v4101_v14, %v1708_v37  ;;  %v1852_v37 = vsub.f32 %v4109_v60, %v1836_v49  ;;  %v1831_v14 = vmul.f32 0.1, %v4113_v36  ;;  %v2228_v60 = vld [vmem:[%s3944_s9 + $0x20] sm:$0xff] }
 0xacf   :  { %v1668_v13 = vpop.f32.mrf.mxu3 }
 0xad0   :  { %v1709_v62 = vmul.f32 0.1, %v1668_v13  ;;  %v1833_v13 = vmul.f32 0.1, %v3629_v21  ;;  %v1847_v21 = vsub.f32 %v4118_v44, %v1831_v14 }
 0xad2   :  { %v1741_v11 = vsub.f32 %v4102_v40, %v1709_v62 }
 0xad4   :  { %v1963_v10 = vpack.c.bf16 %v1741_v11, %v1740_v48  ;;  %v4115_v11 = vld [vmem:[#allocation27_spill] sm:$0xff] }
 0xad6   :  { %1991 = vmatpush.bf16.msrb.mxu0 %v1963_v10  ;;  %2209 = vmatpush.bf16.msrb.mxu2 %v1963_v10  ;;  %v1829_v10 = vmul.f32 0.1, %v4117_v5 }
 0xada   :  { %1992 = vmatpush.bf16.msrb.mxu0 %v1962_v28  ;;  %2210 = vmatpush.bf16.msrb.mxu2 %v1962_v28  ;;  %v4121_v28 = vld [vmem:[#allocation24_spill] sm:$0xff] }
 0xadb   :  { %v1845_v19 = vsub.f32 %v4121_v28, %v1829_v10 }
 0xadd   :  { %v2034_v31 = vpack.c.bf16 %v1845_v19, %v1844_v26  ;;  %v2266_v19 = vlaneseq }
 0xade   :  { %1993 = vmatpush.bf16.msrb.mxu0 %v1961_v54  ;;  %2211 = vmatpush.bf16.msrb.mxu2 %v1961_v54 }
 0xadf   :  { %v3892_v26 = vand.u32 127, %v2266_v19 }
 0xae1   :  { %vm2268_vm15 = vcmp.lt.s32.totalorder %v3892_v26, 10 }
 0xae2   :  { %1994 = vmatpush.bf16.msrb.mxu0 %v1960_v15  ;;  %2212 = vmatpush.bf16.msrb.mxu2 %v1960_v15 }
 0xae6   :  { %1995 = vmatpush.bf16.msrb.mxu0 %v1959_v50  ;;  %2213 = vmatpush.bf16.msrb.mxu2 %v1959_v50  ;;  %v2041_v50 = vpack.c.bf16 %v1859_v34, %v1858_v53 }
 0xaea   :  { %1996 = vmatpush.bf16.msrb.mxu0 %v1958_v22  ;;  %2214 = vmatpush.bf16.msrb.mxu2 %v1958_v22  ;;  %v1840_v22 = vmul.f32 0.1, %v3676_v39  ;;  %v1837_v39 = vmul.f32 0.1, %v3668_v23  ;;  %v4110_v23 = vld [vmem:[#allocation18_spill] sm:$0xff] }
 0xaeb   :  { %v1851_v3 = vsub.f32 %v4110_v23, %v1835_v41  ;;  %v2233_v41 = vld [vmem:[%s3944_s9 + $0x48] sm:$0xff] }
 0xaec   :  { %v1856_v46 = vsub.f32 %v3491_v59, %v1840_v22  ;;  %v1834_v59 = vmul.f32 0.1, %v3653_v17  ;;  %v1830_v17 = vmul.f32 0.1, %v4115_v11 }
 0xaee   :  { %1997 = vmatpush.bf16.msrb.mxu0 %v3756_v9  ;;  %2215 = vmatpush.bf16.msrb.mxu2 %v3756_v9  ;;  %v2040_v12 = vpack.c.bf16 %v1857_v30, %v1856_v46  ;;  %v1850_v62 = vsub.f32 %v4111_v7, %v1834_v59  ;;  %v1846_v38 = vsub.f32 %v4120_v51, %v1830_v17  ;;  %v2236_v46 = vld [vmem:[%s3944_s9 + $0x60] sm:$0xff] }
 0xaef   :  { %v2224_v7 = vld [vmem:[%s3944_s9] sm:$0xff] }
 0xaf0   :  { %v2037_v40 = vpack.c.bf16 %v1851_v3, %v1850_v62  ;;  %v2035_v18 = vpack.c.bf16 %v1847_v21, %v1846_v38  ;;  %v2226_v3 = vld [vmem:[%s3944_s9 + $0x10] sm:$0xff]  ;;  %v2225_v62 = vld [vmem:[%s3944_s9 + $0x8] sm:$0xff]  ;;  %v2464_v17 = vld [vmem:[#allocation3] ss:$0 sm:$0xff] }
 0xaf1   :  { %v2240_v32 = vpack.c.bf16 %v2225_v62, %v2224_v7 }
 0xaf2   :  { %1998 = vmatpush.bf16.msrb.mxu0 %v3728_v55  ;;  %v3797_v9 = vpop.f32.mrf.mxu1  ;;  %2216 = vmatpush.bf16.msrb.mxu2 %v3728_v55  ;;  %v1853_v55 = vsub.f32 %v3514_v0, %v1837_v39  ;;  %v4114_v0 = vld [vmem:[#allocation20_spill] sm:$0xff]  ;;  %v2237_v39 = vld [vmem:[%s3944_s9 + $0x68] sm:$0xff] }
 0xaf3   :  { %v1849_v48 = vsub.f32 %v4114_v0, %v1833_v13  ;;  %v2246_v6 = vpack.c.bf16 %v2237_v39, %v2236_v46  ;;  %v2227_v13 = vld [vmem:[%s3944_s9 + $0x18] sm:$0xff] }
 0xaf4   :  { %v2038_v45 = vpack.c.bf16 %v1853_v55, %v1852_v37  ;;  %v2244_v55 = vpack.c.bf16 %v2233_v41, %v2232_v16  ;;  %v2229_v37 = vld [vmem:[%s3944_s9 + $0x28] sm:$0xff] }
 0xaf5   :  { %1999 = vmatmul.bf16.vlgmr.msrb.gmra.mxu0 %v2439_v63  ;;  %v2036_v35 = vpack.c.bf16 %v1849_v48, %v1848_v29  ;;  %v2191_v63 = vunpack.c.h.b16 %v3735_v58  ;;  %v2235_v58 = vld [vmem:[%s3944_s9 + $0x58] sm:$0xff]  ;;  %v2242_v23 = vpack.c.bf16 %v2229_v37, %v2228_v60  ;;  %v2206_v29 = vadd.f32 %v2464_v17, %v3797_v9 }
 0xaf6   :  { %2045 = vmatpush.bf16.msra.mxu0 %v2041_v50 }
 0xaf7   :  { %v2193_v4 = vpack.c.b16 %v2191_v63, %v2191_v63 }
 0xaf8   :  { %v1986_v54 = vpop.f32.mrf.mxu2 }
 0xaf9   :  { %v1987_v34 = vadd.f32 %v2465_v61, %v1986_v54 }
 0xafa   :  { %2046 = vmatpush.bf16.msra.mxu0 %v2040_v12  ;;  %v2207_v47 = vpop.f32.mrf.mxu1  ;;  %v2234_v12 = vld [vmem:[%s3944_s9 + $0x50] sm:$0xff] }
 0xafb   :  { %v2245_v49 = vpack.c.bf16 %v2235_v58, %v2234_v12  ;;  %v2231_v47 = vld [vmem:[%s3944_s9 + $0x38] sm:$0xff] }
 0xafe   :  { %2047 = vmatpush.bf16.msra.mxu0 %v2039_v33  ;;  %v2230_v33 = vld [vmem:[%s3944_s9 + $0x30] sm:$0xff] }
 0xaff   :  { %v2243_v59 = vpack.c.bf16 %v2231_v47, %v2230_v33 }
 0xb00   :  { %v1988_v52 = vpop.f32.mrf.mxu2 }
 0xb01   :  { %v1989_v25 = vadd.f32 %v2465_v61, %v1988_v52 }
 0xb02   :  { %2048 = vmatpush.bf16.msra.mxu0 %v2038_v45  ;;  %v2241_v45 = vpack.c.bf16 %v2227_v13, %v2226_v3 }
 0xb06   :  { %2049 = vmatpush.bf16.msra.mxu0 %v2037_v40 }
 0xb0a   :  { %2050 = vmatpush.bf16.msra.mxu0 %v2036_v35  ;;  %v2586_v35 = vmov 0  }
 0xb0b   :  { %2456 = vset.pattern.permute.xlu2 %v2586_v35  ;;  %2457 = vset.pattern.permute.xlu0 %v2586_v35 }
 0xb0e   :  { %2051 = vmatpush.bf16.msra.mxu0 %v2035_v18 }
 0xb12   :  { %2052 = vmatpush.bf16.msra.mxu0 %v2034_v31  ;;  %v2468_v31 = vld [vmem:[%s3945_s10] ss:$0 sm:$0xff] }
 0xb16   :  { %2252 = vmatpush.bf16.msrb.mxu0 %v2247_v20 }
 0xb1a   :  { %2253 = vmatpush.bf16.msrb.mxu0 %v2246_v6 }
 0xb1e   :  { %2254 = vmatpush.bf16.msrb.mxu0 %v2245_v49 }
 0xb22   :  { %2255 = vmatpush.bf16.msrb.mxu0 %v2244_v55 }
 0xb26   :  { %2256 = vmatpush.bf16.msrb.mxu0 %v2243_v59 }
 0xb2a   :  { %2257 = vmatpush.bf16.msrb.mxu0 %v2242_v23 }
 0xb2e   :  { %2258 = vmatpush.bf16.msrb.mxu0 %v2241_v45 }
 0xb32   :  { %2259 = vmatpush.bf16.msrb.mxu0 %v2240_v32 }
 0xb72   :  { %v2000_v15 = vpop.f32.mrf.mxu0 }
 0xb73   :  { %v2001_v27 = vadd.f32 %v2000_v15, %v1987_v34  ;;  %v2281_v15 = vld [vmem:[%s3937_s2] sm:$0xff]  ;;  %s2587_s2 = smov [#allocation8]  }
 0xb74   :  { %v2448_v61 = vceil.f32 %v2281_v15  ;;  %v2449_v52 = vfloor.f32 %v2281_v15  ;;  %vm2447_vm0 = vcmp.lt.s32.totalorder %v2281_v15, 0  ;;  %s2304_s10 = sshll.u32 %s2587_s2, 4  ;;  %s2305_s10 = int_to_ptr.vmem [resolvable:$true] %s2304_s10 }
 0xb75   :  { %v2005_v1 = vmax.f32 %v2001_v27, 0.0 }
 0xb76   :  { %v2450_v34 = vsel %vm2447_vm0, %v2448_v61, %v2449_v52 }
 0xb7a   :  { %v2002_v22 = vpop.f32.mrf.mxu0 }
 0xb7b   :  { %v2003_v53 = vadd.f32 %v2002_v22, %v1989_v25  ;;  %v2451_v25 = vcvt.f32.s32 %v2450_v34 }
 0xb7d   :  { %v2006_v30 = vmax.f32 %v2003_v53, 0.0 }
 0xb7f   :  { %v2007_v50 = vpack.c.bf16 %v2006_v30, %v2005_v1 }
 0xb81   :  { %2027 = vmatmul.bf16.vlgmr.msra.gmra.mxu2 %v2007_v50 }
 0xb91   :  { %2217 = vmatmul.bf16.vlgmr.msrb.gmra.mxu2 %v2193_v4 }
 0xc04   :  { %v2028_v36 = vpop.f32.mrf.mxu2 }
 0xc05   :  { %v3873_v14 = vadd.f32 %v2466_v2, %v2028_v36 }
 0xc07   :  { %v2087_v0 = vmul.f32 %v3873_v14, %v3873_v14 }
 0xc09   :  { %2089 = vadd.xlane.f32.xlu1 %v2087_v0 }
 0xc0c   :  { %v2030_v48 = vpop.f32.mrf.mxu2 }
 0xc0d   :  { %v3877_v40 = vadd.f32 %v2466_v2, %v2030_v48 }
 0xc0f   :  { %v2033_v11 = vpack.c.bf16 %v3877_v40, %v3873_v14  ;;  %v2088_v43 = vmul.f32 %v3877_v40, %v3877_v40 }
 0xc11   :  { %2053 = vmatmul.bf16.vlgmr.msra.gmra.mxu0 %v2033_v11 }
 0xc14   :  { %v2218_v42 = vpop.f32.mrf.mxu2 }
 0xc15   :  { %v2219_v5 = vadd.f32 %v2218_v42, %v2206_v29 }
 0xc17   :  { %v2222_v10 = vmax.f32 %v2219_v5, 0.0 }
 0xc19   :  { %v2223_v21 = vpack.c.bf16 %v2222_v10, %v2222_v10 }
 0xc1c   :  { %v2220_v44 = vpop.f32.mrf.mxu2 }
 0xc21   :  { %2260 = vmatmul.bf16.vlgmr.msrb.gmra.mxu0 %v2223_v21 }
 0xc7c   :  { %v2090_v27 = vpop.xlane.xlu1 %2089 }
 0xc7d   :  { %v2093_v22 = vmax.f32 %v2090_v27, 1e-24 }
 0xc7f   :  { %2485 = vrsqrt.f32 %v2093_v22  ;;  %vm2101_vm3 = vweird.f32 %v2093_v22 }
 0xc85   :  { %v2486_v30 = vpop.eup %2485 }
 0xc86   :  { %v2096_v46 = vmul.f32 %v2486_v30, %v2093_v22  ;;  %vm2102_vm1 = vweird.f32 %v2486_v30 }
 0xc87   :  { %vm3911_vm5 = vmor %vm2101_vm3, %vm2102_vm1 }
 0xc88   :  { %v2097_v49 = vmul.f32 %v2486_v30, %v2096_v46 }
 0xc8a   :  { %v2098_v47 = vmul.f32 0.5, %v2097_v49 }
 0xc8c   :  { %v2099_v45 = vsub.f32 1.5, %v2098_v47 }
 0xc8e   :  { %v2054_v56 = vpop.f32.mrf.mxu0  ;;  %v2100_v11 = vmul.f32 %v2486_v30, %v2099_v45 }
 0xc8f   :  { %v3882_v51 = vadd.f32 %v2467_v24, %v2054_v56 }
 0xc90   :  { %v2104_v35 = vsel %vm3911_vm5, %v2486_v30, %v2100_v11 }
 0xc91   :  { %v2059_v38 = vmul.f32 %v3882_v51, %v3882_v51  ;;  %v2117_v19 = vmul.f32 %v2104_v35, %v3873_v14 }
 0xc93   :  { %2061 = vadd.xlane.f32.xlu0 %v2059_v38 }
 0xc96   :  { %v2056_v28 = vpop.f32.mrf.mxu0 }
 0xc97   :  { %v3886_v18 = vadd.f32 %v2467_v24, %v2056_v28 }
 0xc99   :  { %v2060_v9 = vmul.f32 %v3886_v18, %v3886_v18 }
 0xc9b   :  { %2063 = vadd.xlane.f32.xlu2 %v2060_v9  ;;  %2091 = vadd.xlane.f32.xlu0 %v2088_v43 }
 0xc9e   :  { %v2261_v54 = vpop.f32.mrf.mxu0 }
 0xc9f   :  { %v3898_v57 = vadd.f32 %v2468_v31, %v2261_v54 }
 0xca1   :  { %2265 = vst [vmem:[#allocation8] sm:$0xff] %v3898_v57  ;;  %v2269_v8 = vsel %vm2268_vm15, %v3898_v57, -3.4028235e+38 }
 0xca2   :  { %2270 = vmax.xlane.f32.xlu1 %v2269_v8  ;;  %2309 = dma.vmem_to_hbm [thread:$0]  %s2305_s10, 128, %s2307_s28, [#allocation9]  }
 0xca6   :  { %v2263_v20 = vpop.f32.mrf.mxu0 }
 0xcb3   :  { %2284 = vperm.xlu2 %2456, %v2451_v25  }
 0xd06   :  { %v2062_v53 = vpop.xlane.xlu0 %2061 }
 0xd07   :  { %v2065_v1 = vmax.f32 %v2062_v53, 1e-24 }
 0xd09   :  { %2487 = vrsqrt.f32 %v2065_v1  ;;  %vm2073_vm6 = vweird.f32 %v2065_v1 }
 0xd0e   :  { %v2064_v50 = vpop.xlane.xlu2 %2063  ;;  %v2092_v63 = vpop.xlane.xlu0 %2091 }
 0xd0f   :  { %v2488_v4 = vpop.eup %2487  ;;  %v2066_v39 = vmax.f32 %v2064_v50, 1e-24  ;;  %v2094_v6 = vmax.f32 %v2092_v63, 1e-24 }
 0xd10   :  { %v2068_v12 = vmul.f32 %v2488_v4, %v2065_v1  ;;  %vm2074_vm2 = vweird.f32 %v2488_v4 }
 0xd11   :  { %2489 = vrsqrt.f32 %v2066_v39  ;;  %vm2075_vm8 = vmor %vm2073_vm6, %vm2074_vm2  ;;  %vm2083_vm9 = vweird.f32 %v2066_v39  ;;  %vm2111_vm11 = vweird.f32 %v2094_v6 }
 0xd12   :  { %v2069_v58 = vmul.f32 %v2488_v4, %v2068_v12  ;;  %2491 = vrsqrt.f32 %v2094_v6 }
 0xd14   :  { %v2070_v16 = vmul.f32 0.5, %v2069_v58 }
 0xd15   :  { %v3907_v41 = vpop.xlane.xlu1 %2270 }
 0xd16   :  { %v2272_v55 = vsub.f32 %v3898_v57, %v3907_v41  ;;  %v2071_v23 = vsub.f32 1.5, %v2070_v16  ;;  %v2285_v43 = vpop.permute.xlu2 %2284 }
 0xd17   :  { %v2490_v33 = vpop.eup %2489  ;;  %vm2286_vm13 = vcmp.eq.s32.totalorder %v3892_v26, %v2285_v43 }
 0xd18   :  { %v2492_v59 = vpop.eup %2491  ;;  %v2078_v60 = vmul.f32 %v2490_v33, %v2066_v39  ;;  %v2273_v37 = vmul.f32 1.442695, %v2272_v55  ;;  %v2072_v2 = vmul.f32 %v2488_v4, %v2071_v23  ;;  %vm2084_vm4 = vweird.f32 %v2490_v33 }
 0xd19   :  { %v2106_v3 = vmul.f32 %v2492_v59, %v2094_v6  ;;  %vm2112_vm7 = vweird.f32 %v2492_v59  ;;  %vm2085_vm10 = vmor %vm2083_vm9, %vm2084_vm4  ;;  %v2287_v31 = vsel %vm2286_vm13, %v3898_v57, 0.0 }
 0xd1a   :  { %v2079_v13 = vmul.f32 %v2490_v33, %v2078_v60  ;;  %2493 = vpow2.f32 %v2273_v37  ;;  %v2076_v5 = vsel %vm2075_vm8, %v2488_v4, %v2072_v2  ;;  %vm2113_vm12 = vmor %vm2111_vm11, %vm2112_vm7 }
 0xd1b   :  { %v2107_v7 = vmul.f32 %v2492_v59, %v2106_v3  ;;  %v2115_v24 = vmul.f32 %v2076_v5, %v3882_v51 }
 0xd1c   :  { %v2080_v62 = vmul.f32 0.5, %v2079_v13 }
 0xd1d   :  { %v2108_v32 = vmul.f32 0.5, %v2107_v7 }
 0xd1e   :  { %v2081_v36 = vsub.f32 1.5, %v2080_v62 }
 0xd1f   :  { %v2109_v48 = vsub.f32 1.5, %v2108_v32 }
 0xd20   :  { %v2494_v17 = vpop.eup %2493  ;;  %v2082_v42 = vmul.f32 %v2490_v33, %v2081_v36 }
 0xd21   :  { %v2275_v29 = vsel %vm2268_vm15, %v2494_v17, 0.0  ;;  %v2110_v10 = vmul.f32 %v2492_v59, %v2109_v48 }
 0xd22   :  { %2276 = vadd.xlane.f32.xlu0 %v2275_v29  ;;  %v2086_v44 = vsel %vm2085_vm10, %v2490_v33, %v2082_v42 }
 0xd23   :  { %v2114_v21 = vsel %vm2113_vm12, %v2492_v59, %v2110_v10  ;;  %v2116_v38 = vmul.f32 %v2086_v44, %v3886_v18 }
 0xd24   :  { %v2118_v56 = vmul.f32 %v2114_v21, %v3877_v40 }
 0xd25   :  { %v2120_v9 = vmul.f32 %v2117_v19, %v2116_v38 }
 0xd26   :  { %v2119_v28 = vmul.f32 %v2118_v56, %v2115_v24 }
 0xd28   :  { %2121 = vadd.xlane.f32.xlu1 %v2119_v28 }
 0xd2a   :  { %2123 = vadd.xlane.f32.xlu0 %v2120_v9 }
 0xd30   :  { %2288 = vadd.xlane.f32.xlu1 %v2287_v31 }
 0xd95   :  { %v2277_v40 = vpop.xlane.xlu0 %2276 }
 0xd96   :  { %2495 = vlog2.f32 %v2277_v40 }
 0xd9b   :  { %v2122_v14 = vpop.xlane.xlu1 %2121 }
 0xd9c   :  { %v2496_v51 = vpop.eup %2495 }
 0xd9d   :  { %v2124_v18 = vpop.xlane.xlu0 %2123  ;;  %v2279_v54 = vmul.f32 0.6931472, %v2496_v51 }
 0xd9e   :  { %v2125_v8 = vadd.f32 %v2124_v18, %v2122_v14 }
 0xd9f   :  { %v2280_v57 = vadd.f32 %v2279_v54, %v3907_v41 }
 0xda0   :  { %v2126_v26 = vrot.slane %v2125_v8, 4 }
 0xda2   :  { %v2127_v15 = vadd.f32 %v2126_v26, %v2125_v8 }
 0xda3   :  { %v2289_v20 = vpop.xlane.xlu1 %2288 }
 0xda4   :  { %v2128_v61 = vrot.slane %v2127_v15, 2  ;;  %v2290_v52 = vsub.f32 %v2280_v57, %v2289_v20 }
 0xda6   :  { %v2129_v34 = vadd.f32 %v2128_v61, %v2127_v15  ;;  %v2291_v25 = vrot.slane %v2290_v52, 4 }
 0xda8   :  { %v2130_v27 = vrot.slane %v2129_v34, 1  ;;  %v2292_v22 = vadd.f32 %v2291_v25, %v2290_v52 }
 0xdaa   :  { %v2293_v53 = vrot.slane %v2292_v22, 2  ;;  %v2131_v1 = vadd.f32 %v2130_v27, %v2129_v34 }
 0xdac   :  { %v2294_v30 = vadd.f32 %v2293_v53, %v2292_v22  ;;  %v2132_v50 = vmul.f32 0.25, %v2131_v1 }
 0xdae   :  { %v2295_v63 = vrot.slane %v2294_v30, 1  ;;  %v2133_v4 = vsub.f32 4.0, %v2132_v50 }
 0xdb0   :  { %2135 = vst.msk [vmem:[#allocation10] sm:$0x1] %vm2134_vm14, %v2133_v4  ;;  %v2296_v46 = vadd.f32 %v2295_v63, %v2294_v30 }
 0xdb1   :  { %2320 = dma.vmem_to_hbm [thread:$0]  %s2316_s29, 16, %s2318_s5, [#allocation11]  }
 0xdb2   :  { %v2297_v39 = vmul.f32 0.125, %v2296_v46 }
 0xdb4   :  { %2298 = vst.msk [vmem:[#allocation12] sm:$0x1] %vm2134_vm14, %v2297_v39 }
 0xdb5   :  { %2331 = dma.vmem_to_hbm [thread:$0]  %s2327_s15, 16, %s2329_s1, [#allocation11]  }
 0xdb6   :  { %2582 = dma.done.wait [#allocation9], 128  }
 0xdb7   :  { %2583 = vsyncadd [#allocation9], 4294967168 }
 0xdb8   :  { %2584 = dma.done.wait [#allocation11], 32  }
 0xdb9   :  { %2585 = vsyncadd [#allocation11], 4294967264 }
 0xdba   :  { %2344 = vsyncpa [#allocation9], 1 }
 0xdbb   :  { %2345 = vsyncpa [#allocation11], 1 }

</bundles_post_ra>
